<compile_context>
chip_gen: v7x
topology: tpu7x:2x2x1
jax: 0.10.0
libtpu: 0.0.40
codegen_flags: <defaults>
</compile_context>

<pallas_src>
import functools

import jax
import jax.numpy as jnp
from jax import lax
from jax.experimental import pallas as pl
from jax.experimental.pallas import tpu as pltpu

EPS = 1e-5
LANE = 128


# ------------------------------ small helpers --------------------------------

def _rup(x, m):
    return (x + m - 1) // m * m


def _vmem_limit_bytes():
    # v5e/v6e have 128 MiB physical VMEM -> allow big tiles; v7x has 64 MiB and
    # unknown targets stay at a conservative 32 MiB.
    try:
        kind = jax.devices()[0].device_kind.lower()
    except Exception:  # pragma: no cover - defensive
        kind = ""
    if "v5" in kind or "v6" in kind:
        return 96 * 1024 * 1024
    return 32 * 1024 * 1024


_VMEM_LIMIT = _vmem_limit_bytes()


def _cparams():
    return pltpu.CompilerParams(
        dimension_semantics=("parallel",),     # every grid step owns its block
        vmem_limit_bytes=_VMEM_LIMIT)


def _pad_axis(a, target, axis):
    if a.shape[axis] == target:
        return a
    pads = [(0, 0)] * a.ndim
    pads[axis] = (0, target - a.shape[axis])
    return jnp.pad(a, pads)


def _choose_tm(m_rows, k, c_total):
    """Largest row tile whose bf16 A (x2 buffers) + resident W + f32 y (x2)
    fits comfortably inside the scoped-VMEM budget."""
    budget = int(_VMEM_LIMIT * 0.7)
    for tm in (2048, 1024, 512, 256, 128):
        if tm > _rup(m_rows, 128):
            continue
        need = (2 * tm * k * 2              # double-buffered bf16 A tile
                + k * c_total * 2           # resident bf16 weights
                + 2 * tm * c_total * 4      # double-buffered f32 y tile
                + 4 * c_total * 8)          # stats blocks
        if need <= budget:
            return tm
    return 128


# --------------------------------- kernels -----------------------------------

def mm_stats_kernel(a_ref, w_ref, y_ref, st_ref):
    """One M-tile of A @ W (bf16 MXU inputs, f32 accumulate) + BN partials."""
    y = jnp.dot(a_ref[...], w_ref[...], preferred_element_type=jnp.float32)
    y_ref[...] = y
    st_ref[...] = jnp.concatenate(
        [jnp.sum(y, axis=0, keepdims=True),
         jnp.sum(y * y, axis=0, keepdims=True)], axis=0)[None]


def conv3x3_s1_stats_kernel(xp_ref, w_ref, y_ref, st_ref):
    """3x3 stride-1 conv on one spatially pre-padded bf16 NHWC image block.

    Implicit im2col: 3 row-band MXU matmuls of depth 3*Cin (f32 accumulate),
    accumulated directly into the VMEM output block.  Also emits per-image
    BatchNorm partial statistics (sum, sum of squares).
    """
    _, ho, wo, cout = y_ref.shape
    for di in range(3):                                  # short fixed, unrolled
        band = xp_ref[0, di:di + ho]                     # (ho, wp, cin) bf16
        a = jnp.concatenate(
            [band[:, 0:wo], band[:, 1:wo + 1], band[:, 2:wo + 2]],
            axis=-1).reshape(ho * wo, -1)                # (ho*wo, 3*cin) bf16
        contrib = jnp.dot(a, w_ref[di],
                          preferred_element_type=jnp.float32
                          ).reshape(1, ho, wo, cout)
        if di == 0:
            y_ref[...] = contrib
        else:
            y_ref[...] = y_ref[...] + contrib
    y = y_ref[...].reshape(ho * wo, cout)
    st_ref[...] = jnp.concatenate(
        [jnp.sum(y, axis=0, keepdims=True),
         jnp.sum(y * y, axis=0, keepdims=True)], axis=0)[None]


def bn_relu_pad_kernel(y_ref, sb_ref, o_ref):
    """h = relu(y*scale + shift), stored bf16 into a zero spatial-padded block."""
    _, ho, wo, c = y_ref.shape
    sb = sb_ref[...]                                     # (2, c) f32
    h = jnp.maximum(y_ref[0].reshape(ho * wo, c) * sb[0:1, :] + sb[1:2, :], 0.0)
    o_ref[...] = jnp.zeros(o_ref.shape, o_ref.dtype)
    o_ref[0, 1:1 + ho, 1:1 + wo, :] = h.reshape(ho, wo, c).astype(o_ref.dtype)


def bn_add_relu_kernel(y_ref, r_ref, sb_ref, o_ref):
    """out = relu(y*s_main + r*s_res + shift)  (BN2 + shortcut + ReLU)."""
    _, ho, wo, c = y_ref.shape
    sb = sb_ref[...]                                     # (3, c) f32
    y = y_ref[0].reshape(ho * wo, c)
    r = r_ref[0].reshape(ho * wo, c).astype(jnp.float32)
    o = jnp.maximum(y * sb[0:1, :] + r * sb[1:2, :] + sb[2:3, :], 0.0)
    o_ref[...] = o.reshape(1, ho, wo, c)


# ----------------------------- pallas_call wrappers ---------------------------

def _mm_stats(a_b, w_b, tm):
    m_pad, k = a_b.shape
    c = w_b.shape[1]
    nt = m_pad // tm
    y, st = pl.pallas_call(
        mm_stats_kernel,
        out_shape=(jax.ShapeDtypeStruct((m_pad, c), jnp.float32),
                   jax.ShapeDtypeStruct((nt, 2, c), jnp.float32)),
        grid=(nt,),
        in_specs=[pl.BlockSpec((tm, k), lambda i: (i, 0)),
                  pl.BlockSpec((k, c), lambda i: (0, 0))],   # weights resident
        out_specs=(pl.BlockSpec((tm, c), lambda i: (i, 0)),
                   pl.BlockSpec((1, 2, c), lambda i: (i, 0, 0))),
        compiler_params=_cparams(),
    )(a_b, w_b)
    return y, st[:, 0, :].sum(axis=0), st[:, 1, :].sum(axis=0)


def _conv3x3_s1_stats(xp_b, w_rows_b, ho, wo):
    n, hp, wp, cin = xp_b.shape
    k3, c = w_rows_b.shape[1], w_rows_b.shape[2]
    y, st = pl.pallas_call(
        conv3x3_s1_stats_kernel,
        out_shape=(jax.ShapeDtypeStruct((n, ho, wo, c), jnp.float32),
                   jax.ShapeDtypeStruct((n, 2, c), jnp.float32)),
        grid=(n,),
        in_specs=[pl.BlockSpec((1, hp, wp, cin), lambda i: (i, 0, 0, 0)),
                  pl.BlockSpec((3, k3, c), lambda i: (0, 0, 0))],
        out_specs=(pl.BlockSpec((1, ho, wo, c), lambda i: (i, 0, 0, 0)),
                   pl.BlockSpec((1, 2, c), lambda i: (i, 0, 0))),
        compiler_params=_cparams(),
    )(xp_b, w_rows_b)
    return y, st[:, 0, :].sum(axis=0), st[:, 1, :].sum(axis=0)


def _bn_relu_pad(y_img, col_block, scale, shift):
    n, ho, wo, _ = y_img.shape
    c = scale.shape[0]
    sb = jnp.stack([scale, shift], axis=0)               # (2, c)
    return pl.pallas_call(
        bn_relu_pad_kernel,
        out_shape=jax.ShapeDtypeStruct((n, ho + 2, wo + 2, c), jnp.bfloat16),
        grid=(n,),
        in_specs=[pl.BlockSpec((1, ho, wo, c), lambda i: (i, 0, 0, col_block)),
                  pl.BlockSpec((2, c), lambda i: (0, 0))],
        out_specs=pl.BlockSpec((1, ho + 2, wo + 2, c), lambda i: (i, 0, 0, 0)),
        compiler_params=_cparams(),
    )(y_img, sb)


def _bn_add_relu(y_img, r_img, r_col, sb3):
    n, ho, wo, c = y_img.shape
    return pl.pallas_call(
        bn_add_relu_kernel,
        out_shape=jax.ShapeDtypeStruct((n, ho, wo, c), jnp.float32),
        grid=(n,),
        in_specs=[pl.BlockSpec((1, ho, wo, c), lambda i: (i, 0, 0, 0)),
                  pl.BlockSpec((1, ho, wo, c), lambda i: (i, 0, 0, r_col)),
                  pl.BlockSpec((3, c), lambda i: (0, 0))],
        out_specs=pl.BlockSpec((1, ho, wo, c), lambda i: (i, 0, 0, 0)),
        compiler_params=_cparams(),
    )(y_img, r_img, sb3)


# ------------------------------ JAX-side glue ---------------------------------

def _w3x3_rows(w_oihw, cin_p, cout_p):
    # (O, I, 3, 3) -> (3, 3*Cin_p, Cout_p); row band di, columns [dj*cin_p + ci]
    w = jnp.transpose(w_oihw, (2, 3, 1, 0))              # (3, 3, I, O)
    w = _pad_axis(_pad_axis(w, cin_p, 2), cout_p, 3)
    return w.reshape(3, 3 * cin_p, cout_p)


def _w1x1_mat(w_oi11, cin_p, cout_p):
    o, i = w_oi11.shape[:2]
    w = w_oi11.reshape(o, i).T                           # (I, O)
    return _pad_axis(_pad_axis(w, cin_p, 0), cout_p, 1)


def _im2col_3x3(xp_b, stride, ho, wo):
    # Only used for the strided conv1; emitted in bf16 (xp_b is bf16).
    n = xp_b.shape[0]
    cols = []
    for di in range(3):
        for dj in range(3):
            cols.append(xp_b[:, di:di + stride * (ho - 1) + 1:stride,
                             dj:dj + stride * (wo - 1) + 1:stride, :])
    return jnp.concatenate(cols, axis=-1).reshape(n * ho * wo, -1)


def _bn_fold(su, sq, count, gamma_p, beta_p):
    # Training-mode BN constants from single-pass sum / sum-of-squares:
    #   bn(y) = y * scale + shift
    mean = su / count
    var = jnp.maximum(sq / count - mean * mean, 0.0)
    scale = gamma_p * lax.rsqrt(var + EPS)
    shift = beta_p - mean * scale
    return scale, shift


@functools.partial(jax.jit, static_argnames=("stride",))
def residual_block_forward(x_nchw, params, stride):
    n, in_c, h, w = x_nchw.shape
    out_c = params["w1"].shape[0]
    ho = (h + 2 - 3) // stride + 1
    wo = (w + 2 - 3) // stride + 1
    m = n * ho * wo
    cin_p = _rup(in_c, LANE)
    cout_p = _rup(out_c, LANE)
    has_proj = (stride != 1) or (in_c != out_c)

    # NCHW -> NHWC once; bf16 for everything the MXU consumes, f32 residual.
    x_nhwc = jnp.transpose(x_nchw, (0, 2, 3, 1))                  # f32
    x_c = _pad_axis(x_nhwc, cin_p, 3).astype(jnp.bfloat16)        # (N,H,W,Cin_p)
    xp = jnp.pad(x_c, ((0, 0), (1, 1), (1, 1), (0, 0)))           # spatial pad

    g1 = _pad_axis(params["g1"], cout_p, 0)
    b1 = _pad_axis(params["b1"], cout_p, 0)
    g2 = _pad_axis(params["g2"], cout_p, 0)
    b2 = _pad_axis(params["b2"], cout_p, 0)

    w1_rows = _w3x3_rows(params["w1"], cin_p, cout_p)             # (3,3cin_p,cout_p)
    w2_rows = _w3x3_rows(params["w2"], cout_p, cout_p).astype(jnp.bfloat16)

    # ---- conv1 (+ fused 1x1 projection shortcut as extra output columns) ----
    if stride == 1:
        if has_proj:
            ws_rows = jnp.zeros((3, 3 * cin_p, cout_p), jnp.float32)
            ws_rows = ws_rows.at[1, cin_p:2 * cin_p, :].set(      # centre tap
                _w1x1_mat(params["ws"], cin_p, cout_p))
            w1c = jnp.concatenate([w1_rows, ws_rows], axis=2)     # 2*cout_p cols
        else:
            w1c = w1_rows
        y1_img, su_c, sq_c = _conv3x3_s1_stats(
            xp, w1c.astype(jnp.bfloat16), ho, wo)
    else:
        # Strided conv1: bf16 im2col + shortcut folded on the centre tap.
        a1 = _im2col_3x3(xp, stride, ho, wo)                      # (m, 9*cin_p) bf16
        k = a1.shape[1]
        w1_flat = w1_rows.reshape(9 * cin_p, cout_p)
        ws_flat = jnp.zeros((9 * cin_p, cout_p), jnp.float32)
        ws_flat = ws_flat.at[4 * cin_p:5 * cin_p, :].set(
            _w1x1_mat(params["ws"], cin_p, cout_p))
        w1c = jnp.concatenate([w1_flat, ws_flat], axis=1).astype(jnp.bfloat16)
        c_total = w1c.shape[1]
        tm = _choose_tm(m, k, c_total)
        m_pad = _rup(m, tm)
        if m_pad != m:                                            # zero rows keep stats exact
            a1 = jnp.pad(a1, ((0, m_pad - m), (0, 0)))
        yc, su_c, sq_c = _mm_stats(a1, w1c, tm)
        y1_img = yc[:m].reshape(n, ho, wo, c_total)

    # ---- BN1 + ReLU -> bf16 h1 written directly in padded layout ----
    s1, t1 = _bn_fold(su_c[:cout_p], sq_c[:cout_p], m, g1, b1)
    h1p = _bn_relu_pad(y1_img, 0, s1, t1)                         # (n,ho+2,wo+2,cout_p) bf16

    # ---- conv2 (implicit im2col, stride 1) + BN2 partial stats ----
    y2_img, su2, sq2 = _conv3x3_s1_stats(h1p, w2_rows, ho, wo)
    s2, t2 = _bn_fold(su2, sq2, m, g2, b2)

    # ---- shortcut scale/shift ----
    if has_proj:
        gs = _pad_axis(params["gs"], cout_p, 0)
        bs = _pad_axis(params["bs"], cout_p, 0)
        sr, tr = _bn_fold(su_c[cout_p:], sq_c[cout_p:], m, gs, bs)
        r_img, r_col = y1_img, 1                                  # projection columns
    else:
        sr = jnp.ones((cout_p,), jnp.float32)
        tr = jnp.zeros((cout_p,), jnp.float32)
        r_img, r_col = _pad_axis(x_nhwc, cout_p, 3), 0            # exact f32 identity

    # ---- BN2 + shortcut + ReLU ----
    sb3 = jnp.stack([s2, sr, t2 + tr], axis=0)                    # (3, cout_p)
    out_img = _bn_add_relu(y2_img, r_img, r_col, sb3)             # (n,ho,wo,cout_p) f32
    out = out_img[..., :out_c]
    return jnp.transpose(out, (0, 3, 1, 2))                       # back to NCHW


# ----------------------------- pure-JAX reference -----------------------------

def _ref_forward(x, p, stride):
    dn = ("NCHW", "OIHW", "NCHW")

    def conv(x, w, s, pad):
        return lax.conv_general_dilated(x, w, (s, s), ((pad, pad), (pad, pad)),
                                        dimension_numbers=dn)

    def bn(y, g, b):
        mean = y.mean(axis=(0, 2, 3), keepdims=True)
        var = ((y - mean) ** 2).mean(axis=(0, 2, 3), keepdims=True)
        return ((y - mean) * lax.rsqrt(var + EPS)
                * g.reshape(1, -1, 1, 1) + b.reshape(1, -1, 1, 1))

    out = jnp.maximum(bn(conv(x, p["w1"], stride, 1), p["g1"], p["b1"]), 0.0)
    out = bn(conv(out, p["w2"], 1, 1), p["g2"], p["b2"])
    if (stride != 1) or (x.shape[1] != p["w1"].shape[0]):
        sc = bn(conv(x, p["ws"], stride, 0), p["gs"], p["bs"])
    else:
        sc = x
    return jnp.maximum(out + sc, 0.0)


# ---------------------------------- params ------------------------------------

def make_params(key, in_c, out_c, stride):
    ks = jax.random.split(key, 8)
    p = {
        "w1": 0.1 * jax.random.normal(ks[0], (out_c, in_c, 3, 3), jnp.float32),
        "g1": 1.0 + 0.1 * jax.random.normal(ks[1], (out_c,), jnp.float32),
        "b1": 0.1 * jax.random.normal(ks[2], (out_c,), jnp.float32),
        "w2": 0.1 * jax.random.normal(ks[3], (out_c, out_c, 3, 3), jnp.float32),
        "g2": 1.0 + 0.1 * jax.random.normal(ks[4], (out_c,), jnp.float32),
        "b2": 0.1 * jax.random.normal(ks[5], (out_c,), jnp.float32),
    }
    if (stride != 1) or (in_c != out_c):
        p["ws"] = 0.1 * jax.random.normal(ks[6], (out_c, in_c, 1, 1), jnp.float32)
        p["gs"] = jnp.ones((out_c,), jnp.float32)
        p["bs"] = 0.1 * jax.random.normal(ks[7], (out_c,), jnp.float32)
    return p


# ----------------------------------- main --------------------------------------

if __name__ == "__main__":
    key = jax.random.PRNGKey(0)
    k_x1, k_p1, k_x2, k_p2 = jax.random.split(key, 4)

    # bf16 MXU inputs (f32 accumulation) vs. an all-f32 reference.
    RTOL = ATOL = 3e-2

    # Case 1: downsampling block with projection shortcut (stride 2)
    x1 = jax.random.normal(k_x1, (2, 4, 16, 16), jnp.float32)
    p1 = make_params(k_p1, in_c=4, out_c=8, stride=2)
    out1 = jax.block_until_ready(residual_block_forward(x1, p1, stride=2))
    ref1 = _ref_forward(x1, p1, stride=2)
    assert out1.shape == (2, 8, 8, 8)
    assert bool(jnp.allclose(out1, ref1, rtol=RTOL, atol=ATOL)), \
        f"case1 max err {float(jnp.max(jnp.abs(out1 - ref1)))}"

    # Case 2: identity shortcut (stride 1, in_c == out_c)
    x2 = jax.random.normal(k_x2, (2, 8, 16, 16), jnp.float32)
    p2 = make_params(k_p2, in_c=8, out_c=8, stride=1)
    out2 = jax.block_until_ready(residual_block_forward(x2, p2, stride=1))
    ref2 = _ref_forward(x2, p2, stride=1)
    assert out2.shape == (2, 8, 16, 16)
    assert bool(jnp.allclose(out2, ref2, rtol=RTOL, atol=ATOL)), \
        f"case2 max err {float(jnp.max(jnp.abs(out2 - ref2)))}"

    print("KERNEL_OK")
</pallas_src>

<mosaic_0001>
module attributes {stable_mosaic.version = 11 : i64} {
  func.func @mm_stats_kernel(%arg0: i32, %arg1: memref<128x1152xbf16, #tpu.memory_space<vmem>>, %arg2: memref<1152x256xbf16, #tpu.memory_space<vmem>>, %arg3: memref<128x256xf32, #tpu.memory_space<vmem>>, %arg4: memref<1x2x256xf32, #tpu.memory_space<vmem>>) attributes {dimension_semantics = [#tpu.dimension_semantics<parallel>], iteration_bounds = array<i64: 1>, scalar_prefetch = 0 : i64, scratch_operands = 0 : i64, tpu.core_type = #tpu.core_type<tc>, window_params = [{transform_indices = @transform_0, window_bounds = array<i64: 128, 1152>}, {pipeline_mode = #tpu.pipeline_mode<synchronous>, transform_indices = @transform_1, window_bounds = array<i64: 1152, 256>}, {transform_indices = @transform_2, window_bounds = array<i64: 128, 256>}, {transform_indices = @transform_3, window_bounds = array<i64: 1, 2, 256>}]} {
    %c0 = arith.constant 0 : index
    %c0_0 = arith.constant 0 : index
    %0 = vector.load %arg1[%c0, %c0_0] : memref<128x1152xbf16, #tpu.memory_space<vmem>>, vector<128x1152xbf16>
    %c0_1 = arith.constant 0 : index
    %c0_2 = arith.constant 0 : index
    %1 = vector.load %arg2[%c0_1, %c0_2] : memref<1152x256xbf16, #tpu.memory_space<vmem>>, vector<1152x256xbf16>
    %cst = arith.constant dense<0.000000e+00> : vector<128x256xf32>
    %2 = tpu.matmul %0, %1, %cst {dimension_numbers = #tpu.dot_dimension_numbers<[1], [0], [0], [1], [0, 0, 1, 1], [], []>} : vector<128x1152xbf16>, vector<1152x256xbf16>, vector<128x256xf32> -> vector<128x256xf32>
    %c0_3 = arith.constant 0 : index
    %c0_4 = arith.constant 0 : index
    %3 = vector.load %arg3[%c0_3, %c0_4] : memref<128x256xf32, #tpu.memory_space<vmem>>, vector<128x256xf32>
    tpu.vector_store %arg3[%c0_3, %c0_4], %2 {strides = array<i32>} : memref<128x256xf32, #tpu.memory_space<vmem>>, vector<128x256xf32>,
    %cst_5 = arith.constant dense<0.000000e+00> : vector<256xf32>
    %4 = vector.multi_reduction <add>, %2, %cst_5 [0] : vector<128x256xf32> to vector<256xf32>
    %5 = vector.shape_cast %4 : vector<256xf32> to vector<1x256xf32>
    %6 = arith.mulf %2, %2 : vector<128x256xf32>
    %cst_6 = arith.constant dense<0.000000e+00> : vector<256xf32>
    %7 = vector.multi_reduction <add>, %6, %cst_6 [0] : vector<128x256xf32> to vector<256xf32>
    %8 = vector.shape_cast %7 : vector<256xf32> to vector<1x256xf32>
    %9 = tpu.concatenate %5, %8 in 0 : vector<1x256xf32>, vector<1x256xf32> -> vector<2x256xf32>
    %10 = vector.shape_cast %9 : vector<2x256xf32> to vector<1x2x256xf32>
    %c0_7 = arith.constant 0 : index
    %c0_8 = arith.constant 0 : index
    %c0_9 = arith.constant 0 : index
    %11 = vector.load %arg4[%c0_7, %c0_8, %c0_9] : memref<1x2x256xf32, #tpu.memory_space<vmem>>, vector<1x2x256xf32>
    tpu.vector_store %arg4[%c0_7, %c0_8, %c0_9], %10 {strides = array<i32>} : memref<1x2x256xf32, #tpu.memory_space<vmem>>, vector<1x2x256xf32>,
    return
  }
  func.func @transform_0(%arg0: i32) -> (i32, i32) {
    %c0_i32 = arith.constant 0 : i32
    %c0_i32_0 = arith.constant 0 : i32
    return %arg0, %c0_i32 : i32, i32
  }
  func.func @transform_1(%arg0: i32) -> (i32, i32) {
    %c0_i32 = arith.constant 0 : i32
    %c0_i32_0 = arith.constant 0 : i32
    %c0_i32_1 = arith.constant 0 : i32
    return %c0_i32, %c0_i32_0 : i32, i32
  }
  func.func @transform_2(%arg0: i32) -> (i32, i32) {
    %c0_i32 = arith.constant 0 : i32
    %c0_i32_0 = arith.constant 0 : i32
    return %arg0, %c0_i32 : i32, i32
  }
  func.func @transform_3(%arg0: i32) -> (i32, i32, i32) {
    %c0_i32 = arith.constant 0 : i32
    %c0_i32_0 = arith.constant 0 : i32
    %c0_i32_1 = arith.constant 0 : i32
    return %arg0, %c0_i32, %c0_i32_0 : i32, i32, i32
  }
}

module attributes {stable_mosaic.version = 11 : i64} {
  func.func @bn_relu_pad_kernel(%arg0: i32, %arg1: memref<1x8x8x128xf32, #tpu.memory_space<vmem>>, %arg2: memref<2x128xf32, #tpu.memory_space<vmem>>, %arg3: memref<1x10x10x128xbf16, #tpu.memory_space<vmem>>) attributes {dimension_semantics = [#tpu.dimension_semantics<parallel>], iteration_bounds = array<i64: 2>, scalar_prefetch = 0 : i64, scratch_operands = 0 : i64, tpu.core_type = #tpu.core_type<tc>, window_params = [{transform_indices = @transform_0, window_bounds = array<i64: 1, 8, 8, 128>}, {pipeline_mode = #tpu.pipeline_mode<synchronous>, transform_indices = @transform_1, window_bounds = array<i64: 2, 128>}, {transform_indices = @transform_2, window_bounds = array<i64: 1, 10, 10, 128>}]} {
    %c0 = arith.constant 0 : index
    %c0_0 = arith.constant 0 : index
    %0 = vector.load %arg2[%c0, %c0_0] : memref<2x128xf32, #tpu.memory_space<vmem>>, vector<2x128xf32>
    %c0_1 = arith.constant 0 : index
    %c0_2 = arith.constant 0 : index
    %c0_3 = arith.constant 0 : index
    %c0_4 = arith.constant 0 : index
    %1 = vector.load %arg1[%c0_1, %c0_2, %c0_3, %c0_4] : memref<1x8x8x128xf32, #tpu.memory_space<vmem>>, vector<1x8x8x128xf32>
    %2 = vector.shape_cast %1 : vector<1x8x8x128xf32> to vector<8x8x128xf32>
    %3 = vector.shape_cast %2 : vector<8x8x128xf32> to vector<64x128xf32>
    %4 = vector.extract_strided_slice %0 {offsets = [0, 0], sizes = [1, 128], strides = [1, 1]} : vector<2x128xf32> to vector<1x128xf32>
    %5 = vector.broadcast %4 : vector<1x128xf32> to vector<64x128xf32>
    %6 = arith.mulf %3, %5 : vector<64x128xf32>
    %7 = vector.extract_strided_slice %0 {offsets = [1, 0], sizes = [1, 128], strides = [1, 1]} : vector<2x128xf32> to vector<1x128xf32>
    %8 = vector.broadcast %7 : vector<1x128xf32> to vector<64x128xf32>
    %9 = arith.addf %6, %8 : vector<64x128xf32>
    %cst = arith.constant 0.000000e+00 : f32
    %10 = vector.broadcast %cst : f32 to vector<64x128xf32>
    %11 = arith.maximumf %9, %10 : vector<64x128xf32>
    %cst_5 = arith.constant 0.000000e+00 : bf16
    %12 = vector.broadcast %cst_5 : bf16 to vector<1x10x10x128xbf16>
    %c0_6 = arith.constant 0 : index
    %c0_7 = arith.constant 0 : index
    %c0_8 = arith.constant 0 : index
    %c0_9 = arith.constant 0 : index
    %13 = vector.load %arg3[%c0_6, %c0_7, %c0_8, %c0_9] : memref<1x10x10x128xbf16, #tpu.memory_space<vmem>>, vector<1x10x10x128xbf16>
    tpu.vector_store %arg3[%c0_6, %c0_7, %c0_8, %c0_9], %12 {strides = array<i32>} : memref<1x10x10x128xbf16, #tpu.memory_space<vmem>>, vector<1x10x10x128xbf16>,
    %14 = vector.shape_cast %11 : vector<64x128xf32> to vector<8x8x128xf32>
    %15 = arith.truncf %14 : vector<8x8x128xf32> to vector<8x8x128xbf16>
    %c0_10 = arith.constant 0 : index
    %c1 = arith.constant 1 : index
    %c1_11 = arith.constant 1 : index
    %c0_12 = arith.constant 0 : index
    %16 = vector.load %arg3[%c0_10, %c1, %c1_11, %c0_12] : memref<1x10x10x128xbf16, #tpu.memory_space<vmem>>, vector<1x8x8x128xbf16>
    %17 = vector.shape_cast %16 : vector<1x8x8x128xbf16> to vector<8x8x128xbf16>
    %18 = vector.shape_cast %15 : vector<8x8x128xbf16> to vector<1x8x8x128xbf16>
    tpu.vector_store %arg3[%c0_10, %c1, %c1_11, %c0_12], %18 {strides = array<i32>} : memref<1x10x10x128xbf16, #tpu.memory_space<vmem>>, vector<1x8x8x128xbf16>,
    return
  }
  func.func @transform_0(%arg0: i32) -> (i32, i32, i32, i32) {
    %c0_i32 = arith.constant 0 : i32
    %c0_i32_0 = arith.constant 0 : i32
    %c0_i32_1 = arith.constant 0 : i32
    %c0_i32_2 = arith.constant 0 : i32
    return %arg0, %c0_i32, %c0_i32_0, %c0_i32_1 : i32, i32, i32, i32
  }
  func.func @transform_1(%arg0: i32) -> (i32, i32) {
    %c0_i32 = arith.constant 0 : i32
    %c0_i32_0 = arith.constant 0 : i32
    %c0_i32_1 = arith.constant 0 : i32
    return %c0_i32, %c0_i32_0 : i32, i32
  }
  func.func @transform_2(%arg0: i32) -> (i32, i32, i32, i32) {
    %c0_i32 = arith.constant 0 : i32
    %c0_i32_0 = arith.constant 0 : i32
    %c0_i32_1 = arith.constant 0 : i32
    %c0_i32_2 = arith.constant 0 : i32
    return %arg0, %c0_i32, %c0_i32_0, %c0_i32_1 : i32, i32, i32, i32
  }
}

module attributes {stable_mosaic.version = 11 : i64} {
  func.func @conv3x3_s1_stats_kernel(%arg0: i32, %arg1: memref<1x10x10x128xbf16, #tpu.memory_space<vmem>>, %arg2: memref<3x384x128xbf16, #tpu.memory_space<vmem>>, %arg3: memref<1x8x8x128xf32, #tpu.memory_space<vmem>>, %arg4: memref<1x2x128xf32, #tpu.memory_space<vmem>>) attributes {dimension_semantics = [#tpu.dimension_semantics<parallel>], iteration_bounds = array<i64: 2>, scalar_prefetch = 0 : i64, scratch_operands = 0 : i64, tpu.core_type = #tpu.core_type<tc>, window_params = [{transform_indices = @transform_0, window_bounds = array<i64: 1, 10, 10, 128>}, {pipeline_mode = #tpu.pipeline_mode<synchronous>, transform_indices = @transform_1, window_bounds = array<i64: 3, 384, 128>}, {transform_indices = @transform_2, window_bounds = array<i64: 1, 8, 8, 128>}, {transform_indices = @transform_3, window_bounds = array<i64: 1, 2, 128>}]} {
    %c0 = arith.constant 0 : index
    %c0_0 = arith.constant 0 : index
    %c0_1 = arith.constant 0 : index
    %c0_2 = arith.constant 0 : index
    %0 = vector.load %arg1[%c0, %c0_0, %c0_1, %c0_2] : memref<1x10x10x128xbf16, #tpu.memory_space<vmem>>, vector<1x8x10x128xbf16>
    %1 = vector.shape_cast %0 : vector<1x8x10x128xbf16> to vector<8x10x128xbf16>
    %2 = vector.extract_strided_slice %1 {offsets = [0, 0, 0], sizes = [8, 8, 128], strides = [1, 1, 1]} : vector<8x10x128xbf16> to vector<8x8x128xbf16>
    %3 = vector.extract_strided_slice %1 {offsets = [0, 1, 0], sizes = [8, 8, 128], strides = [1, 1, 1]} : vector<8x10x128xbf16> to vector<8x8x128xbf16>
    %4 = vector.extract_strided_slice %1 {offsets = [0, 2, 0], sizes = [8, 8, 128], strides = [1, 1, 1]} : vector<8x10x128xbf16> to vector<8x8x128xbf16>
    %5 = tpu.concatenate %2, %3, %4 in 2 : vector<8x8x128xbf16>, vector<8x8x128xbf16>, vector<8x8x128xbf16> -> vector<8x8x384xbf16>
    %6 = vector.shape_cast %5 : vector<8x8x384xbf16> to vector<64x384xbf16>
    %c0_3 = arith.constant 0 : index
    %c0_4 = arith.constant 0 : index
    %c0_5 = arith.constant 0 : index
    %7 = vector.load %arg2[%c0_3, %c0_4, %c0_5] : memref<3x384x128xbf16, #tpu.memory_space<vmem>>, vector<1x384x128xbf16>
    %8 = vector.shape_cast %7 : vector<1x384x128xbf16> to vector<384x128xbf16>
    %cst = arith.constant dense<0.000000e+00> : vector<64x128xf32>
    %9 = tpu.matmul %6, %8, %cst {dimension_numbers = #tpu.dot_dimension_numbers<[1], [0], [0], [1], [0, 0, 1, 1], [], []>} : vector<64x384xbf16>, vector<384x128xbf16>, vector<64x128xf32> -> vector<64x128xf32>
    %10 = vector.shape_cast %9 : vector<64x128xf32> to vector<1x8x8x128xf32>
    %c0_6 = arith.constant 0 : index
    %c0_7 = arith.constant 0 : index
    %c0_8 = arith.constant 0 : index
    %c0_9 = arith.constant 0 : index
    %11 = vector.load %arg3[%c0_6, %c0_7, %c0_8, %c0_9] : memref<1x8x8x128xf32, #tpu.memory_space<vmem>>, vector<1x8x8x128xf32>
    tpu.vector_store %arg3[%c0_6, %c0_7, %c0_8, %c0_9], %10 {strides = array<i32>} : memref<1x8x8x128xf32, #tpu.memory_space<vmem>>, vector<1x8x8x128xf32>,
    %c0_10 = arith.constant 0 : index
    %c1 = arith.constant 1 : index
    %c0_11 = arith.constant 0 : index
    %c0_12 = arith.constant 0 : index
    %12 = vector.load %arg1[%c0_10, %c1, %c0_11, %c0_12] : memref<1x10x10x128xbf16, #tpu.memory_space<vmem>>, vector<1x8x10x128xbf16>
    %13 = vector.shape_cast %12 : vector<1x8x10x128xbf16> to vector<8x10x128xbf16>
    %14 = vector.extract_strided_slice %13 {offsets = [0, 0, 0], sizes = [8, 8, 128], strides = [1, 1, 1]} : vector<8x10x128xbf16> to vector<8x8x128xbf16>
    %15 = vector.extract_strided_slice %13 {offsets = [0, 1, 0], sizes = [8, 8, 128], strides = [1, 1, 1]} : vector<8x10x128xbf16> to vector<8x8x128xbf16>
    %16 = vector.extract_strided_slice %13 {offsets = [0, 2, 0], sizes = [8, 8, 128], strides = [1, 1, 1]} : vector<8x10x128xbf16> to vector<8x8x128xbf16>
    %17 = tpu.concatenate %14, %15, %16 in 2 : vector<8x8x128xbf16>, vector<8x8x128xbf16>, vector<8x8x128xbf16> -> vector<8x8x384xbf16>
    %18 = vector.shape_cast %17 : vector<8x8x384xbf16> to vector<64x384xbf16>
    %c1_13 = arith.constant 1 : index
    %c0_14 = arith.constant 0 : index
    %c0_15 = arith.constant 0 : index
    %19 = vector.load %arg2[%c1_13, %c0_14, %c0_15] : memref<3x384x128xbf16, #tpu.memory_space<vmem>>, vector<1x384x128xbf16>
    %20 = vector.shape_cast %19 : vector<1x384x128xbf16> to vector<384x128xbf16>
    %cst_16 = arith.constant dense<0.000000e+00> : vector<64x128xf32>
    %21 = tpu.matmul %18, %20, %cst_16 {dimension_numbers = #tpu.dot_dimension_numbers<[1], [0], [0], [1], [0, 0, 1, 1], [], []>} : vector<64x384xbf16>, vector<384x128xbf16>, vector<64x128xf32> -> vector<64x128xf32>
    %22 = vector.shape_cast %21 : vector<64x128xf32> to vector<1x8x8x128xf32>
    %c0_17 = arith.constant 0 : index
    %c0_18 = arith.constant 0 : index
    %c0_19 = arith.constant 0 : index
    %c0_20 = arith.constant 0 : index
    %23 = vector.load %arg3[%c0_17, %c0_18, %c0_19, %c0_20] : memref<1x8x8x128xf32, #tpu.memory_space<vmem>>, vector<1x8x8x128xf32>
    %24 = arith.addf %23, %22 : vector<1x8x8x128xf32>
    %c0_21 = arith.constant 0 : index
    %c0_22 = arith.constant 0 : index
    %c0_23 = arith.constant 0 : index
    %c0_24 = arith.constant 0 : index
    %25 = vector.load %arg3[%c0_21, %c0_22, %c0_23, %c0_24] : memref<1x8x8x128xf32, #tpu.memory_space<vmem>>, vector<1x8x8x128xf32>
    tpu.vector_store %arg3[%c0_21, %c0_22, %c0_23, %c0_24], %24 {strides = array<i32>} : memref<1x8x8x128xf32, #tpu.memory_space<vmem>>, vector<1x8x8x128xf32>,
    %c0_25 = arith.constant 0 : index
    %c2 = arith.constant 2 : index
    %c0_26 = arith.constant 0 : index
    %c0_27 = arith.constant 0 : index
    %26 = vector.load %arg1[%c0_25, %c2, %c0_26, %c0_27] : memref<1x10x10x128xbf16, #tpu.memory_space<vmem>>, vector<1x8x10x128xbf16>
    %27 = vector.shape_cast %26 : vector<1x8x10x128xbf16> to vector<8x10x128xbf16>
    %28 = vector.extract_strided_slice %27 {offsets = [0, 0, 0], sizes = [8, 8, 128], strides = [1, 1, 1]} : vector<8x10x128xbf16> to vector<8x8x128xbf16>
    %29 = vector.extract_strided_slice %27 {offsets = [0, 1, 0], sizes = [8, 8, 128], strides = [1, 1, 1]} : vector<8x10x128xbf16> to vector<8x8x128xbf16>
    %30 = vector.extract_strided_slice %27 {offsets = [0, 2, 0], sizes = [8, 8, 128], strides = [1, 1, 1]} : vector<8x10x128xbf16> to vector<8x8x128xbf16>
    %31 = tpu.concatenate %28, %29, %30 in 2 : vector<8x8x128xbf16>, vector<8x8x128xbf16>, vector<8x8x128xbf16> -> vector<8x8x384xbf16>
    %32 = vector.shape_cast %31 : vector<8x8x384xbf16> to vector<64x384xbf16>
    %c2_28 = arith.constant 2 : index
    %c0_29 = arith.constant 0 : index
    %c0_30 = arith.constant 0 : index
    %33 = vector.load %arg2[%c2_28, %c0_29, %c0_30] : memref<3x384x128xbf16, #tpu.memory_space<vmem>>, vector<1x384x128xbf16>
    %34 = vector.shape_cast %33 : vector<1x384x128xbf16> to vector<384x128xbf16>
    %cst_31 = arith.constant dense<0.000000e+00> : vector<64x128xf32>
    %35 = tpu.matmul %32, %34, %cst_31 {dimension_numbers = #tpu.dot_dimension_numbers<[1], [0], [0], [1], [0, 0, 1, 1], [], []>} : vector<64x384xbf16>, vector<384x128xbf16>, vector<64x128xf32> -> vector<64x128xf32>
    %36 = vector.shape_cast %35 : vector<64x128xf32> to vector<1x8x8x128xf32>
    %c0_32 = arith.constant 0 : index
    %c0_33 = arith.constant 0 : index
    %c0_34 = arith.constant 0 : index
    %c0_35 = arith.constant 0 : index
    %37 = vector.load %arg3[%c0_32, %c0_33, %c0_34, %c0_35] : memref<1x8x8x128xf32, #tpu.memory_space<vmem>>, vector<1x8x8x128xf32>
    %38 = arith.addf %37, %36 : vector<1x8x8x128xf32>
    %c0_36 = arith.constant 0 : index
    %c0_37 = arith.constant 0 : index
    %c0_38 = arith.constant 0 : index
    %c0_39 = arith.constant 0 : index
    %39 = vector.load %arg3[%c0_36, %c0_37, %c0_38, %c0_39] : memref<1x8x8x128xf32, #tpu.memory_space<vmem>>, vector<1x8x8x128xf32>
    tpu.vector_store %arg3[%c0_36, %c0_37, %c0_38, %c0_39], %38 {strides = array<i32>} : memref<1x8x8x128xf32, #tpu.memory_space<vmem>>, vector<1x8x8x128xf32>,
    %c0_40 = arith.constant 0 : index
    %c0_41 = arith.constant 0 : index
    %c0_42 = arith.constant 0 : index
    %c0_43 = arith.constant 0 : index
    %40 = vector.load %arg3[%c0_40, %c0_41, %c0_42, %c0_43] : memref<1x8x8x128xf32, #tpu.memory_space<vmem>>, vector<1x8x8x128xf32>
    %41 = vector.shape_cast %40 : vector<1x8x8x128xf32> to vector<64x128xf32>
    %cst_44 = arith.constant dense<0.000000e+00> : vector<128xf32>
    %42 = vector.multi_reduction <add>, %41, %cst_44 [0] : vector<64x128xf32> to vector<128xf32>
    %43 = vector.shape_cast %42 : vector<128xf32> to vector<1x128xf32>
    %44 = arith.mulf %41, %41 : vector<64x128xf32>
    %cst_45 = arith.constant dense<0.000000e+00> : vector<128xf32>
    %45 = vector.multi_reduction <add>, %44, %cst_45 [0] : vector<64x128xf32> to vector<128xf32>
    %46 = vector.shape_cast %45 : vector<128xf32> to vector<1x128xf32>
    %47 = tpu.concatenate %43, %46 in 0 : vector<1x128xf32>, vector<1x128xf32> -> vector<2x128xf32>
    %48 = vector.shape_cast %47 : vector<2x128xf32> to vector<1x2x128xf32>
    %c0_46 = arith.constant 0 : index
    %c0_47 = arith.constant 0 : index
    %c0_48 = arith.constant 0 : index
    %49 = vector.load %arg4[%c0_46, %c0_47, %c0_48] : memref<1x2x128xf32, #tpu.memory_space<vmem>>, vector<1x2x128xf32>
    tpu.vector_store %arg4[%c0_46, %c0_47, %c0_48], %48 {strides = array<i32>} : memref<1x2x128xf32, #tpu.memory_space<vmem>>, vector<1x2x128xf32>,
    return
  }
  func.func @transform_0(%arg0: i32) -> (i32, i32, i32, i32) {
    %c0_i32 = arith.constant 0 : i32
    %c0_i32_0 = arith.constant 0 : i32
    %c0_i32_1 = arith.constant 0 : i32
    %c0_i32_2 = arith.constant 0 : i32
    return %arg0, %c0_i32, %c0_i32_0, %c0_i32_1 : i32, i32, i32, i32
  }
  func.func @transform_1(%arg0: i32) -> (i32, i32, i32) {
    %c0_i32 = arith.constant 0 : i32
    %c0_i32_0 = arith.constant 0 : i32
    %c0_i32_1 = arith.constant 0 : i32
    %c0_i32_2 = arith.constant 0 : i32
    return %c0_i32, %c0_i32_0, %c0_i32_1 : i32, i32, i32
  }
  func.func @transform_2(%arg0: i32) -> (i32, i32, i32, i32) {
    %c0_i32 = arith.constant 0 : i32
    %c0_i32_0 = arith.constant 0 : i32
    %c0_i32_1 = arith.constant 0 : i32
    %c0_i32_2 = arith.constant 0 : i32
    return %arg0, %c0_i32, %c0_i32_0, %c0_i32_1 : i32, i32, i32, i32
  }
  func.func @transform_3(%arg0: i32) -> (i32, i32, i32) {
    %c0_i32 = arith.constant 0 : i32
    %c0_i32_0 = arith.constant 0 : i32
    %c0_i32_1 = arith.constant 0 : i32
    return %arg0, %c0_i32, %c0_i32_0 : i32, i32, i32
  }
}

module attributes {stable_mosaic.version = 11 : i64} {
  func.func @bn_add_relu_kernel(%arg0: i32, %arg1: memref<1x8x8x128xf32, #tpu.memory_space<vmem>>, %arg2: memref<1x8x8x128xf32, #tpu.memory_space<vmem>>, %arg3: memref<3x128xf32, #tpu.memory_space<vmem>>, %arg4: memref<1x8x8x128xf32, #tpu.memory_space<vmem>>) attributes {dimension_semantics = [#tpu.dimension_semantics<parallel>], iteration_bounds = array<i64: 2>, scalar_prefetch = 0 : i64, scratch_operands = 0 : i64, tpu.core_type = #tpu.core_type<tc>, window_params = [{transform_indices = @transform_0, window_bounds = array<i64: 1, 8, 8, 128>}, {transform_indices = @transform_1, window_bounds = array<i64: 1, 8, 8, 128>}, {pipeline_mode = #tpu.pipeline_mode<synchronous>, transform_indices = @transform_2, window_bounds = array<i64: 3, 128>}, {transform_indices = @transform_3, window_bounds = array<i64: 1, 8, 8, 128>}]} {
    %c0 = arith.constant 0 : index
    %c0_0 = arith.constant 0 : index
    %0 = vector.load %arg3[%c0, %c0_0] : memref<3x128xf32, #tpu.memory_space<vmem>>, vector<3x128xf32>
    %c0_1 = arith.constant 0 : index
    %c0_2 = arith.constant 0 : index
    %c0_3 = arith.constant 0 : index
    %c0_4 = arith.constant 0 : index
    %1 = vector.load %arg1[%c0_1, %c0_2, %c0_3, %c0_4] : memref<1x8x8x128xf32, #tpu.memory_space<vmem>>, vector<1x8x8x128xf32>
    %2 = vector.shape_cast %1 : vector<1x8x8x128xf32> to vector<8x8x128xf32>
    %3 = vector.shape_cast %2 : vector<8x8x128xf32> to vector<64x128xf32>
    %c0_5 = arith.constant 0 : index
    %c0_6 = arith.constant 0 : index
    %c0_7 = arith.constant 0 : index
    %c0_8 = arith.constant 0 : index
    %4 = vector.load %arg2[%c0_5, %c0_6, %c0_7, %c0_8] : memref<1x8x8x128xf32, #tpu.memory_space<vmem>>, vector<1x8x8x128xf32>
    %5 = vector.shape_cast %4 : vector<1x8x8x128xf32> to vector<8x8x128xf32>
    %6 = vector.shape_cast %5 : vector<8x8x128xf32> to vector<64x128xf32>
    %7 = vector.extract_strided_slice %0 {offsets = [0, 0], sizes = [1, 128], strides = [1, 1]} : vector<3x128xf32> to vector<1x128xf32>
    %8 = vector.broadcast %7 : vector<1x128xf32> to vector<64x128xf32>
    %9 = arith.mulf %3, %8 : vector<64x128xf32>
    %10 = vector.extract_strided_slice %0 {offsets = [1, 0], sizes = [1, 128], strides = [1, 1]} : vector<3x128xf32> to vector<1x128xf32>
    %11 = vector.broadcast %10 : vector<1x128xf32> to vector<64x128xf32>
    %12 = arith.mulf %6, %11 : vector<64x128xf32>
    %13 = arith.addf %9, %12 : vector<64x128xf32>
    %14 = vector.extract_strided_slice %0 {offsets = [2, 0], sizes = [1, 128], strides = [1, 1]} : vector<3x128xf32> to vector<1x128xf32>
    %15 = vector.broadcast %14 : vector<1x128xf32> to vector<64x128xf32>
    %16 = arith.addf %13, %15 : vector<64x128xf32>
    %cst = arith.constant 0.000000e+00 : f32
    %17 = vector.broadcast %cst : f32 to vector<64x128xf32>
    %18 = arith.maximumf %16, %17 : vector<64x128xf32>
    %19 = vector.shape_cast %18 : vector<64x128xf32> to vector<1x8x8x128xf32>
    %c0_9 = arith.constant 0 : index
    %c0_10 = arith.constant 0 : index
    %c0_11 = arith.constant 0 : index
    %c0_12 = arith.constant 0 : index
    %20 = vector.load %arg4[%c0_9, %c0_10, %c0_11, %c0_12] : memref<1x8x8x128xf32, #tpu.memory_space<vmem>>, vector<1x8x8x128xf32>
    tpu.vector_store %arg4[%c0_9, %c0_10, %c0_11, %c0_12], %19 {strides = array<i32>} : memref<1x8x8x128xf32, #tpu.memory_space<vmem>>, vector<1x8x8x128xf32>,
    return
  }
  func.func @transform_0(%arg0: i32) -> (i32, i32, i32, i32) {
    %c0_i32 = arith.constant 0 : i32
    %c0_i32_0 = arith.constant 0 : i32
    %c0_i32_1 = arith.constant 0 : i32
    %c0_i32_2 = arith.constant 0 : i32
    return %arg0, %c0_i32, %c0_i32_0, %c0_i32_1 : i32, i32, i32, i32
  }
  func.func @transform_1(%arg0: i32) -> (i32, i32, i32, i32) {
    %c0_i32 = arith.constant 0 : i32
    %c0_i32_0 = arith.constant 0 : i32
    %c1_i32 = arith.constant 1 : i32
    %c0_i32_1 = arith.constant 0 : i32
    return %arg0, %c0_i32, %c0_i32_0, %c1_i32 : i32, i32, i32, i32
  }
  func.func @transform_2(%arg0: i32) -> (i32, i32) {
    %c0_i32 = arith.constant 0 : i32
    %c0_i32_0 = arith.constant 0 : i32
    %c0_i32_1 = arith.constant 0 : i32
    return %c0_i32, %c0_i32_0 : i32, i32
  }
  func.func @transform_3(%arg0: i32) -> (i32, i32, i32, i32) {
    %c0_i32 = arith.constant 0 : i32
    %c0_i32_0 = arith.constant 0 : i32
    %c0_i32_1 = arith.constant 0 : i32
    %c0_i32_2 = arith.constant 0 : i32
    return %arg0, %c0_i32, %c0_i32_0, %c0_i32_1 : i32, i32, i32, i32
  }
}

</mosaic_0001>

<bundles_post_ra>
// kernel: residual_block_forward.5
= control target key start
LH: loop header
LB: loop body
LE: loop exit
PB: predicated region body
PF: predicated region fallthrough
CT: control target
= control target key end

     0   :  { %s624_s9 = smov 0   ;;  %s626_s10 = smov 0   ;;  %s795_s0 = inlined_call_operand.vmem [shape: f32[2,8,8,256], index: 0, kind: input, shape index: {}]   ;;  %s796_s1 = inlined_call_operand.vmem [shape: f32[2,128], index: 1, kind: input, shape index: {}]   ;;  %s797_s2 = inlined_call_operand.vmem [shape: bf16[2,10,10,128], index: 2, kind: output, shape index: {}]  }
   0x1   :  { %s628_s11 = smov 0  }
   0x2 LB: > { %s497_s12 = sadd.s32 4294967295, %s606_s11   ;;  %s641_s13 = sadd.s32 1, %s606_s11   ;;  %s606_s11 = sphi %s628_s11, %s804_s11   ;;  %s602_s10 = sphi %s626_s10, %s803_s10   ;;  %s598_s9 = sphi %s624_s9, %s802_s9  }
   0x3   : > { %s16_s14 = ssub.s32 %s606_s11, %s641_s13  ;;  %s19_s15 = sadd.s32 1, %s602_s10 }
   0x4   : > { %p17_p0 = scmp.eq.s32.totalorder %s16_s14, 0  ;;  %p26_p1 = scmp.ne.s32.totalorder %s602_s10, %s598_s9 }
   0x5   : > { %p27_p2 = scmp.eq.s32.totalorder %s606_s11, 0  ;;  %p500_p4 = scmp.ge.s32.totalorder %s606_s11, 2 }
   0x6   : > { %s650_s16 = scalar_select %p17_p0, %s602_s10, %s19_s15  }
   0x7   : > { %p28_p3 = por %p27_p2, %p26_p1  ;;  %102 = sbr.rel (%p500_p4) target bundleno = 22 (0x16), region = 20 }
   0xe   : > { %105 = sbr.rel (!%p28_p3) target bundleno = 22 (0x16), region = 24  ;;  %s107_s17 = sand.u32 (%p28_p3), 1, %s602_s10  }
   0xf   : > { %s549_s18 = sshll.u32 (%p28_p3), %s606_s11, 7  ;;  %s501_s19 = sshll.u32 (%p28_p3), %s107_s17, 6 }
  0x10   : > { %s112_s22 = scalar_lea.vmem (%p28_p3), %s795_s0, %s549_s18  ;;  %s109_s23 = scalar_lea.vmem (%p28_p3), [#allocation2], %s501_s19 }
  0x11   : > { %v154_v0 = vld [vmem:[%s112_s22] sm:$0xff] (%p28_p3)  ;;  %v156_v1 = vld [vmem:[%s112_s22 + $0x10] sm:$0xff] (%p28_p3) }
  0x12   : > { %v158_v2 = vld [vmem:[%s112_s22 + $0x20] sm:$0xff] (%p28_p3)  ;;  %155 = vst [vmem:[%s109_s23] sm:$0xff] (%p28_p3), %v154_v0  ;;  %157 = vst [vmem:[%s109_s23 + $0x8] sm:$0xff] (%p28_p3), %v156_v1  ;;  %v160_v3 = vld [vmem:[%s112_s22 + $0x30] sm:$0xff] (%p28_p3) }
  0x13   : > { %159 = vst [vmem:[%s109_s23 + $0x10] sm:$0xff] (%p28_p3), %v158_v2  ;;  %v162_v4 = vld [vmem:[%s112_s22 + $0x40] sm:$0xff] (%p28_p3)  ;;  %v164_v5 = vld [vmem:[%s112_s22 + $0x50] sm:$0xff] (%p28_p3)  ;;  %161 = vst [vmem:[%s109_s23 + $0x18] sm:$0xff] (%p28_p3), %v160_v3 }
  0x14   : > { %163 = vst [vmem:[%s109_s23 + $0x20] sm:$0xff] (%p28_p3), %v162_v4  ;;  %165 = vst [vmem:[%s109_s23 + $0x28] sm:$0xff] (%p28_p3), %v164_v5  ;;  %v166_v6 = vld [vmem:[%s112_s22 + $0x60] sm:$0xff] (%p28_p3)  ;;  %v168_v7 = vld [vmem:[%s112_s22 + $0x70] sm:$0xff] (%p28_p3) }
  0x15   : > { %167 = vst [vmem:[%s109_s23 + $0x30] sm:$0xff] %v166_v6  ;;  %169 = vst [vmem:[%s109_s23 + $0x38] sm:$0xff] %v168_v7 }
  0x16 PF: > { %p504_p5 = scmp.ge.s32.totalorder %s606_s11, 1  ;;  %p174_p6 = scmp.lt.s32.totalorder %s606_s11, 3 }
  0x18   : > { %p175_p7 = pnand %p504_p5, %p174_p6 }
  0x19   : > { %p202_p8 = scmp.lt.s32.totalorder (!%p175_p7), %s497_s12, 1  ;;  %s181_s24 = sand.u32 (!%p175_p7), 1, %s598_s9   ;;  %v217_v8 = vlaneseq (!%p175_p7)  ;;  %v208_v10 = vld [vmem:[%s796_s1] sm:$0x3] (!%p175_p7)  ;;  %v608_v23 = vmov (!%p175_p7), 0   ;;  %vm382_vm0 = vcmask (!%p175_p7), 1043456  }
  0x1a   : > { %178 = sbr.rel (%p175_p7) target bundleno = 64 (0x40), region = 62  ;;  %s505_s25 = sshll.u32 (!%p175_p7), %s181_s24, 6  ;;  %vm383_vm1 = vsmask.f32 (!%p175_p7), 7938  ;;  %vm388_vm2 = vcmask (!%p175_p7), 1040384  }
  0x1b   : > { %v218_v9 = vshrl.u32 (!%p175_p7), %v217_v8, 7  ;;  %s183_s29 = scalar_lea.vmem (!%p175_p7), [#allocation2], %s505_s25  ;;  %vm389_vm3 = vsmask.f32 (!%p175_p7), 256  ;;  %vm707_vm4 = vmand (!%p175_p7), %vm382_vm0, %vm383_vm1 }
  0x1c   : > { %v209_v11 = vld [vmem:[%s183_s29] sm:$0xff] (!%p175_p7)  ;;  %v210_v14 = vld [vmem:[%s183_s29 + $0x8] sm:$0xff] (!%p175_p7)  ;;  %v211_v15 = vld [vmem:[%s183_s29 + $0x10] sm:$0xff] (!%p175_p7) }
  0x1d   : > { %v219_v12 = vsub.s32 (!%p175_p7), 0, %v218_v9  ;;  %v231_v13 = vsub.s32 (!%p175_p7), 1, %v218_v9  ;;  %v212_v16 = vld [vmem:[%s183_s29 + $0x18] sm:$0xff] (!%p175_p7)  ;;  %v213_v17 = vld [vmem:[%s183_s29 + $0x20] sm:$0xff] (!%p175_p7)  ;;  %v214_v20 = vld [vmem:[%s183_s29 + $0x28] sm:$0xff] (!%p175_p7) }
  0x1e   : > { %v215_v21 = vld [vmem:[%s183_s29 + $0x30] sm:$0xff] (!%p175_p7)  ;;  %v216_v22 = vld [vmem:[%s183_s29 + $0x38] sm:$0xff] (!%p175_p7)  ;;  %vm716_vm5 = vmand (!%p175_p7), %vm388_vm2, %vm389_vm3 }
  0x1f   : > { %v220_v18 = vrot.slane (!%p175_p7), %v208_v10, %v219_v12  ;;  %v232_v19 = vrot.slane (!%p175_p7), %v208_v10, %v231_v13 }
  0x21   : > { %s806_s12 = smov (!%p202_p8, %s497_s12), 1  ;;  %v221_v24 = vmul.f32 %v220_v18, %v209_v11  ;;  %v222_v25 = vmul.f32 %v220_v18, %v210_v14  ;;  %v223_v26 = vmul.f32 %v220_v18, %v211_v15  ;;  %v224_v27 = vmul.f32 %v220_v18, %v212_v16 }
  0x22   : > { %s558_s28 = smul.u32 80, %s806_s12  ;;  %v225_v28 = vmul.f32 %v220_v18, %v213_v17  ;;  %v226_v29 = vmul.f32 %v220_v18, %v214_v20  ;;  %v227_v30 = vmul.f32 %v220_v18, %v215_v21  ;;  %v228_v31 = vmul.f32 %v220_v18, %v216_v22 }
  0x23   : > { %v233_v32 = vadd.f32 %v232_v19, %v221_v24  ;;  %v234_v33 = vadd.f32 %v232_v19, %v222_v25  ;;  %v235_v34 = vadd.f32 %v232_v19, %v223_v26  ;;  %v236_v35 = vadd.f32 %v232_v19, %v224_v27 }
  0x24   : > { %s671_s4 = scalar_lea.vmem %s797_s2, %s558_s28  ;;  %v237_v36 = vadd.f32 %v232_v19, %v225_v28  ;;  %v238_v37 = vadd.f32 %v232_v19, %v226_v29  ;;  %v239_v38 = vadd.f32 %v232_v19, %v227_v30  ;;  %v240_v39 = vadd.f32 %v232_v19, %v228_v31 }
  0x25   : > { %251 = vst [vmem:[%s671_s4 + $0x8] sm:$0xf] %v608_v23  ;;  %249 = vst [vmem:[%s671_s4] sm:$0xf] %v608_v23  ;;  %v241_v40 = vmax.f32 %v233_v32, 0.0  ;;  %v242_v41 = vmax.f32 %v234_v33, 0.0  ;;  %v243_v42 = vmax.f32 %v235_v34, 0.0 }
  0x26   : > { %250 = vst [vmem:[%s671_s4 + $0x4] sm:$0x1] %v608_v23  ;;  %252 = vst [vmem:[%s671_s4 + $0xc] sm:$0x1] %v608_v23  ;;  %v244_v43 = vmax.f32 %v236_v35, 0.0  ;;  %v245_v44 = vmax.f32 %v237_v36, 0.0 }
  0x27   : > { %253 = vst [vmem:[%s671_s4 + $0x10] sm:$0xf] %v608_v23  ;;  %254 = vst [vmem:[%s671_s4 + $0x14] sm:$0x1] %v608_v23  ;;  %v246_v45 = vmax.f32 %v238_v37, 0.0  ;;  %v247_v46 = vmax.f32 %v239_v38, 0.0  ;;  %v550_v48 = vpack.c.bf16 %v241_v40, %v241_v40  ;;  %v551_v49 = vpack.c.bf16 %v242_v41, %v242_v41 }
  0x28   : > { %255 = vst [vmem:[%s671_s4 + $0x18] sm:$0xf] %v608_v23  ;;  %256 = vst [vmem:[%s671_s4 + $0x1c] sm:$0x1] %v608_v23  ;;  %v248_v47 = vmax.f32 %v240_v39, 0.0  ;;  %v552_v50 = vpack.c.bf16 %v243_v42, %v243_v42  ;;  %v553_v51 = vpack.c.bf16 %v244_v43, %v244_v43  ;;  %v693_v52 = vpack.c.bf16 %v245_v44, %v245_v44 }
  0x29   : > { %257 = vst [vmem:[%s671_s4 + $0x20] sm:$0xf] %v608_v23  ;;  %258 = vst [vmem:[%s671_s4 + $0x24] sm:$0x1] %v608_v23  ;;  %v695_v53 = vpack.c.bf16 %v246_v45, %v246_v45  ;;  %v697_v54 = vpack.c.bf16 %v247_v46, %v247_v46  ;;  %v302_v56 = vshrl.u32 %v550_v48, 16  ;;  %v305_v57 = vshll.u32 %v550_v48, 16 }
  0x2a   : > { %259 = vst [vmem:[%s671_s4 + $0x28] sm:$0xf] %v608_v23  ;;  %260 = vst [vmem:[%s671_s4 + $0x2c] sm:$0x1] %v608_v23  ;;  %v699_v55 = vpack.c.bf16 %v248_v47, %v248_v47  ;;  %v310_v58 = vshrl.u32 %v551_v49, 16  ;;  %v313_v59 = vshll.u32 %v551_v49, 16 }
  0x2b   : > { %261 = vst [vmem:[%s671_s4 + $0x30] sm:$0xf] %v608_v23  ;;  %262 = vst [vmem:[%s671_s4 + $0x34] sm:$0x1] %v608_v23  ;;  %v318_v0 = vshrl.u32 %v552_v50, 16  ;;  %v321_v1 = vshll.u32 %v552_v50, 16 }
  0x2c   : > { %263 = vst [vmem:[%s671_s4 + $0x38] sm:$0xf] %v608_v23  ;;  %264 = vst [vmem:[%s671_s4 + $0x3c] sm:$0x1] %v608_v23  ;;  %v515_v60 = vld [vmem:[%s671_s4 + $0x8] sm:$0xf] }
  0x2d   : > { %265 = vst [vmem:[%s671_s4 + $0x40] sm:$0xf] %v608_v23  ;;  %266 = vst [vmem:[%s671_s4 + $0x44] sm:$0x1] %v608_v23  ;;  %v517_v61 = vld [vmem:[%s671_s4 + $0xc] sm:$0x1] }
  0x2e   : > { %267 = vst [vmem:[%s671_s4 + $0x48] sm:$0xf] %v608_v23  ;;  %268 = vst [vmem:[%s671_s4 + $0x4c] sm:$0x1] %v608_v23  ;;  %v519_v62 = vld [vmem:[%s671_s4 + $0x10] sm:$0xf] }
  0x2f   : > { %v521_v63 = vld [vmem:[%s671_s4 + $0x14] sm:$0x1]  ;;  %v326_v2 = vshrl.u32 %v553_v51, 16  ;;  %v329_v3 = vshll.u32 %v553_v51, 16  ;;  %v304_v4 = vrot.slane %v302_v56, 7  ;;  %v312_v6 = vrot.slane %v310_v58, 7 }
  0x30   : > { %v523_v7 = vld [vmem:[%s671_s4 + $0x18] sm:$0xf]  ;;  %v334_v8 = vshrl.u32 %v693_v52, 16  ;;  %v337_v9 = vshll.u32 %v693_v52, 16  ;;  %v320_v11 = vrot.slane %v318_v0, 7  ;;  %v342_v14 = vshrl.u32 %v695_v53, 16 }
  0x31   : > { %v525_v12 = vld [vmem:[%s671_s4 + $0x1c] sm:$0x1]  ;;  %v328_v13 = vrot.slane %v326_v2, 7  ;;  %v345_v15 = vshll.u32 %v695_v53, 16  ;;  %v307_v16 = vor.u32 %v305_v57, %v304_v4  ;;  %v308_v17 = vrot.slane %v304_v4, 4 }
  0x32   : > { %v315_v18 = vor.u32 %v313_v59, %v312_v6  ;;  %v316_v19 = vrot.slane %v312_v6, 4  ;;  %v527_v20 = vld [vmem:[%s671_s4 + $0x20] sm:$0xf]  ;;  %v529_v21 = vld [vmem:[%s671_s4 + $0x24] sm:$0x1]  ;;  %v323_v22 = vor.u32 %v321_v1, %v320_v11  ;;  %v324_v23 = vrot.slane %v320_v11, 4 }
  0x33   : > { %v331_v24 = vor.u32 %v329_v3, %v328_v13  ;;  %v332_v25 = vrot.slane %v328_v13, 4  ;;  %v386_v26 = vsel %vm707_vm4, %v307_v16, %v515_v60  ;;  %v392_v27 = vsel %vm716_vm5, %v308_v17, %v517_v61  ;;  %v531_v34 = vld [vmem:[%s671_s4 + $0x28] sm:$0xf]  ;;  %v533_v35 = vld [vmem:[%s671_s4 + $0x2c] sm:$0x1] }
  0x34   : > { %v395_v28 = vsel %vm707_vm4, %v315_v18, %v519_v62  ;;  %v398_v29 = vsel %vm716_vm5, %v316_v19, %v521_v63  ;;  %516 = vst [vmem:[%s671_s4 + $0x8] sm:$0xf] %v386_v26  ;;  %518 = vst [vmem:[%s671_s4 + $0xc] sm:$0x1] %v392_v27  ;;  %v401_v30 = vsel %vm707_vm4, %v323_v22, %v523_v7  ;;  %v336_v36 = vrot.slane %v334_v8, 7 }
  0x35   : > { %520 = vst [vmem:[%s671_s4 + $0x10] sm:$0xf] %v395_v28  ;;  %522 = vst [vmem:[%s671_s4 + $0x14] sm:$0x1] %v398_v29  ;;  %v404_v31 = vsel %vm716_vm5, %v324_v23, %v525_v12  ;;  %v407_v32 = vsel %vm707_vm4, %v331_v24, %v527_v20  ;;  %v410_v33 = vsel %vm716_vm5, %v332_v25, %v529_v21  ;;  %v344_v37 = vrot.slane %v342_v14, 7 }
  0x36   : > { %524 = vst [vmem:[%s671_s4 + $0x18] sm:$0xf] %v401_v30  ;;  %526 = vst [vmem:[%s671_s4 + $0x1c] sm:$0x1] %v404_v31  ;;  %v535_v38 = vld [vmem:[%s671_s4 + $0x30] sm:$0xf]  ;;  %v339_v44 = vor.u32 %v337_v9, %v336_v36 }
  0x37   : > { %528 = vst [vmem:[%s671_s4 + $0x20] sm:$0xf] %v407_v32  ;;  %530 = vst [vmem:[%s671_s4 + $0x24] sm:$0x1] %v410_v33  ;;  %v350_v39 = vshrl.u32 %v697_v54, 16  ;;  %v353_v41 = vshll.u32 %v697_v54, 16  ;;  %v347_v46 = vor.u32 %v345_v15, %v344_v37 }
  0x38   : > { %v537_v40 = vld [vmem:[%s671_s4 + $0x34] sm:$0x1]  ;;  %v358_v42 = vshrl.u32 %v699_v55, 16  ;;  %v361_v43 = vshll.u32 %v699_v55, 16  ;;  %v340_v45 = vrot.slane %v336_v36, 4  ;;  %v348_v47 = vrot.slane %v344_v37, 4 }
  0x39   : > { %v352_v48 = vrot.slane %v350_v39, 7  ;;  %v539_v49 = vld [vmem:[%s671_s4 + $0x38] sm:$0xf]  ;;  %v413_v51 = vsel %vm707_vm4, %v339_v44, %v531_v34  ;;  %v419_v53 = vsel %vm707_vm4, %v347_v46, %v535_v38  ;;  %v541_v55 = vld [vmem:[%s671_s4 + $0x3c] sm:$0x1] }
  0x3a   : > { %v360_v50 = vrot.slane %v358_v42, 7  ;;  %v416_v52 = vsel %vm716_vm5, %v340_v45, %v533_v35  ;;  %v422_v54 = vsel %vm716_vm5, %v348_v47, %v537_v40  ;;  %v543_v56 = vld [vmem:[%s671_s4 + $0x40] sm:$0xf]  ;;  %v545_v57 = vld [vmem:[%s671_s4 + $0x44] sm:$0x1] }
  0x3b   : > { %532 = vst [vmem:[%s671_s4 + $0x28] sm:$0xf] %v413_v51  ;;  %534 = vst [vmem:[%s671_s4 + $0x2c] sm:$0x1] %v416_v52  ;;  %v355_v58 = vor.u32 %v353_v41, %v352_v48  ;;  %v356_v59 = vrot.slane %v352_v48, 4 }
  0x3c   : > { %536 = vst [vmem:[%s671_s4 + $0x30] sm:$0xf] %v419_v53  ;;  %538 = vst [vmem:[%s671_s4 + $0x34] sm:$0x1] %v422_v54  ;;  %v363_v60 = vor.u32 %v361_v43, %v360_v50  ;;  %v364_v61 = vrot.slane %v360_v50, 4 }
  0x3d   : > { %v425_v62 = vsel %vm707_vm4, %v355_v58, %v539_v49  ;;  %v428_v63 = vsel %vm716_vm5, %v356_v59, %v541_v55 }
  0x3e   : > { %v431_v0 = vsel %vm707_vm4, %v363_v60, %v543_v56  ;;  %v434_v1 = vsel %vm716_vm5, %v364_v61, %v545_v57  ;;  %540 = vst [vmem:[%s671_s4 + $0x38] sm:$0xf] %v425_v62  ;;  %542 = vst [vmem:[%s671_s4 + $0x3c] sm:$0x1] %v428_v63 }
  0x3f   : > { %544 = vst [vmem:[%s671_s4 + $0x40] sm:$0xf] %v431_v0  ;;  %546 = vst [vmem:[%s671_s4 + $0x44] sm:$0x1] %v434_v1 }
  0x40 PF: > { %p9_p9 = scmp.ge.s32.totalorder %s641_s13, 4   ;;  %s802_s9 = smov %s602_s10 }
  0x41   : > { %s803_s10 = smov %s650_s16  ;;  %s804_s11 = smov %s641_s13 }
  0x42   :  { %11 = sbr.rel (!%p9_p9) target bundleno = 2 (0x2), region = 102 }

// kernel: residual_block_forward.4
= control target key start
LH: loop header
LB: loop body
LE: loop exit
PB: predicated region body
PF: predicated region fallthrough
CT: control target
= control target key end

     0   :  { %vm2039_vm0 = vcmask 1040384   ;;  %s3766_s1 = inlined_call_operand.vmem [shape: bf16[1152,256], index: 1, kind: input, shape index: {}]   ;;  %s3767_s0 = inlined_call_operand.vmem [shape: bf16[128,1152], index: 0, kind: input, shape index: {}]   ;;  %s3768_s2 = inlined_call_operand.vmem [shape: f32[128,256], index: 2, kind: output, shape index: {0}]   ;;  %s3769_s3 = inlined_call_operand.vmem [shape: f32[1,2,256], index: 3, kind: output, shape index: {1}]  }
   0x1   :  { %v2440_v0 = vld [vmem:[%s3766_s1 + $0x4] ss:$8 sps:$4 sm:$0xff]   ;;  %v2444_v2 = vld [vmem:[%s3766_s1] ss:$8 sps:$4 sm:$0xff]   ;;  %v2446_v4 = vld [vmem:[%s3766_s1 + $0x14] ss:$8 sps:$4 sm:$0xff]  }
   0x2   :  { %v2442_v1 = vld [vmem:[%s3766_s1 + $0x204] ss:$8 sps:$4 sm:$0xff]   ;;  %1326 = vmatprep.subr.bf16.mxu1 %v2440_v0  ;;  %v2445_v3 = vld [vmem:[%s3766_s1 + $0x200] ss:$8 sps:$4 sm:$0xff]   ;;  %v2448_v5 = vld [vmem:[%s3766_s1 + $0x214] ss:$8 sps:$4 sm:$0xff]  }
   0x3   :  { %1552 = vmatprep.subr.bf16.mxu0 %v2442_v1  ;;  %1327 = vmatpush1.bf16.msra.mxu1 %v2444_v2  ;;  %v2450_v6 = vld [vmem:[%s3766_s1 + $0x10] ss:$8 sps:$4 sm:$0xff]   ;;  %v2452_v8 = vld [vmem:[%s3766_s1 + $0x24] ss:$8 sps:$4 sm:$0xff]   ;;  %v2456_v10 = vld [vmem:[%s3766_s1 + $0x20] ss:$8 sps:$4 sm:$0xff]  }
   0x4   :  { %1553 = vmatpush1.bf16.msra.mxu0 %v2445_v3  ;;  %1328 = vmatprep.subr.bf16.mxu1 %v2446_v4  ;;  %v2451_v7 = vld [vmem:[%s3766_s1 + $0x210] ss:$8 sps:$4 sm:$0xff]   ;;  %v2454_v9 = vld [vmem:[%s3766_s1 + $0x224] ss:$8 sps:$4 sm:$0xff]   ;;  %v2457_v11 = vld [vmem:[%s3766_s1 + $0x220] ss:$8 sps:$4 sm:$0xff]  }
   0x5   :  { %1554 = vmatprep.subr.bf16.mxu0 %v2448_v5  ;;  %v2458_v12 = vld [vmem:[%s3766_s1 + $0x34] ss:$8 sps:$4 sm:$0xff]   ;;  %v2462_v14 = vld [vmem:[%s3766_s1 + $0x30] ss:$8 sps:$4 sm:$0xff]   ;;  %v2464_v16 = vld [vmem:[%s3766_s1 + $0x44] ss:$8 sps:$4 sm:$0xff]  }
   0x6   :  { %v2460_v13 = vld [vmem:[%s3766_s1 + $0x234] ss:$8 sps:$4 sm:$0xff]   ;;  %v2463_v15 = vld [vmem:[%s3766_s1 + $0x230] ss:$8 sps:$4 sm:$0xff]   ;;  %v2466_v17 = vld [vmem:[%s3766_s1 + $0x244] ss:$8 sps:$4 sm:$0xff]  }
   0x7   :  { %1329 = vmatpush1.bf16.msra.mxu1 %v2450_v6  ;;  %v2468_v18 = vld [vmem:[%s3766_s1 + $0x40] ss:$8 sps:$4 sm:$0xff]   ;;  %v2470_v20 = vld [vmem:[%s3766_s1 + $0x54] ss:$8 sps:$4 sm:$0xff]   ;;  %v2474_v22 = vld [vmem:[%s3766_s1 + $0x50] ss:$8 sps:$4 sm:$0xff]  }
   0x8   :  { %1555 = vmatpush1.bf16.msra.mxu0 %v2451_v7  ;;  %1330 = vmatprep.subr.bf16.mxu1 %v2452_v8  ;;  %v2469_v19 = vld [vmem:[%s3766_s1 + $0x240] ss:$8 sps:$4 sm:$0xff]   ;;  %v2472_v21 = vld [vmem:[%s3766_s1 + $0x254] ss:$8 sps:$4 sm:$0xff]   ;;  %v2475_v23 = vld [vmem:[%s3766_s1 + $0x250] ss:$8 sps:$4 sm:$0xff]  }
   0x9   :  { %1556 = vmatprep.subr.bf16.mxu0 %v2454_v9  ;;  %v2476_v24 = vld [vmem:[%s3766_s1 + $0x64] ss:$8 sps:$4 sm:$0xff]   ;;  %v2480_v26 = vld [vmem:[%s3766_s1 + $0x60] ss:$8 sps:$4 sm:$0xff]   ;;  %v2482_v28 = vld [vmem:[%s3766_s1 + $0x74] ss:$8 sps:$4 sm:$0xff]  }
   0xa   :  { %v2478_v25 = vld [vmem:[%s3766_s1 + $0x264] ss:$8 sps:$4 sm:$0xff]   ;;  %v2481_v27 = vld [vmem:[%s3766_s1 + $0x260] ss:$8 sps:$4 sm:$0xff]   ;;  %v2484_v29 = vld [vmem:[%s3766_s1 + $0x274] ss:$8 sps:$4 sm:$0xff]  }
   0xb   :  { %1331 = vmatpush1.bf16.msra.mxu1 %v2456_v10  ;;  %v2486_v30 = vld [vmem:[%s3766_s1 + $0x70] ss:$8 sps:$4 sm:$0xff]   ;;  %v2488_v32 = vld [vmem:[%s3766_s1 + $0x84] ss:$8 sps:$4 sm:$0xff]   ;;  %v2492_v34 = vld [vmem:[%s3766_s1 + $0x80] ss:$8 sps:$4 sm:$0xff]  }
   0xc   :  { %1557 = vmatpush1.bf16.msra.mxu0 %v2457_v11  ;;  %1332 = vmatprep.subr.bf16.mxu1 %v2458_v12  ;;  %v2487_v31 = vld [vmem:[%s3766_s1 + $0x270] ss:$8 sps:$4 sm:$0xff]   ;;  %v2490_v33 = vld [vmem:[%s3766_s1 + $0x284] ss:$8 sps:$4 sm:$0xff]   ;;  %v2493_v35 = vld [vmem:[%s3766_s1 + $0x280] ss:$8 sps:$4 sm:$0xff]  }
   0xd   :  { %1558 = vmatprep.subr.bf16.mxu0 %v2460_v13  ;;  %v2494_v36 = vld [vmem:[%s3766_s1 + $0x94] ss:$8 sps:$4 sm:$0xff]   ;;  %v2498_v38 = vld [vmem:[%s3766_s1 + $0x90] ss:$8 sps:$4 sm:$0xff]   ;;  %v2500_v40 = vld [vmem:[%s3766_s1 + $0xa4] ss:$8 sps:$4 sm:$0xff]  }
   0xe   :  { %v2496_v37 = vld [vmem:[%s3766_s1 + $0x294] ss:$8 sps:$4 sm:$0xff]   ;;  %v2499_v39 = vld [vmem:[%s3766_s1 + $0x290] ss:$8 sps:$4 sm:$0xff]   ;;  %v2502_v41 = vld [vmem:[%s3766_s1 + $0x2a4] ss:$8 sps:$4 sm:$0xff]  }
   0xf   :  { %1333 = vmatpush1.bf16.msra.mxu1 %v2462_v14  ;;  %v2504_v42 = vld [vmem:[%s3766_s1 + $0xa0] ss:$8 sps:$4 sm:$0xff]   ;;  %v2506_v44 = vld [vmem:[%s3766_s1 + $0xb4] ss:$8 sps:$4 sm:$0xff]   ;;  %v2510_v46 = vld [vmem:[%s3766_s1 + $0xb0] ss:$8 sps:$4 sm:$0xff]  }
  0x10   :  { %1559 = vmatpush1.bf16.msra.mxu0 %v2463_v15  ;;  %1334 = vmatprep.subr.bf16.mxu1 %v2464_v16  ;;  %v2505_v43 = vld [vmem:[%s3766_s1 + $0x2a0] ss:$8 sps:$4 sm:$0xff]   ;;  %v2508_v45 = vld [vmem:[%s3766_s1 + $0x2b4] ss:$8 sps:$4 sm:$0xff]   ;;  %v2511_v47 = vld [vmem:[%s3766_s1 + $0x2b0] ss:$8 sps:$4 sm:$0xff]  }
  0x11   :  { %1560 = vmatprep.subr.bf16.mxu0 %v2466_v17  ;;  %v2512_v48 = vld [vmem:[%s3766_s1 + $0xc4] ss:$8 sps:$4 sm:$0xff]   ;;  %v2541_v51 = vld [vmem:[%s3767_s0 + $0x14] ss:$36 sps:$4 sm:$0xff]   ;;  %v2516_v52 = vld [vmem:[%s3766_s1 + $0xc0] ss:$8 sps:$4 sm:$0xff]  }
  0x12   :  { %v2538_v49 = vld [vmem:[%s3767_s0 + $0x4] ss:$36 sps:$4 sm:$0xff]   ;;  %1584 = vmatprep.mubr.bf16.mxu0 %v2541_v51  ;;  %v2518_v54 = vld [vmem:[%s3766_s1 + $0xd4] ss:$8 sps:$4 sm:$0xff]   ;;  %v2522_v56 = vld [vmem:[%s3766_s1 + $0xd0] ss:$8 sps:$4 sm:$0xff]  }
  0x13   :  { %1335 = vmatpush1.bf16.msra.mxu1 %v2468_v18  ;;  %v2514_v50 = vld [vmem:[%s3766_s1 + $0x2c4] ss:$8 sps:$4 sm:$0xff]   ;;  %1358 = vmatprep.mubr.bf16.mxu1 %v2538_v49  ;;  %v2517_v53 = vld [vmem:[%s3766_s1 + $0x2c0] ss:$8 sps:$4 sm:$0xff]   ;;  %v2520_v55 = vld [vmem:[%s3766_s1 + $0x2d4] ss:$8 sps:$4 sm:$0xff]  }
  0x14   :  { %1561 = vmatpush1.bf16.msra.mxu0 %v2469_v19  ;;  %1336 = vmatprep.subr.bf16.mxu1 %v2470_v20  ;;  %v2523_v57 = vld [vmem:[%s3766_s1 + $0x2d0] ss:$8 sps:$4 sm:$0xff]   ;;  %v2524_v58 = vld [vmem:[%s3766_s1 + $0xe4] ss:$8 sps:$4 sm:$0xff]   ;;  %v2528_v60 = vld [vmem:[%s3766_s1 + $0xe0] ss:$8 sps:$4 sm:$0xff]  }
  0x15   :  { %1562 = vmatprep.subr.bf16.mxu0 %v2472_v21  ;;  %v2526_v59 = vld [vmem:[%s3766_s1 + $0x2e4] ss:$8 sps:$4 sm:$0xff]   ;;  %v2529_v61 = vld [vmem:[%s3766_s1 + $0x2e0] ss:$8 sps:$4 sm:$0xff]   ;;  %v2530_v62 = vld [vmem:[%s3766_s1 + $0xf4] ss:$8 sps:$4 sm:$0xff]  }
  0x16   :  { %v2532_v63 = vld [vmem:[%s3766_s1 + $0x2f4] ss:$8 sps:$4 sm:$0xff]   ;;  %v2534_v0 = vld [vmem:[%s3766_s1 + $0xf0] ss:$8 sps:$4 sm:$0xff]   ;;  %v2544_v2 = vld [vmem:[%s3766_s1 + $0x104] ss:$8 sps:$4 sm:$0xff]  }
  0x17   :  { %1337 = vmatpush1.bf16.msra.mxu1 %v2474_v22  ;;  %v2535_v1 = vld [vmem:[%s3766_s1 + $0x2f0] ss:$8 sps:$4 sm:$0xff]   ;;  %v2985_v3 = vld [vmem:[%s3766_s1 + $0x304] ss:$8 sps:$4 sm:$0xff]   ;;  %v2542_v6 = vld [vmem:[%s3766_s1 + $0x100] ss:$8 sps:$4 sm:$0xff]  }
  0x18   :  { %1563 = vmatpush1.bf16.msra.mxu0 %v2475_v23  ;;  %1338 = vmatprep.subr.bf16.mxu1 %v2476_v24  ;;  %v2536_v4 = vld [vmem:[%s3767_s0] ss:$36 sps:$4 sm:$0xff]   ;;  %v2539_v5 = vld [vmem:[%s3767_s0 + $0x10] ss:$36 sps:$4 sm:$0xff]   ;;  %v2558_v16 = vld [vmem:[%s3767_s0 + $0x48] ss:$36 sps:$4 sm:$0xff]  }
  0x19   :  { %1564 = vmatprep.subr.bf16.mxu0 %v2478_v25  ;;  %v2999_v7 = vld [vmem:[%s3766_s1 + $0x300] ss:$8 sps:$4 sm:$0xff]   ;;  %v2550_v8 = vld [vmem:[%s3766_s1 + $0x114] ss:$8 sps:$4 sm:$0xff]   ;;  %v2554_v10 = vld [vmem:[%s3767_s0 + $0x4c] ss:$36 sps:$4 sm:$0xff]  }
  0x1a   :  { %v3008_v9 = vld [vmem:[%s3766_s1 + $0x314] ss:$8 sps:$4 sm:$0xff]   ;;  %v2548_v12 = vld [vmem:[%s3766_s1 + $0x110] ss:$8 sps:$4 sm:$0xff]   ;;  %v2561_v14 = vld [vmem:[%s3766_s1 + $0x124] ss:$8 sps:$4 sm:$0xff]  }
  0x1b   :  { %1339 = vmatpush1.bf16.msra.mxu1 %v2480_v26  ;;  %v2556_v11 = vld [vmem:[%s3767_s0 + $0x5c] ss:$36 sps:$4 sm:$0xff]   ;;  %v3023_v13 = vld [vmem:[%s3766_s1 + $0x310] ss:$8 sps:$4 sm:$0xff]   ;;  %v3032_v15 = vld [vmem:[%s3766_s1 + $0x324] ss:$8 sps:$4 sm:$0xff]  }
  0x1c   :  { %1565 = vmatpush1.bf16.msra.mxu0 %v2481_v27  ;;  %1340 = vmatprep.subr.bf16.mxu1 %v2482_v28  ;;  %v2559_v17 = vld [vmem:[%s3766_s1 + $0x120] ss:$8 sps:$4 sm:$0xff]   ;;  %v2562_v18 = vld [vmem:[%s3767_s0 + $0x58] ss:$36 sps:$4 sm:$0xff]   ;;  %v2579_v26 = vld [vmem:[%s3766_s1 + $0x144] ss:$8 sps:$4 sm:$0xff]  }
  0x1d   :  { %1566 = vmatprep.subr.bf16.mxu0 %v2484_v29  ;;  %v3046_v19 = vld [vmem:[%s3766_s1 + $0x320] ss:$8 sps:$4 sm:$0xff]   ;;  %v2568_v20 = vld [vmem:[%s3766_s1 + $0x134] ss:$8 sps:$4 sm:$0xff]   ;;  %v2566_v24 = vld [vmem:[%s3766_s1 + $0x130] ss:$8 sps:$4 sm:$0xff]  }
  0x1e   :  { %v3056_v21 = vld [vmem:[%s3766_s1 + $0x334] ss:$8 sps:$4 sm:$0xff]   ;;  %v2574_v23 = vld [vmem:[%s3767_s0 + $0xa4] ss:$36 sps:$4 sm:$0xff]   ;;  %v3071_v25 = vld [vmem:[%s3766_s1 + $0x330] ss:$8 sps:$4 sm:$0xff]  }
  0x1f   :  { %1341 = vmatpush1.bf16.msra.mxu1 %v2486_v30  ;;  %v2572_v22 = vld [vmem:[%s3767_s0 + $0x94] ss:$36 sps:$4 sm:$0xff]   ;;  %v3080_v27 = vld [vmem:[%s3766_s1 + $0x344] ss:$8 sps:$4 sm:$0xff]   ;;  %v2577_v29 = vld [vmem:[%s3766_s1 + $0x140] ss:$8 sps:$4 sm:$0xff]  }
  0x20   :  { %1567 = vmatpush1.bf16.msra.mxu0 %v2487_v31  ;;  %1342 = vmatprep.subr.bf16.mxu1 %v2488_v32  ;;  %v2576_v28 = vld [vmem:[%s3767_s0 + $0x90] ss:$36 sps:$4 sm:$0xff]   ;;  %v2580_v30 = vld [vmem:[%s3767_s0 + $0xa0] ss:$36 sps:$4 sm:$0xff]  }
  0x21   :  { %1568 = vmatprep.subr.bf16.mxu0 %v2490_v33  ;;  %v3094_v31 = vld [vmem:[%s3766_s1 + $0x340] ss:$8 sps:$4 sm:$0xff]   ;;  %v2586_v32 = vld [vmem:[%s3766_s1 + $0x154] ss:$8 sps:$4 sm:$0xff]   ;;  %v3167_v49 = vld [vmem:[%s3766_s1 + $0x370] ss:$8 sps:$4 sm:$0xff]  }
  0x22   :  { %v3104_v33 = vld [vmem:[%s3766_s1 + $0x354] ss:$8 sps:$4 sm:$0xff]   ;;  %v3176_v51 = vld [vmem:[%s3766_s1 + $0x384] ss:$8 sps:$4 sm:$0xff]  }
  0x23   :  { %1343 = vmatpush1.bf16.msra.mxu1 %v2492_v34  ;;  %v2590_v34 = vld [vmem:[%s3767_s0 + $0xdc] ss:$36 sps:$4 sm:$0xff]  }
  0x24   :  { %1569 = vmatpush1.bf16.msra.mxu0 %v2493_v35  ;;  %1344 = vmatprep.subr.bf16.mxu1 %v2494_v36  ;;  %v2592_v35 = vld [vmem:[%s3767_s0 + $0xec] ss:$36 sps:$4 sm:$0xff]  }
  0x25   :  { %1570 = vmatprep.subr.bf16.mxu0 %v2496_v37  ;;  %v2584_v36 = vld [vmem:[%s3766_s1 + $0x150] ss:$8 sps:$4 sm:$0xff]  }
  0x26   :  { %v3119_v37 = vld [vmem:[%s3766_s1 + $0x350] ss:$8 sps:$4 sm:$0xff]  }
  0x27   :  { %1345 = vmatpush1.bf16.msra.mxu1 %v2498_v38  ;;  %v2597_v38 = vld [vmem:[%s3766_s1 + $0x164] ss:$8 sps:$4 sm:$0xff]  }
  0x28   :  { %1571 = vmatpush1.bf16.msra.mxu0 %v2499_v39  ;;  %1346 = vmatprep.subr.bf16.mxu1 %v2500_v40  ;;  %v3128_v39 = vld [vmem:[%s3766_s1 + $0x364] ss:$8 sps:$4 sm:$0xff]   ;;  %v2594_v40 = vld [vmem:[%s3767_s0 + $0xd8] ss:$36 sps:$4 sm:$0xff]  }
  0x29   :  { %1572 = vmatprep.subr.bf16.mxu0 %v2502_v41  ;;  %v2595_v41 = vld [vmem:[%s3766_s1 + $0x160] ss:$8 sps:$4 sm:$0xff]  }
  0x2b   :  { %1347 = vmatpush1.bf16.msra.mxu1 %v2504_v42  ;;  %v2598_v42 = vld [vmem:[%s3767_s0 + $0xe8] ss:$36 sps:$4 sm:$0xff]  }
  0x2c   :  { %1573 = vmatpush1.bf16.msra.mxu0 %v2505_v43  ;;  %1348 = vmatprep.subr.bf16.mxu1 %v2506_v44  ;;  %v3142_v43 = vld [vmem:[%s3766_s1 + $0x360] ss:$8 sps:$4 sm:$0xff]   ;;  %v2604_v44 = vld [vmem:[%s3766_s1 + $0x174] ss:$8 sps:$4 sm:$0xff]  }
  0x2d   :  { %1574 = vmatprep.subr.bf16.mxu0 %v2508_v45  ;;  %v3152_v45 = vld [vmem:[%s3766_s1 + $0x374] ss:$8 sps:$4 sm:$0xff]  }
  0x2f   :  { %1349 = vmatpush1.bf16.msra.mxu1 %v2510_v46  ;;  %v2608_v46 = vld [vmem:[%s3767_s0 + $0x124] ss:$36 sps:$4 sm:$0xff]  }
  0x30   :  { %1575 = vmatpush1.bf16.msra.mxu0 %v2511_v47  ;;  %1350 = vmatprep.subr.bf16.mxu1 %v2512_v48  ;;  %v2610_v47 = vld [vmem:[%s3767_s0 + $0x134] ss:$36 sps:$4 sm:$0xff]  }
  0x31   :  { %1576 = vmatprep.subr.bf16.mxu0 %v2514_v50  ;;  %v2602_v48 = vld [vmem:[%s3766_s1 + $0x170] ss:$8 sps:$4 sm:$0xff]   ;;  %v2615_v50 = vld [vmem:[%s3766_s1 + $0x184] ss:$8 sps:$4 sm:$0xff]  }
  0x33   :  { %1351 = vmatpush1.bf16.msra.mxu1 %v2516_v52  ;;  %v2612_v52 = vld [vmem:[%s3767_s0 + $0x120] ss:$36 sps:$4 sm:$0xff]  }
  0x34   :  { %1577 = vmatpush1.bf16.msra.mxu0 %v2517_v53  ;;  %1352 = vmatprep.subr.bf16.mxu1 %v2518_v54  ;;  %v2613_v53 = vld [vmem:[%s3766_s1 + $0x180] ss:$8 sps:$4 sm:$0xff]   ;;  %v2616_v54 = vld [vmem:[%s3767_s0 + $0x130] ss:$36 sps:$4 sm:$0xff]  }
  0x35   :  { %1578 = vmatprep.subr.bf16.mxu0 %v2520_v55  ;;  %v3190_v55 = vld [vmem:[%s3766_s1 + $0x380] ss:$8 sps:$4 sm:$0xff]  }
  0x37   :  { %1353 = vmatpush1.bf16.msra.mxu1 %v2522_v56  ;;  %v2622_v56 = vld [vmem:[%s3766_s1 + $0x194] ss:$8 sps:$4 sm:$0xff]  }
  0x38   :  { %1579 = vmatpush1.bf16.msra.mxu0 %v2523_v57  ;;  %1354 = vmatprep.subr.bf16.mxu1 %v2524_v58  ;;  %v3200_v57 = vld [vmem:[%s3766_s1 + $0x394] ss:$8 sps:$4 sm:$0xff]   ;;  %v2626_v58 = vld [vmem:[%s3767_s0 + $0x16c] ss:$36 sps:$4 sm:$0xff]  }
  0x39   :  { %1580 = vmatprep.subr.bf16.mxu0 %v2526_v59  ;;  %v2628_v59 = vld [vmem:[%s3767_s0 + $0x17c] ss:$36 sps:$4 sm:$0xff]  }
  0x3b   :  { %1355 = vmatpush1.bf16.msra.mxu1 %v2528_v60  ;;  %v2620_v60 = vld [vmem:[%s3766_s1 + $0x190] ss:$8 sps:$4 sm:$0xff]  }
  0x3c   :  { %1581 = vmatpush1.bf16.msra.mxu0 %v2529_v61  ;;  %1356 = vmatprep.subr.bf16.mxu1 %v2530_v62  ;;  %v3215_v61 = vld [vmem:[%s3766_s1 + $0x390] ss:$8 sps:$4 sm:$0xff]   ;;  %v2633_v62 = vld [vmem:[%s3766_s1 + $0x1a4] ss:$8 sps:$4 sm:$0xff]  }
  0x3d   :  { %1582 = vmatprep.subr.bf16.mxu0 %v2532_v63  ;;  %v3224_v63 = vld [vmem:[%s3766_s1 + $0x3a4] ss:$8 sps:$4 sm:$0xff]  }
  0x3f   :  { %1357 = vmatpush1.bf16.msra.mxu1 %v2534_v0  ;;  %v2630_v0 = vld [vmem:[%s3767_s0 + $0x168] ss:$36 sps:$4 sm:$0xff]  }
  0x40   :  { %1583 = vmatpush1.bf16.msra.mxu0 %v2535_v1  ;;  %1439 = vmatprep.subr.bf16.mxu1 %v2544_v2  ;;  %v2631_v1 = vld [vmem:[%s3766_s1 + $0x1a0] ss:$8 sps:$4 sm:$0xff]   ;;  %v2634_v2 = vld [vmem:[%s3767_s0 + $0x178] ss:$36 sps:$4 sm:$0xff]  }
  0x41   :  { %1665 = vmatprep.subr.bf16.mxu0 %v2985_v3 }
  0x42   :  { %1359 = vmatmul.mubr.bf16.vlgmr.msra.gmra.mrb[0].mxu1 %v2536_v4  ;;  %v3238_v4 = vld [vmem:[%s3766_s1 + $0x3a0] ss:$8 sps:$4 sm:$0xff]  }
  0x43   :  { %1585 = vmatmul.mubr.bf16.vlgmr.msra.gmra.mrb[0].mxu0 %v2539_v5  ;;  %1440 = vmatpush1.bf16.msra.mxu1 %v2542_v6  ;;  %v2640_v5 = vld [vmem:[%s3766_s1 + $0x1b4] ss:$8 sps:$4 sm:$0xff]  }
  0x44   :  { %1666 = vmatpush1.bf16.msra.mxu0 %v2999_v7  ;;  %1441 = vmatprep.subr.bf16.mxu1 %v2550_v8  ;;  %v3248_v6 = vld [vmem:[%s3766_s1 + $0x3b4] ss:$8 sps:$4 sm:$0xff]  }
  0x45   :  { %1667 = vmatprep.subr.bf16.mxu0 %v3008_v9  ;;  %1368 = vmatprep.mubr.bf16.mxu1 %v2554_v10  ;;  %v2644_v8 = vld [vmem:[%s3767_s0 + $0x1b4] ss:$36 sps:$4 sm:$0xff]   ;;  %v2646_v10 = vld [vmem:[%s3767_s0 + $0x1c4] ss:$36 sps:$4 sm:$0xff]  }
  0x46   :  { %1594 = vmatprep.mubr.bf16.mxu0 %v2556_v11  ;;  %v2638_v11 = vld [vmem:[%s3766_s1 + $0x1b0] ss:$8 sps:$4 sm:$0xff]  }
  0x47   :  { %1442 = vmatpush1.bf16.msra.mxu1 %v2548_v12  ;;  %v3262_v12 = vld [vmem:[%s3766_s1 + $0x3b0] ss:$8 sps:$4 sm:$0xff]  }
  0x48   :  { %1668 = vmatpush1.bf16.msra.mxu0 %v3023_v13  ;;  %1443 = vmatprep.subr.bf16.mxu1 %v2561_v14  ;;  %v2651_v14 = vld [vmem:[%s3766_s1 + $0x1c4] ss:$8 sps:$4 sm:$0xff]  }
  0x49   :  { %1669 = vmatprep.subr.bf16.mxu0 %v3032_v15 }
  0x4a   :  { %1369 = vmatmul.mubr.bf16.gmra.mrb[4].mxu1 %v2558_v16  ;;  %v3272_v16 = vld [vmem:[%s3766_s1 + $0x3c4] ss:$8 sps:$4 sm:$0xff]  }
  0x4b   :  { %1595 = vmatmul.mubr.bf16.gmra.mrb[4].mxu0 %v2562_v18  ;;  %1444 = vmatpush1.bf16.msra.mxu1 %v2559_v17  ;;  %v2648_v17 = vld [vmem:[%s3767_s0 + $0x1b0] ss:$36 sps:$4 sm:$0xff]   ;;  %v2649_v18 = vld [vmem:[%s3766_s1 + $0x1c0] ss:$8 sps:$4 sm:$0xff]  }
  0x4c   :  { %1670 = vmatpush1.bf16.msra.mxu0 %v3046_v19  ;;  %1445 = vmatprep.subr.bf16.mxu1 %v2568_v20  ;;  %v2652_v20 = vld [vmem:[%s3767_s0 + $0x1c0] ss:$36 sps:$4 sm:$0xff]  }
  0x4d   :  { %1671 = vmatprep.subr.bf16.mxu0 %v3056_v21  ;;  %1378 = vmatprep.mubr.bf16.mxu1 %v2572_v22  ;;  %v3286_v22 = vld [vmem:[%s3766_s1 + $0x3c0] ss:$8 sps:$4 sm:$0xff]  }
  0x4e   :  { %1604 = vmatprep.mubr.bf16.mxu0 %v2574_v23  ;;  %v2658_v23 = vld [vmem:[%s3766_s1 + $0x1d4] ss:$8 sps:$4 sm:$0xff]  }
  0x4f   :  { %1446 = vmatpush1.bf16.msra.mxu1 %v2566_v24  ;;  %v3296_v24 = vld [vmem:[%s3766_s1 + $0x3d4] ss:$8 sps:$4 sm:$0xff]  }
  0x50   :  { %1672 = vmatpush1.bf16.msra.mxu0 %v3071_v25  ;;  %1447 = vmatprep.subr.bf16.mxu1 %v2579_v26  ;;  %v2662_v26 = vld [vmem:[%s3767_s0 + $0x1fc] ss:$36 sps:$4 sm:$0xff]  }
  0x51   :  { %1673 = vmatprep.subr.bf16.mxu0 %v3080_v27 }
  0x52   :  { %1379 = vmatmul.mubr.bf16.gmra.mrb[8].mxu1 %v2576_v28  ;;  %v2664_v28 = vld [vmem:[%s3767_s0 + $0x20c] ss:$36 sps:$4 sm:$0xff]  }
  0x53   :  { %1605 = vmatmul.mubr.bf16.gmra.mrb[8].mxu0 %v2580_v30  ;;  %1448 = vmatpush1.bf16.msra.mxu1 %v2577_v29  ;;  %v2656_v29 = vld [vmem:[%s3766_s1 + $0x1d0] ss:$8 sps:$4 sm:$0xff]  }
  0x54   :  { %1674 = vmatpush1.bf16.msra.mxu0 %v3094_v31  ;;  %1449 = vmatprep.subr.bf16.mxu1 %v2586_v32  ;;  %v3310_v30 = vld [vmem:[%s3766_s1 + $0x3d0] ss:$8 sps:$4 sm:$0xff]   ;;  %v2669_v32 = vld [vmem:[%s3766_s1 + $0x1e4] ss:$8 sps:$4 sm:$0xff]  }
  0x55   :  { %1675 = vmatprep.subr.bf16.mxu0 %v3104_v33  ;;  %1388 = vmatprep.mubr.bf16.mxu1 %v2590_v34  ;;  %v3320_v34 = vld [vmem:[%s3766_s1 + $0x3e4] ss:$8 sps:$4 sm:$0xff]  }
  0x56   :  { %1614 = vmatprep.mubr.bf16.mxu0 %v2592_v35  ;;  %v2666_v35 = vld [vmem:[%s3767_s0 + $0x1f8] ss:$36 sps:$4 sm:$0xff]  }
  0x57   :  { %1450 = vmatpush1.bf16.msra.mxu1 %v2584_v36  ;;  %v2667_v36 = vld [vmem:[%s3766_s1 + $0x1e0] ss:$8 sps:$4 sm:$0xff]  }
  0x58   :  { %1676 = vmatpush1.bf16.msra.mxu0 %v3119_v37  ;;  %1451 = vmatprep.subr.bf16.mxu1 %v2597_v38  ;;  %v2670_v38 = vld [vmem:[%s3767_s0 + $0x208] ss:$36 sps:$4 sm:$0xff]  }
  0x59   :  { %1677 = vmatprep.subr.bf16.mxu0 %v3128_v39 }
  0x5a   :  { %1389 = vmatmul.mubr.bf16.gmra.mrb[12].mxu1 %v2594_v40  ;;  %v3334_v40 = vld [vmem:[%s3766_s1 + $0x3e0] ss:$8 sps:$4 sm:$0xff]  }
  0x5b   :  { %1615 = vmatmul.mubr.bf16.gmra.mrb[12].mxu0 %v2598_v42  ;;  %1452 = vmatpush1.bf16.msra.mxu1 %v2595_v41  ;;  %v2676_v41 = vld [vmem:[%s3766_s1 + $0x1f4] ss:$8 sps:$4 sm:$0xff]  }
  0x5c   :  { %1678 = vmatpush1.bf16.msra.mxu0 %v3142_v43  ;;  %1453 = vmatprep.subr.bf16.mxu1 %v2604_v44  ;;  %v3344_v42 = vld [vmem:[%s3766_s1 + $0x3f4] ss:$8 sps:$4 sm:$0xff]   ;;  %v2682_v44 = vld [vmem:[%s3767_s0 + $0xc] ss:$36 sps:$4 sm:$0xff]  }
  0x5d   :  { %1679 = vmatprep.subr.bf16.mxu0 %v3152_v45  ;;  %1398 = vmatprep.mubr.bf16.mxu1 %v2608_v46  ;;  %v2685_v46 = vld [vmem:[%s3767_s0 + $0x1c] ss:$36 sps:$4 sm:$0xff]  }
  0x5e   :  { %1624 = vmatprep.mubr.bf16.mxu0 %v2610_v47  ;;  %v2674_v47 = vld [vmem:[%s3766_s1 + $0x1f0] ss:$8 sps:$4 sm:$0xff]  }
  0x5f   :  { %1454 = vmatpush1.bf16.msra.mxu1 %v2602_v48  ;;  %v3359_v48 = vld [vmem:[%s3766_s1 + $0x3f0] ss:$8 sps:$4 sm:$0xff]  }
  0x60   :  { %1680 = vmatpush1.bf16.msra.mxu0 %v3167_v49  ;;  %1455 = vmatprep.subr.bf16.mxu1 %v2615_v50  ;;  %v2688_v50 = vld [vmem:[%s3766_s1 + $0x404] ss:$8 sps:$4 sm:$0xff]  }
  0x61   :  { %1681 = vmatprep.subr.bf16.mxu0 %v3176_v51 }
  0x62   :  { %1399 = vmatmul.mubr.bf16.gmra.mrb[16].mxu1 %v2612_v52  ;;  %v2680_v52 = vld [vmem:[%s3767_s0 + $0x8] ss:$36 sps:$4 sm:$0xff]  }
  0x63   :  { %1625 = vmatmul.mubr.bf16.gmra.mrb[16].mxu0 %v2616_v54  ;;  %1456 = vmatpush1.bf16.msra.mxu1 %v2613_v53  ;;  %v2683_v53 = vld [vmem:[%s3767_s0 + $0x18] ss:$36 sps:$4 sm:$0xff]   ;;  %v2686_v54 = vld [vmem:[%s3766_s1 + $0x400] ss:$8 sps:$4 sm:$0xff]  }
  0x64   :  { %1682 = vmatpush1.bf16.msra.mxu0 %v3190_v55  ;;  %1457 = vmatprep.subr.bf16.mxu1 %v2622_v56  ;;  %v2691_v56 = vld [vmem:[%s3766_s1 + $0x414] ss:$8 sps:$4 sm:$0xff]  }
  0x65   :  { %1683 = vmatprep.subr.bf16.mxu0 %v3200_v57  ;;  %1408 = vmatprep.mubr.bf16.mxu1 %v2626_v58  ;;  %v2692_v58 = vld [vmem:[%s3767_s0 + $0x54] ss:$36 sps:$4 sm:$0xff]  }
  0x66   :  { %1634 = vmatprep.mubr.bf16.mxu0 %v2628_v59  ;;  %v2694_v59 = vld [vmem:[%s3767_s0 + $0x64] ss:$36 sps:$4 sm:$0xff]  }
  0x67   :  { %1458 = vmatpush1.bf16.msra.mxu1 %v2620_v60  ;;  %v2689_v60 = vld [vmem:[%s3766_s1 + $0x410] ss:$8 sps:$4 sm:$0xff]  }
  0x68   :  { %1684 = vmatpush1.bf16.msra.mxu0 %v3215_v61  ;;  %1459 = vmatprep.subr.bf16.mxu1 %v2633_v62  ;;  %v2696_v62 = vld [vmem:[%s3767_s0 + $0x50] ss:$36 sps:$4 sm:$0xff]  }
  0x69   :  { %1685 = vmatprep.subr.bf16.mxu0 %v3224_v63 }
  0x6a   :  { %1409 = vmatmul.mubr.bf16.gmra.mrb[20].mxu1 %v2630_v0  ;;  %v2703_v0 = vld [vmem:[%s3766_s1 + $0x434] ss:$8 sps:$4 sm:$0xff]  }
  0x6b   :  { %1635 = vmatmul.mubr.bf16.gmra.mrb[20].mxu0 %v2634_v2  ;;  %1460 = vmatpush1.bf16.msra.mxu1 %v2631_v1  ;;  %v2704_v1 = vld [vmem:[%s3767_s0 + $0x9c] ss:$36 sps:$4 sm:$0xff]   ;;  %v2712_v2 = vld [vmem:[%s3766_s1 + $0x444] ss:$8 sps:$4 sm:$0xff]  }
  0x6c   :  { %1686 = vmatpush1.bf16.msra.mxu0 %v3238_v4  ;;  %1461 = vmatprep.subr.bf16.mxu1 %v2640_v5  ;;  %v2708_v5 = vld [vmem:[%s3767_s0 + $0x98] ss:$36 sps:$4 sm:$0xff]  }
  0x6d   :  { %1687 = vmatprep.subr.bf16.mxu0 %v3248_v6  ;;  %1418 = vmatprep.mubr.bf16.mxu1 %v2644_v8  ;;  %v2715_v8 = vld [vmem:[%s3766_s1 + $0x454] ss:$8 sps:$4 sm:$0xff]  }
  0x6e   :  { %1644 = vmatprep.mubr.bf16.mxu0 %v2646_v10  ;;  %v2716_v10 = vld [vmem:[%s3767_s0 + $0xe4] ss:$36 sps:$4 sm:$0xff]  }
  0x6f   :  { %1462 = vmatpush1.bf16.msra.mxu1 %v2638_v11  ;;  %v2724_v11 = vld [vmem:[%s3766_s1 + $0x464] ss:$8 sps:$4 sm:$0xff]  }
  0x70   :  { %1688 = vmatpush1.bf16.msra.mxu0 %v3262_v12  ;;  %1463 = vmatprep.subr.bf16.mxu1 %v2651_v14  ;;  %v2720_v14 = vld [vmem:[%s3767_s0 + $0xe0] ss:$36 sps:$4 sm:$0xff]  }
  0x71   :  { %1689 = vmatprep.subr.bf16.mxu0 %v3272_v16 }
  0x72   :  { %1419 = vmatmul.mubr.bf16.gmra.mrb[24].mxu1 %v2648_v17  ;;  %v2727_v17 = vld [vmem:[%s3766_s1 + $0x474] ss:$8 sps:$4 sm:$0xff]  }
  0x73   :  { %1645 = vmatmul.mubr.bf16.gmra.mrb[24].mxu0 %v2652_v20  ;;  %1464 = vmatpush1.bf16.msra.mxu1 %v2649_v18  ;;  %v2728_v18 = vld [vmem:[%s3767_s0 + $0x12c] ss:$36 sps:$4 sm:$0xff]  }
  0x74   :  { %1690 = vmatpush1.bf16.msra.mxu0 %v3286_v22  ;;  %1465 = vmatprep.subr.bf16.mxu1 %v2658_v23  ;;  %v2730_v20 = vld [vmem:[%s3767_s0 + $0x128] ss:$36 sps:$4 sm:$0xff]  }
  0x75   :  { %1691 = vmatprep.subr.bf16.mxu0 %v3296_v24  ;;  %1428 = vmatprep.mubr.bf16.mxu1 %v2662_v26  ;;  %v2735_v23 = vld [vmem:[%s3767_s0 + $0x68] ss:$36 sps:$4 sm:$0xff]  }
  0x76   :  { %1654 = vmatprep.mubr.bf16.mxu0 %v2664_v28  ;;  %v2751_v26 = vld [vmem:[%s3767_s0 + $0x188] ss:$36 sps:$4 sm:$0xff]  }
  0x77   :  { %1466 = vmatpush1.bf16.msra.mxu1 %v2656_v29  ;;  %v2752_v28 = vld [vmem:[%s3767_s0 + $0x1cc] ss:$36 sps:$4 sm:$0xff]  }
  0x78   :  { %1692 = vmatpush1.bf16.msra.mxu0 %v3310_v30  ;;  %1467 = vmatprep.subr.bf16.mxu1 %v2669_v32  ;;  %v2754_v29 = vld [vmem:[%s3767_s0 + $0x1c8] ss:$36 sps:$4 sm:$0xff]   ;;  %v2756_v32 = vld [vmem:[%s3767_s0 + $0x214] ss:$36 sps:$4 sm:$0xff]  }
  0x79   :  { %1693 = vmatprep.subr.bf16.mxu0 %v3320_v34 }
  0x7a   :  { %1429 = vmatmul.mubr.bf16.gmra.mrb[28].mxu1 %v2666_v35  ;;  %v2759_v35 = vld [vmem:[%s3767_s0 + $0x218] ss:$36 sps:$4 sm:$0xff]  }
  0x7b   :  { %1655 = vmatmul.mubr.bf16.gmra.mrb[28].mxu0 %v2670_v38  ;;  %1468 = vmatpush1.bf16.msra.mxu1 %v2667_v36 }
  0x7c   :  { %1694 = vmatpush1.bf16.msra.mxu0 %v3334_v40  ;;  %1469 = vmatprep.subr.bf16.mxu1 %v2676_v41 }
  0x7d   :  { %1695 = vmatprep.subr.bf16.mxu0 %v3344_v42  ;;  %1471 = vmatprep.mubr.bf16.mxu1 %v2682_v44 }
  0x7e   :  { %1697 = vmatprep.mubr.bf16.mxu0 %v2685_v46 }
  0x7f   :  { %1470 = vmatpush1.bf16.msra.mxu1 %v2674_v47 }
  0x80   :  { %1696 = vmatpush1.bf16.msra.mxu0 %v3359_v48  ;;  %2279 = vmatprep.subr.bf16.mxu1 %v2985_v3  ;;  %v2700_v3 = vld [vmem:[%s3766_s1 + $0x424] ss:$8 sps:$4 sm:$0xff]  }
  0x81   :  { %1778 = vmatprep.subr.bf16.mxu0 %v2688_v50 }
  0x82   :  { %1472 = vmatmul.mubr.bf16.vlgmr.msra.gmra.mrb[0].mxu1 %v2680_v52 }
  0x83   :  { %1698 = vmatmul.mubr.bf16.vlgmr.msra.gmra.mrb[0].mxu0 %v2683_v53  ;;  %2295 = vmatpush1.bf16.msra.mxu1 %v2999_v7  ;;  %v2697_v7 = vld [vmem:[%s3767_s0 + $0x60] ss:$36 sps:$4 sm:$0xff]  }
  0x84   :  { %1779 = vmatpush1.bf16.msra.mxu0 %v2686_v54  ;;  %2280 = vmatprep.subr.bf16.mxu1 %v3008_v9  ;;  %v2698_v9 = vld [vmem:[%s3766_s1 + $0x420] ss:$8 sps:$4 sm:$0xff]  }
  0x85   :  { %1780 = vmatprep.subr.bf16.mxu0 %v2691_v56  ;;  %1481 = vmatprep.mubr.bf16.mxu1 %v2692_v58 }
  0x86   :  { %1707 = vmatprep.mubr.bf16.mxu0 %v2694_v59 }
  0x87   :  { %2296 = vmatpush1.bf16.msra.mxu1 %v3023_v13  ;;  %v2706_v13 = vld [vmem:[%s3767_s0 + $0xac] ss:$36 sps:$4 sm:$0xff]  }
  0x88   :  { %1781 = vmatpush1.bf16.msra.mxu0 %v2689_v60  ;;  %2281 = vmatprep.subr.bf16.mxu1 %v3032_v15  ;;  %v2701_v15 = vld [vmem:[%s3766_s1 + $0x430] ss:$8 sps:$4 sm:$0xff]  }
  0x89   :  { %1782 = vmatprep.subr.bf16.mxu0 %v2700_v3 }
  0x8a   :  { %1482 = vmatmul.mubr.bf16.gmra.mrb[4].mxu1 %v2696_v62 }
  0x8b   :  { %1708 = vmatmul.mubr.bf16.gmra.mrb[4].mxu0 %v2697_v7  ;;  %2297 = vmatpush1.bf16.msra.mxu1 %v3046_v19  ;;  %v2709_v19 = vld [vmem:[%s3767_s0 + $0xa8] ss:$36 sps:$4 sm:$0xff]  }
  0x8c   :  { %1783 = vmatpush1.bf16.msra.mxu0 %v2698_v9  ;;  %2282 = vmatprep.subr.bf16.mxu1 %v3056_v21  ;;  %v2710_v21 = vld [vmem:[%s3766_s1 + $0x440] ss:$8 sps:$4 sm:$0xff]  }
  0x8d   :  { %1784 = vmatprep.subr.bf16.mxu0 %v2703_v0  ;;  %1491 = vmatprep.mubr.bf16.mxu1 %v2704_v1 }
  0x8e   :  { %1717 = vmatprep.mubr.bf16.mxu0 %v2706_v13 }
  0x8f   :  { %2298 = vmatpush1.bf16.msra.mxu1 %v3071_v25  ;;  %v2718_v25 = vld [vmem:[%s3767_s0 + $0xf4] ss:$36 sps:$4 sm:$0xff]  }
  0x90   :  { %1785 = vmatpush1.bf16.msra.mxu0 %v2701_v15  ;;  %2283 = vmatprep.subr.bf16.mxu1 %v3080_v27  ;;  %v2713_v27 = vld [vmem:[%s3766_s1 + $0x450] ss:$8 sps:$4 sm:$0xff]  }
  0x91   :  { %1786 = vmatprep.subr.bf16.mxu0 %v2712_v2 }
  0x92   :  { %1492 = vmatmul.mubr.bf16.gmra.mrb[8].mxu1 %v2708_v5 }
  0x93   :  { %1718 = vmatmul.mubr.bf16.gmra.mrb[8].mxu0 %v2709_v19  ;;  %2299 = vmatpush1.bf16.msra.mxu1 %v3094_v31  ;;  %v2721_v31 = vld [vmem:[%s3767_s0 + $0xf0] ss:$36 sps:$4 sm:$0xff]  }
  0x94   :  { %1787 = vmatpush1.bf16.msra.mxu0 %v2710_v21  ;;  %2284 = vmatprep.subr.bf16.mxu1 %v3104_v33  ;;  %v2722_v33 = vld [vmem:[%s3766_s1 + $0x460] ss:$8 sps:$4 sm:$0xff]  }
  0x95   :  { %1788 = vmatprep.subr.bf16.mxu0 %v2715_v8  ;;  %1501 = vmatprep.mubr.bf16.mxu1 %v2716_v10 }
  0x96   :  { %1727 = vmatprep.mubr.bf16.mxu0 %v2718_v25 }
  0x97   :  { %2300 = vmatpush1.bf16.msra.mxu1 %v3119_v37  ;;  %v2725_v37 = vld [vmem:[%s3766_s1 + $0x470] ss:$8 sps:$4 sm:$0xff]  }
  0x98   :  { %1789 = vmatpush1.bf16.msra.mxu0 %v2713_v27  ;;  %2285 = vmatprep.subr.bf16.mxu1 %v3128_v39  ;;  %v2760_v39 = vmov 0  }
  0x99   :  { %1790 = vmatprep.subr.bf16.mxu0 %v2724_v11 }
  0x9a   :  { %1502 = vmatmul.mubr.bf16.gmra.mrb[12].mxu1 %v2720_v14 }
  0x9b   :  { %1728 = vmatmul.mubr.bf16.gmra.mrb[12].mxu0 %v2721_v31  ;;  %2301 = vmatpush1.bf16.msra.mxu1 %v3142_v43  ;;  %v2731_v43 = vld [vmem:[%s3767_s0 + $0x20] ss:$36 sps:$4 sm:$0xff]  }
  0x9c   :  { %1791 = vmatpush1.bf16.msra.mxu0 %v2722_v33  ;;  %2286 = vmatprep.subr.bf16.mxu1 %v3152_v45  ;;  %v2732_v45 = vld [vmem:[%s3767_s0 + $0x174] ss:$36 sps:$4 sm:$0xff]  }
  0x9d   :  { %1792 = vmatprep.subr.bf16.mxu0 %v2727_v17  ;;  %1511 = vmatprep.mubr.bf16.mxu1 %v2728_v18 }
  0x9e   :  { %1810 = vmatprep.mubr.bf16.mxu0 %v2760_v39 }
  0x9f   :  { %2302 = vmatpush1.bf16.msra.mxu1 %v3167_v49  ;;  %v2734_v49 = vld [vmem:[%s3767_s0 + $0x170] ss:$36 sps:$4 sm:$0xff]  }
  0xa0   :  { %1793 = vmatpush1.bf16.msra.mxu0 %v2725_v37  ;;  %2287 = vmatprep.subr.bf16.mxu1 %v3176_v51  ;;  %v2736_v51 = vld [vmem:[%s3767_s0 + $0x1bc] ss:$36 sps:$4 sm:$0xff]  }
  0xa2   :  { %1512 = vmatmul.mubr.bf16.gmra.mrb[16].mxu1 %v2730_v20 }
  0xa3   :  { %1811 = vmatmul.mubr.bf16.vlgmr.msra.gmra.mrb[0].mxu0 %v2731_v43  ;;  %2303 = vmatpush1.bf16.msra.mxu1 %v3190_v55  ;;  %v2738_v55 = vld [vmem:[%s3767_s0 + $0x1b8] ss:$36 sps:$4 sm:$0xff]  }
  0xa4   :  { %1521 = vmatprep.mubr.bf16.mxu1 %v2732_v45  ;;  %2288 = vmatprep.subr.bf16.mxu1 %v3200_v57  ;;  %v2739_v57 = vld [vmem:[%s3767_s0 + $0xb0] ss:$36 sps:$4 sm:$0xff]  }
  0xa5   :  { %1820 = vmatprep.mubr.bf16.mxu0 %v2760_v39 }
  0xa7   :  { %2304 = vmatpush1.bf16.msra.mxu1 %v3215_v61  ;;  %v2740_v61 = vld [vmem:[%s3767_s0 + $0x204] ss:$36 sps:$4 sm:$0xff]  }
  0xa8   :  { %2289 = vmatprep.subr.bf16.mxu1 %v3224_v63  ;;  %v2742_v63 = vld [vmem:[%s3767_s0 + $0x200] ss:$36 sps:$4 sm:$0xff]  }
  0xaa   :  { %1522 = vmatmul.mubr.bf16.gmra.mrb[20].mxu1 %v2734_v49 }
  0xab   :  { %1821 = vmatmul.mubr.bf16.gmra.mrb[4].mxu0 %v2735_v23  ;;  %2305 = vmatpush1.bf16.msra.mxu1 %v3238_v4  ;;  %v2743_v4 = vld [vmem:[%s3767_s0 + $0xf8] ss:$36 sps:$4 sm:$0xff]  }
  0xac   :  { %1531 = vmatprep.mubr.bf16.mxu1 %v2736_v51  ;;  %2290 = vmatprep.subr.bf16.mxu1 %v3248_v6  ;;  %v2746_v6 = vld [vmem:[%s3767_s0 + $0x13c] ss:$36 sps:$4 sm:$0xff]  }
  0xad   :  { %1830 = vmatprep.mubr.bf16.mxu0 %v2760_v39 }
  0xaf   :  { %2306 = vmatpush1.bf16.msra.mxu1 %v3262_v12  ;;  %v2744_v12 = vld [vmem:[%s3767_s0 + $0x138] ss:$36 sps:$4 sm:$0xff]  }
  0xb0   :  { %2291 = vmatprep.subr.bf16.mxu1 %v3272_v16  ;;  %v2747_v16 = vld [vmem:[%s3767_s0 + $0x140] ss:$36 sps:$4 sm:$0xff]  }
  0xb2   :  { %1532 = vmatmul.mubr.bf16.gmra.mrb[24].mxu1 %v2738_v55 }
  0xb3   :  { %1831 = vmatmul.mubr.bf16.gmra.mrb[8].mxu0 %v2739_v57  ;;  %2307 = vmatpush1.bf16.msra.mxu1 %v3286_v22  ;;  %v2748_v22 = vld [vmem:[%s3767_s0 + $0x184] ss:$36 sps:$4 sm:$0xff]  }
  0xb4   :  { %1541 = vmatprep.mubr.bf16.mxu1 %v2740_v61  ;;  %2292 = vmatprep.subr.bf16.mxu1 %v3296_v24  ;;  %v2750_v24 = vld [vmem:[%s3767_s0 + $0x180] ss:$36 sps:$4 sm:$0xff]  }
  0xb5   :  { %1840 = vmatprep.mubr.bf16.mxu0 %v2760_v39 }
  0xb7   :  { %2308 = vmatpush1.bf16.msra.mxu1 %v3310_v30  ;;  %v2755_v30 = vld [vmem:[%s3767_s0 + $0x1d0] ss:$36 sps:$4 sm:$0xff]  }
  0xb8   :  { %2293 = vmatprep.subr.bf16.mxu1 %v3320_v34  ;;  %v2758_v34 = vld [vmem:[%s3767_s0 + $0x210] ss:$36 sps:$4 sm:$0xff]  }
  0xba   :  { %1542 = vmatmul.mubr.bf16.gmra.mrb[28].mxu1 %v2742_v63 }
  0xbb   :  { %1841 = vmatmul.mubr.bf16.gmra.mrb[12].mxu0 %v2743_v4  ;;  %2309 = vmatpush1.bf16.msra.mxu1 %v3334_v40 }
  0xbc   :  { %1737 = vmatprep.mubr.bf16.mxu1 %v2746_v6  ;;  %2294 = vmatprep.subr.bf16.mxu1 %v3344_v42 }
  0xbd   :  { %1850 = vmatprep.mubr.bf16.mxu0 %v2760_v39 }
  0xbf   :  { %2310 = vmatpush1.bf16.msra.mxu1 %v3359_v48 }
  0xc2   :  { %1738 = vmatmul.mubr.bf16.vlgmr.msra.gmra.mrb[32].mxu1 %v2744_v12 }
  0xc3   :  { %1851 = vmatmul.mubr.bf16.gmra.mrb[32].mxu0 %v2747_v16  ;;  %1747 = vmatprep.mubr.bf16.mxu1 %v2748_v22 }
  0xc4   :  { %1860 = vmatprep.mubr.bf16.mxu0 %v2760_v39 }
  0xca   :  { %1748 = vmatmul.mubr.bf16.gmra.mrb[36].mxu1 %v2750_v24 }
  0xcb   :  { %1861 = vmatmul.mubr.bf16.gmra.mrb[36].mxu0 %v2751_v26  ;;  %1757 = vmatprep.mubr.bf16.mxu1 %v2752_v28 }
  0xcc   :  { %1870 = vmatprep.mubr.bf16.mxu0 %v2760_v39 }
  0xd2   :  { %1758 = vmatmul.mubr.bf16.gmra.mrb[40].mxu1 %v2754_v29 }
  0xd3   :  { %1871 = vmatmul.mubr.bf16.gmra.mrb[40].mxu0 %v2755_v30  ;;  %1767 = vmatprep.mubr.bf16.mxu1 %v2756_v32 }
  0xd4   :  { %1880 = vmatprep.mubr.bf16.mxu0 %v2760_v39 }
  0xda   :  { %1768 = vmatmul.mubr.bf16.gmra.mrb[44].mxu1 %v2758_v34 }
  0xdb   :  { %1881 = vmatmul.mubr.bf16.gmra.mrb[44].mxu0 %v2759_v35 }
 0x136   :  { %v1626_v36 = vpop.f32.mrb[16].mxu0 }
 0x137   :  { %v1628_v38 = vpop.f32.mrb[17].mxu0 }
 0x138   :  { %v1630_v40 = vpop.f32.mrb[18].mxu0 }
 0x139   :  { %v1632_v41 = vpop.f32.mrb[19].mxu0 }
 0x13e   :  { %v1636_v42 = vpop.f32.mrb[20].mxu0 }
 0x13f   :  { %v1638_v44 = vpop.f32.mrb[21].mxu0 }
 0x140   :  { %v3565_v46 = vpop.f32.mrb[22].mxu0 }
 0x141   :  { %v3567_v47 = vpop.f32.mrb[23].mxu0 }
 0x146   :  { %v3569_v48 = vpop.f32.mrb[24].mxu0 }
 0x147   :  { %v3571_v50 = vpop.f32.mrb[25].mxu0 }
 0x148   :  { %v3573_v52 = vpop.f32.mrb[26].mxu0 }
 0x149   :  { %v3575_v53 = vpop.f32.mrb[27].mxu0 }
 0x14e   :  { %v3577_v54 = vpop.f32.mrb[28].mxu0 }
 0x14f   :  { %v3579_v56 = vpop.f32.mrb[29].mxu0 }
 0x150   :  { %v3581_v58 = vpop.f32.mrb[30].mxu0 }
 0x151   :  { %v3583_v59 = vpop.f32.mrb[31].mxu0 }
 0x155   :  { %v1473_v60 = vpop.f32.mrb[0].mxu1 }
 0x156   :  { %v1475_v3 = vpop.f32.mrb[1].mxu1 }
 0x157   :  { %v1477_v62 = vpop.f32.mrb[2].mxu1 }
 0x158   :  { %v1479_v7 = vpop.f32.mrb[3].mxu1 }
 0x15d   :  { %v1483_v9 = vpop.f32.mrb[4].mxu1 }
 0x15e   :  { %v1485_v0 = vpop.f32.mrb[5].mxu1 }
 0x15f   :  { %v1487_v1 = vpop.f32.mrb[6].mxu1 }
 0x160   :  { %v1489_v13 = vpop.f32.mrb[7].mxu1 }
 0x165   :  { %v3585_v15 = vpop.f32.mrb[8].mxu1 }
 0x166   :  { %v3587_v2 = vpop.f32.mrb[9].mxu1 }
 0x167   :  { %v3589_v5 = vpop.f32.mrb[10].mxu1 }
 0x168   :  { %v3591_v19 = vpop.f32.mrb[11].mxu1 }
 0x16d   :  { %v3593_v21 = vpop.f32.mrb[12].mxu1 }
 0x16e   :  { %v3595_v8 = vpop.f32.mrb[13].mxu1 }
 0x16f   :  { %v3597_v10 = vpop.f32.mrb[14].mxu1 }
 0x170   :  { %v3599_v25 = vpop.f32.mrb[15].mxu1 }
 0x175   :  { %v1513_v27 = vpop.f32.mrb[16].mxu1 }
 0x176   :  { %v1812_v11 = vpop.f32.mrb[0].mxu0  ;;  %v3601_v14 = vadd.f32 %v1626_v36, %v1513_v27  ;;  %v1515_v33 = vpop.f32.mrb[17].mxu1 }
 0x177   :  { %v2311_v31 = vadd.f32 %v1812_v11, %v1473_v60  ;;  %v1814_v17 = vpop.f32.mrb[1].mxu0  ;;  %v3603_v18 = vadd.f32 %v1628_v38, %v1515_v33  ;;  %v1517_v39 = vpop.f32.mrb[18].mxu1 }
 0x178   :  { %v2312_v37 = vadd.f32 %v1814_v17, %v1475_v3  ;;  %v1816_v20 = vpop.f32.mrb[2].mxu0  ;;  %v3608_v43 = vadd.f32 %v1630_v40, %v1517_v39  ;;  %v1519_v49 = vpop.f32.mrb[19].mxu1 }
 0x179   :  { %1891 = vst [vmem:[%s3768_s2] sm:$0xff] %v2311_v31  ;;  %v2313_v45 = vadd.f32 %v1816_v20, %v1477_v62  ;;  %v1818_v23 = vpop.f32.mrb[3].mxu0  ;;  %v3613_v51 = vadd.f32 %v1632_v41, %v1519_v49  ;;  %v1965_v57 = vmul.f32 %v2311_v31, %v2311_v31 }
 0x17a   :  { %1892 = vst [vmem:[%s3768_s2 + $0x8] sm:$0xff] %v2312_v37  ;;  %v2314_v55 = vadd.f32 %v1818_v23, %v1479_v7  ;;  %v1966_v4 = vmul.f32 %v2312_v37, %v2312_v37 }
 0x17b   :  { %1893 = vst [vmem:[%s3768_s2 + $0x10] sm:$0xff] %v2313_v45  ;;  %v1923_v61 = vadd.f32 %v2313_v45, %v2311_v31  ;;  %v1967_v63 = vmul.f32 %v2313_v45, %v2313_v45 }
 0x17c   :  { %1894 = vst [vmem:[%s3768_s2 + $0x18] sm:$0xff] %v2314_v55  ;;  %v1944_v6 = vadd.f32 %v2314_v55, %v2312_v37  ;;  %v1968_v12 = vmul.f32 %v2314_v55, %v2314_v55 }
 0x17d   :  { %v1997_v16 = vadd.f32 %v1967_v63, %v1965_v57  ;;  %v1523_v24 = vpop.f32.mrb[20].mxu1 }
 0x17e   :  { %v2018_v22 = vadd.f32 %v1968_v12, %v1966_v4  ;;  %v1822_v26 = vpop.f32.mrb[4].mxu0  ;;  %v3621_v28 = vadd.f32 %v1636_v42, %v1523_v24  ;;  %v1525_v30 = vpop.f32.mrb[21].mxu1 }
 0x17f   :  { %v2315_v29 = vadd.f32 %v1822_v26, %v1483_v9  ;;  %v1824_v32 = vpop.f32.mrb[5].mxu0  ;;  %v3623_v34 = vadd.f32 %v1638_v44, %v1525_v30  ;;  %v1527_v36 = vpop.f32.mrb[22].mxu1 }
 0x180   :  { %v2316_v35 = vadd.f32 %v1824_v32, %v1485_v0  ;;  %v1826_v38 = vpop.f32.mrb[6].mxu0  ;;  %v3629_v60 = vadd.f32 %v3565_v46, %v1527_v36  ;;  %v1529_v42 = vpop.f32.mrb[23].mxu1 }
 0x181   :  { %1895 = vst [vmem:[%s3768_s2 + $0x20] sm:$0xff] %v2315_v29  ;;  %v1924_v40 = vadd.f32 %v2315_v29, %v1923_v61  ;;  %v1969_v41 = vmul.f32 %v2315_v29, %v2315_v29  ;;  %v2317_v3 = vadd.f32 %v1826_v38, %v1487_v1  ;;  %v1828_v62 = vpop.f32.mrb[7].mxu0  ;;  %v3635_v9 = vadd.f32 %v3567_v47, %v1529_v42 }
 0x182   :  { %1896 = vst [vmem:[%s3768_s2 + $0x28] sm:$0xff] %v2316_v35  ;;  %v1945_v44 = vadd.f32 %v2316_v35, %v1944_v6  ;;  %v1970_v7 = vmul.f32 %v2316_v35, %v2316_v35  ;;  %v2318_v0 = vadd.f32 %v1828_v62, %v1489_v13 }
 0x183   :  { %v1998_v27 = vadd.f32 %v1997_v16, %v1969_v41  ;;  %1897 = vst [vmem:[%s3768_s2 + $0x30] sm:$0xff] %v2317_v3  ;;  %v1925_v46 = vadd.f32 %v2317_v3, %v1924_v40  ;;  %v1971_v11 = vmul.f32 %v2317_v3, %v2317_v3 }
 0x184   :  { %v2019_v1 = vadd.f32 %v2018_v22, %v1970_v7  ;;  %1898 = vst [vmem:[%s3768_s2 + $0x38] sm:$0xff] %v2318_v0  ;;  %v1946_v31 = vadd.f32 %v2318_v0, %v1945_v44  ;;  %v1972_v33 = vmul.f32 %v2318_v0, %v2318_v0 }
 0x185   :  { %v1999_v17 = vadd.f32 %v1998_v27, %v1971_v11  ;;  %v1533_v39 = vpop.f32.mrb[24].mxu1 }
 0x186   :  { %v2020_v37 = vadd.f32 %v2019_v1, %v1972_v33  ;;  %v1832_v47 = vpop.f32.mrb[8].mxu0  ;;  %v3644_v13 = vadd.f32 %v3569_v48, %v1533_v39  ;;  %v1535_v45 = vpop.f32.mrb[25].mxu1 }
 0x187   :  { %v2319_v20 = vadd.f32 %v1832_v47, %v3585_v15  ;;  %v1834_v49 = vpop.f32.mrb[9].mxu0  ;;  %v3648_v23 = vadd.f32 %v3571_v50, %v1535_v45  ;;  %v1537_v57 = vpop.f32.mrb[26].mxu1 }
 0x188   :  { %v2320_v55 = vadd.f32 %v1834_v49, %v3587_v2  ;;  %v1836_v61 = vpop.f32.mrb[10].mxu0  ;;  %v3655_v48 = vadd.f32 %v3573_v52, %v1537_v57  ;;  %v1539_v6 = vpop.f32.mrb[27].mxu1 }
 0x189   :  { %1899 = vst [vmem:[%s3768_s2 + $0x40] sm:$0xff] %v2319_v20  ;;  %v1926_v63 = vadd.f32 %v2319_v20, %v1925_v46  ;;  %v1973_v4 = vmul.f32 %v2319_v20, %v2319_v20  ;;  %v2321_v15 = vadd.f32 %v1836_v61, %v3589_v5  ;;  %v1838_v12 = vpop.f32.mrb[11].mxu0  ;;  %v3662_v16 = vadd.f32 %v3575_v53, %v1539_v6 }
 0x18a   :  { %1900 = vst [vmem:[%s3768_s2 + $0x48] sm:$0xff] %v2320_v55  ;;  %v1947_v50 = vadd.f32 %v2320_v55, %v1946_v31  ;;  %v1974_v2 = vmul.f32 %v2320_v55, %v2320_v55  ;;  %v2322_v22 = vadd.f32 %v1838_v12, %v3591_v19 }
 0x18b   :  { %v2000_v24 = vadd.f32 %v1999_v17, %v1973_v4  ;;  %1901 = vst [vmem:[%s3768_s2 + $0x50] sm:$0xff] %v2321_v15  ;;  %v1927_v52 = vadd.f32 %v2321_v15, %v1926_v63  ;;  %v1975_v5 = vmul.f32 %v2321_v15, %v2321_v15 }
 0x18c   :  { %v2021_v26 = vadd.f32 %v2020_v37, %v1974_v2  ;;  %1902 = vst [vmem:[%s3768_s2 + $0x58] sm:$0xff] %v2322_v22  ;;  %v1948_v29 = vadd.f32 %v2322_v22, %v1947_v50  ;;  %v1976_v30 = vmul.f32 %v2322_v22, %v2322_v22 }
 0x18d   :  { %v2001_v32 = vadd.f32 %v2000_v24, %v1975_v5  ;;  %v1543_v53 = vpop.f32.mrb[28].mxu1 }
 0x18e   :  { %v2022_v35 = vadd.f32 %v2021_v26, %v1976_v30  ;;  %v1842_v36 = vpop.f32.mrb[12].mxu0  ;;  %v3672_v19 = vadd.f32 %v3577_v54, %v1543_v53  ;;  %v1545_v40 = vpop.f32.mrb[29].mxu1 }
 0x18f   :  { %v2323_v38 = vadd.f32 %v1842_v36, %v3593_v21  ;;  %v1844_v41 = vpop.f32.mrb[13].mxu0  ;;  %v3676_v3 = vadd.f32 %v3579_v56, %v1545_v40  ;;  %v1547_v62 = vpop.f32.mrb[30].mxu1 }
 0x190   :  { %v2324_v42 = vadd.f32 %v1844_v41, %v3595_v8  ;;  %v1846_v44 = vpop.f32.mrb[14].mxu0  ;;  %v3683_v54 = vadd.f32 %v3581_v58, %v1547_v62  ;;  %v1549_v27 = vpop.f32.mrb[31].mxu1 }
 0x191   :  { %1903 = vst [vmem:[%s3768_s2 + $0x60] sm:$0xff] %v2323_v38  ;;  %v1928_v7 = vadd.f32 %v2323_v38, %v1927_v52  ;;  %v1977_v0 = vmul.f32 %v2323_v38, %v2323_v38  ;;  %v2325_v21 = vadd.f32 %v1846_v44, %v3597_v10  ;;  %v1848_v46 = vpop.f32.mrb[15].mxu0  ;;  %v3690_v11 = vadd.f32 %v3583_v59, %v1549_v27 }
 0x192   :  { %1904 = vst [vmem:[%s3768_s2 + $0x68] sm:$0xff] %v2324_v42  ;;  %v1949_v56 = vadd.f32 %v2324_v42, %v1948_v29  ;;  %v1978_v8 = vmul.f32 %v2324_v42, %v2324_v42  ;;  %v2326_v1 = vadd.f32 %v1848_v46, %v3599_v25 }
 0x193   :  { %v2002_v31 = vadd.f32 %v2001_v32, %v1977_v0  ;;  %1905 = vst [vmem:[%s3768_s2 + $0x70] sm:$0xff] %v2325_v21  ;;  %v1929_v58 = vadd.f32 %v2325_v21, %v1928_v7  ;;  %v1979_v10 = vmul.f32 %v2325_v21, %v2325_v21 }
 0x194   :  { %v2023_v33 = vadd.f32 %v2022_v35, %v1978_v8  ;;  %1906 = vst [vmem:[%s3768_s2 + $0x78] sm:$0xff] %v2326_v1  ;;  %v1950_v17 = vadd.f32 %v2326_v1, %v1949_v56  ;;  %v1980_v37 = vmul.f32 %v2326_v1, %v2326_v1 }
 0x195   :  { %v2003_v39 = vadd.f32 %v2002_v31, %v1979_v10  ;;  %v1739_v59 = vpop.f32.mrb[32].mxu1 }
 0x196   :  { %v2024_v47 = vadd.f32 %v2023_v33, %v1980_v37  ;;  %v1852_v20 = vpop.f32.mrb[32].mxu0  ;;  %v2328_v25 = vadd.f32 %v3601_v14, %v1739_v59  ;;  %v1741_v45 = vpop.f32.mrb[33].mxu1 }
 0x197   :  { %v1854_v49 = vpop.f32.mrb[33].mxu0  ;;  %v2331_v55 = vadd.f32 %v3603_v18, %v1741_v45  ;;  %v1743_v57 = vpop.f32.mrb[34].mxu1 }
 0x198   :  { %v1856_v61 = vpop.f32.mrb[34].mxu0  ;;  %v2329_v63 = vadd.f32 %v2328_v25, %v1852_v20  ;;  %v2334_v4 = vadd.f32 %v3608_v43, %v1743_v57  ;;  %v1745_v15 = vpop.f32.mrb[35].mxu1 }
 0x199   :  { %v1858_v6 = vpop.f32.mrb[35].mxu0  ;;  %v2332_v12 = vadd.f32 %v2331_v55, %v1854_v49  ;;  %v2337_v50 = vadd.f32 %v3613_v51, %v1745_v15 }
 0x19a   :  { %1907 = vst [vmem:[%s3768_s2 + $0x80] sm:$0xff] %v2329_v63  ;;  %v1930_v2 = vadd.f32 %v2329_v63, %v1929_v58  ;;  %v1981_v14 = vmul.f32 %v2329_v63, %v2329_v63  ;;  %v2335_v22 = vadd.f32 %v2334_v4, %v1856_v61 }
 0x19b   :  { %1908 = vst [vmem:[%s3768_s2 + $0x88] sm:$0xff] %v2332_v12  ;;  %v1951_v18 = vadd.f32 %v2332_v12, %v1950_v17  ;;  %v1982_v24 = vmul.f32 %v2332_v12, %v2332_v12  ;;  %v2338_v52 = vadd.f32 %v2337_v50, %v1858_v6 }
 0x19c   :  { %v2004_v43 = vadd.f32 %v2003_v39, %v1981_v14  ;;  %1909 = vst [vmem:[%s3768_s2 + $0x90] sm:$0xff] %v2335_v22  ;;  %v1931_v51 = vadd.f32 %v2335_v22, %v1930_v2  ;;  %v1983_v5 = vmul.f32 %v2335_v22, %v2335_v22 }
 0x19d   :  { %v2025_v26 = vadd.f32 %v2024_v47, %v1982_v24  ;;  %1910 = vst [vmem:[%s3768_s2 + $0x98] sm:$0xff] %v2338_v52  ;;  %v1952_v29 = vadd.f32 %v2338_v52, %v1951_v18  ;;  %v1984_v30 = vmul.f32 %v2338_v52, %v2338_v52  ;;  %v1749_v32 = vpop.f32.mrb[36].mxu1 }
 0x19e   :  { %v1862_v35 = vpop.f32.mrb[36].mxu0  ;;  %v2005_v53 = vadd.f32 %v2004_v43, %v1983_v5  ;;  %v2340_v36 = vadd.f32 %v3621_v28, %v1749_v32  ;;  %v1751_v38 = vpop.f32.mrb[37].mxu1 }
 0x19f   :  { %v1864_v40 = vpop.f32.mrb[37].mxu0  ;;  %v2026_v41 = vadd.f32 %v2025_v26, %v1984_v30  ;;  %v2343_v42 = vadd.f32 %v3623_v34, %v1751_v38  ;;  %v1753_v62 = vpop.f32.mrb[38].mxu1 }
 0x1a0   :  { %v1866_v44 = vpop.f32.mrb[38].mxu0  ;;  %v2341_v7 = vadd.f32 %v2340_v36, %v1862_v35  ;;  %v2346_v0 = vadd.f32 %v3629_v60, %v1753_v62  ;;  %v1755_v21 = vpop.f32.mrb[39].mxu1 }
 0x1a1   :  { %v1868_v27 = vpop.f32.mrb[39].mxu0  ;;  %v2344_v46 = vadd.f32 %v2343_v42, %v1864_v40  ;;  %v2349_v56 = vadd.f32 %v3635_v9, %v1755_v21 }
 0x1a2   :  { %1911 = vst [vmem:[%s3768_s2 + $0xa0] sm:$0xff] %v2341_v7  ;;  %v1932_v28 = vadd.f32 %v2341_v7, %v1931_v51  ;;  %v1985_v8 = vmul.f32 %v2341_v7, %v2341_v7  ;;  %v2347_v1 = vadd.f32 %v2346_v0, %v1866_v44 }
 0x1a3   :  { %1912 = vst [vmem:[%s3768_s2 + $0xa8] sm:$0xff] %v2344_v46  ;;  %v1953_v34 = vadd.f32 %v2344_v46, %v1952_v29  ;;  %v1986_v31 = vmul.f32 %v2344_v46, %v2344_v46  ;;  %v2350_v58 = vadd.f32 %v2349_v56, %v1868_v27 }
 0x1a4   :  { %v2006_v60 = vadd.f32 %v2005_v53, %v1985_v8  ;;  %1913 = vst [vmem:[%s3768_s2 + $0xb0] sm:$0xff] %v2347_v1  ;;  %v1933_v9 = vadd.f32 %v2347_v1, %v1932_v28  ;;  %v1987_v10 = vmul.f32 %v2347_v1, %v2347_v1 }
 0x1a5   :  { %v2027_v33 = vadd.f32 %v2026_v41, %v1986_v31  ;;  %1914 = vst [vmem:[%s3768_s2 + $0xb8] sm:$0xff] %v2350_v58  ;;  %v1954_v17 = vadd.f32 %v2350_v58, %v1953_v34  ;;  %v1988_v37 = vmul.f32 %v2350_v58, %v2350_v58  ;;  %v1759_v39 = vpop.f32.mrb[40].mxu1 }
 0x1a6   :  { %v1872_v47 = vpop.f32.mrb[40].mxu0  ;;  %v2007_v59 = vadd.f32 %v2006_v60, %v1987_v10  ;;  %v2352_v20 = vadd.f32 %v3644_v13, %v1759_v39  ;;  %v1761_v25 = vpop.f32.mrb[41].mxu1 }
 0x1a7   :  { %v1874_v45 = vpop.f32.mrb[41].mxu0  ;;  %v2028_v49 = vadd.f32 %v2027_v33, %v1988_v37  ;;  %v2355_v55 = vadd.f32 %v3648_v23, %v1761_v25  ;;  %v1763_v57 = vpop.f32.mrb[42].mxu1 }
 0x1a8   :  { %v1876_v61 = vpop.f32.mrb[42].mxu0  ;;  %v2353_v63 = vadd.f32 %v2352_v20, %v1872_v47  ;;  %v2358_v4 = vadd.f32 %v3655_v48, %v1763_v57  ;;  %v1765_v15 = vpop.f32.mrb[43].mxu1 }
 0x1a9   :  { %v1878_v6 = vpop.f32.mrb[43].mxu0  ;;  %v2356_v12 = vadd.f32 %v2355_v55, %v1874_v45  ;;  %v2361_v50 = vadd.f32 %v3662_v16, %v1765_v15 }
 0x1aa   :  { %1915 = vst [vmem:[%s3768_s2 + $0xc0] sm:$0xff] %v2353_v63  ;;  %v1934_v13 = vadd.f32 %v2353_v63, %v1933_v9  ;;  %v1989_v2 = vmul.f32 %v2353_v63, %v2353_v63  ;;  %v2359_v14 = vadd.f32 %v2358_v4, %v1876_v61 }
 0x1ab   :  { %1916 = vst [vmem:[%s3768_s2 + $0xc8] sm:$0xff] %v2356_v12  ;;  %v1955_v23 = vadd.f32 %v2356_v12, %v1954_v17  ;;  %v1990_v22 = vmul.f32 %v2356_v12, %v2356_v12  ;;  %v2362_v18 = vadd.f32 %v2361_v50, %v1878_v6 }
 0x1ac   :  { %v2008_v48 = vadd.f32 %v2007_v59, %v1989_v2  ;;  %1917 = vst [vmem:[%s3768_s2 + $0xd0] sm:$0xff] %v2359_v14  ;;  %v1935_v16 = vadd.f32 %v2359_v14, %v1934_v13  ;;  %v1991_v24 = vmul.f32 %v2359_v14, %v2359_v14 }
 0x1ad   :  { %v2029_v52 = vadd.f32 %v2028_v49, %v1990_v22  ;;  %1918 = vst [vmem:[%s3768_s2 + $0xd8] sm:$0xff] %v2362_v18  ;;  %v1956_v43 = vadd.f32 %v2362_v18, %v1955_v23  ;;  %v1992_v51 = vmul.f32 %v2362_v18, %v2362_v18  ;;  %v1769_v5 = vpop.f32.mrb[44].mxu1 }
 0x1ae   :  { %v1882_v26 = vpop.f32.mrb[44].mxu0  ;;  %v2009_v29 = vadd.f32 %v2008_v48, %v1991_v24  ;;  %v2364_v30 = vadd.f32 %v3672_v19, %v1769_v5  ;;  %v1771_v32 = vpop.f32.mrb[45].mxu1 }
 0x1af   :  { %v1884_v35 = vpop.f32.mrb[45].mxu0  ;;  %v2030_v53 = vadd.f32 %v2029_v52, %v1992_v51  ;;  %v2367_v36 = vadd.f32 %v3676_v3, %v1771_v32  ;;  %v1773_v38 = vpop.f32.mrb[46].mxu1 }
 0x1b0   :  { %v1886_v40 = vpop.f32.mrb[46].mxu0  ;;  %v2365_v41 = vadd.f32 %v2364_v30, %v1882_v26  ;;  %v2370_v42 = vadd.f32 %v3683_v54, %v1773_v38  ;;  %v1775_v62 = vpop.f32.mrb[47].mxu1 }
 0x1b1   :  { %v1888_v44 = vpop.f32.mrb[47].mxu0  ;;  %v2368_v7 = vadd.f32 %v2367_v36, %v1884_v35  ;;  %v2373_v0 = vadd.f32 %v3690_v11, %v1775_v62 }
 0x1b2   :  { %1919 = vst [vmem:[%s3768_s2 + $0xe0] sm:$0xff] %v2365_v41  ;;  %v1936_v19 = vadd.f32 %v2365_v41, %v1935_v16  ;;  %v1993_v21 = vmul.f32 %v2365_v41, %v2365_v41  ;;  %v2371_v27 = vadd.f32 %v2370_v42, %v1886_v40 }
 0x1b3   :  { %1920 = vst [vmem:[%s3768_s2 + $0xe8] sm:$0xff] %v2368_v7  ;;  %v1957_v3 = vadd.f32 %v2368_v7, %v1956_v43  ;;  %v1994_v46 = vmul.f32 %v2368_v7, %v2368_v7  ;;  %v2374_v56 = vadd.f32 %v2373_v0, %v1888_v44 }
 0x1b4   :  { %v2010_v54 = vadd.f32 %v2009_v29, %v1993_v21  ;;  %1921 = vst [vmem:[%s3768_s2 + $0xf0] sm:$0xff] %v2371_v27  ;;  %v1937_v11 = vadd.f32 %v2371_v27, %v1936_v19  ;;  %v1995_v28 = vmul.f32 %v2371_v27, %v2371_v27 }
 0x1b5   :  { %v2031_v8 = vadd.f32 %v2030_v53, %v1994_v46  ;;  %1922 = vst [vmem:[%s3768_s2 + $0xf8] sm:$0xff] %v2374_v56  ;;  %v1958_v1 = vadd.f32 %v2374_v56, %v1957_v3  ;;  %v1996_v34 = vmul.f32 %v2374_v56, %v2374_v56 }
 0x1b6   :  { %v1938_v31 = vrot.slane %v1937_v11, 4  ;;  %v2011_v58 = vadd.f32 %v2010_v54, %v1995_v28 }
 0x1b7   :  { %v1959_v60 = vrot.slane %v1958_v1, 4  ;;  %v2032_v9 = vadd.f32 %v2031_v8, %v1996_v34 }
 0x1b8   :  { %v1939_v10 = vadd.f32 %v1938_v31, %v1937_v11  ;;  %v2012_v33 = vrot.slane %v2011_v58, 4 }
 0x1b9   :  { %v1960_v17 = vadd.f32 %v1959_v60, %v1958_v1  ;;  %v2033_v37 = vrot.slane %v2032_v9, 4 }
 0x1ba   :  { %v1940_v39 = vrot.slane %v1939_v10, 2  ;;  %v2013_v47 = vadd.f32 %v2012_v33, %v2011_v58 }
 0x1bb   :  { %v1961_v59 = vrot.slane %v1960_v17, 2  ;;  %v2034_v20 = vadd.f32 %v2033_v37, %v2032_v9 }
 0x1bc   :  { %v1941_v25 = vadd.f32 %v1940_v39, %v1939_v10  ;;  %v2014_v45 = vrot.slane %v2013_v47, 2 }
 0x1bd   :  { %v1962_v49 = vadd.f32 %v1961_v59, %v1960_v17  ;;  %v2035_v55 = vrot.slane %v2034_v20, 2 }
 0x1be   :  { %v1942_v57 = vrot.slane %v1941_v25, 1  ;;  %v2015_v61 = vadd.f32 %v2014_v45, %v2013_v47 }
 0x1bf   :  { %v1963_v63 = vrot.slane %v1962_v49, 1  ;;  %v2036_v4 = vadd.f32 %v2035_v55, %v2034_v20 }
 0x1c0   :  { %v2016_v15 = vrot.slane %v2015_v61, 1  ;;  %v1943_v12 = vadd.f32 %v1942_v57, %v1941_v25 }
 0x1c1   :  { %v2037_v6 = vrot.slane %v2036_v4, 1  ;;  %v1964_v13 = vadd.f32 %v1963_v63, %v1962_v49 }
 0x1c2   :  { %v2017_v50 = vadd.f32 %v2016_v15, %v2015_v61 }
 0x1c3   :  { %v2038_v2 = vadd.f32 %v2037_v6, %v2036_v4 }
 0x1c4   :  { %v2040_v14 = vsel %vm2039_vm0, %v1943_v12, %v2017_v50 }
 0x1c5   :  { %v2041_v23 = vsel %vm2039_vm0, %v1964_v13, %v2038_v2 }
 0x1c6   :  { %v2044_v22 = vcombine.low %v2040_v14, %v2041_v23 }
 0x1c8   :  { %2278 = vst.sshfl [vmem:[%s3769_s3] sm:$0x33 pattern:$0x76325410] %v2044_v22 }

// kernel: residual_block_forward.7
= control target key start
LH: loop header
LB: loop body
LE: loop exit
PB: predicated region body
PF: predicated region fallthrough
CT: control target
= control target key end

     0   :  { %s501_s12 = smov 0   ;;  %s503_s13 = smov 0   ;;  %s588_s0 = inlined_call_operand.vmem [shape: f32[2,8,8,128], index: 0, kind: input, shape index: {}]   ;;  %s589_s1 = inlined_call_operand.vmem [shape: f32[2,8,8,256], index: 1, kind: input, shape index: {}]   ;;  %s590_s2 = inlined_call_operand.vmem [shape: f32[3,128], index: 2, kind: input, shape index: {}]   ;;  %s591_s3 = inlined_call_operand.vmem [shape: f32[2,8,8,128], index: 3, kind: output, shape index: {}]  }
   0x1   :  { %s505_s14 = smov 0  }
   0x2 LB: > { %s407_s15 = sadd.s32 4294967295, %s479_s14   ;;  %s518_s16 = sadd.s32 1, %s479_s14   ;;  %s479_s14 = sphi %s505_s14, %s594_s14   ;;  %s475_s13 = sphi %s503_s13, %s593_s13   ;;  %s471_s12 = sphi %s501_s12, %s592_s12  }
   0x3   : > { %s43_s17 = ssub.s32 %s479_s14, %s518_s16  ;;  %s46_s18 = sadd.s32 1, %s475_s13 }
   0x4   : > { %p44_p0 = scmp.eq.s32.totalorder %s43_s17, 0  ;;  %p53_p1 = scmp.ne.s32.totalorder %s475_s13, %s471_s12 }
   0x5   : > { %p54_p2 = scmp.eq.s32.totalorder %s479_s14, 0  ;;  %p410_p4 = scmp.ge.s32.totalorder %s479_s14, 2 }
   0x6   : > { %s527_s19 = scalar_select %p44_p0, %s475_s13, %s46_s18  }
   0x7   : > { %p55_p3 = por %p54_p2, %p53_p1  ;;  %129 = sbr.rel (%p410_p4) target bundleno = 22 (0x16), region = 20 }
   0xe   : > { %140 = sbr.rel (!%p55_p3) target bundleno = 22 (0x16), region = 28  ;;  %s142_s20 = sand.u32 (%p55_p3), 1, %s475_s13  }
   0xf   : > { %s430_s21 = sshll.u32 (%p55_p3), %s479_s14, 7  ;;  %s411_s22 = sshll.u32 (%p55_p3), %s142_s20, 6 }
  0x10   : > { %s359_s25 = scalar_lea.vmem (%p55_p3), %s589_s1, %s430_s21  ;;  %s144_s26 = scalar_lea.vmem (%p55_p3), [#allocation2], %s411_s22 }
  0x11   : > { %v414_v0 = vld [vmem:[%s359_s25 + $0x8] sm:$0xff] (%p55_p3)  ;;  %v415_v1 = vld [vmem:[%s359_s25 + $0x18] sm:$0xff] (%p55_p3) }
  0x12   : > { %v416_v2 = vld [vmem:[%s359_s25 + $0x28] sm:$0xff] (%p55_p3)  ;;  %191 = vst [vmem:[%s144_s26] sm:$0xff] (%p55_p3), %v414_v0  ;;  %193 = vst [vmem:[%s144_s26 + $0x8] sm:$0xff] (%p55_p3), %v415_v1  ;;  %v417_v3 = vld [vmem:[%s359_s25 + $0x38] sm:$0xff] (%p55_p3) }
  0x13   : > { %195 = vst [vmem:[%s144_s26 + $0x10] sm:$0xff] (%p55_p3), %v416_v2  ;;  %v418_v4 = vld [vmem:[%s359_s25 + $0x48] sm:$0xff] (%p55_p3)  ;;  %v419_v5 = vld [vmem:[%s359_s25 + $0x58] sm:$0xff] (%p55_p3)  ;;  %197 = vst [vmem:[%s144_s26 + $0x18] sm:$0xff] (%p55_p3), %v417_v3 }
  0x14   : > { %199 = vst [vmem:[%s144_s26 + $0x20] sm:$0xff] (%p55_p3), %v418_v4  ;;  %201 = vst [vmem:[%s144_s26 + $0x28] sm:$0xff] (%p55_p3), %v419_v5  ;;  %v420_v6 = vld [vmem:[%s359_s25 + $0x68] sm:$0xff] (%p55_p3)  ;;  %v421_v7 = vld [vmem:[%s359_s25 + $0x78] sm:$0xff] (%p55_p3) }
  0x15   : > { %203 = vst [vmem:[%s144_s26 + $0x30] sm:$0xff] %v420_v6  ;;  %205 = vst [vmem:[%s144_s26 + $0x38] sm:$0xff] %v421_v7 }
  0x16 PF: > { %p422_p5 = scmp.ge.s32.totalorder %s479_s14, 1  ;;  %p210_p6 = scmp.lt.s32.totalorder %s479_s14, 3 }
  0x18   : > { %p211_p7 = pnand %p422_p5, %p210_p6 }
  0x19   : > { %s217_s27 = sand.u32 (!%p211_p7), 1, %s471_s12   ;;  %p245_p8 = scmp.lt.s32.totalorder (!%p211_p7), %s407_s15, 1  ;;  %v272_v8 = vlaneseq (!%p211_p7)  ;;  %v255_v10 = vld [vmem:[%s590_s2] sm:$0x7] (!%p211_p7) }
  0x1a   : > { %214 = sbr.rel (%p211_p7) target bundleno = 49 (0x31), region = 66  ;;  %s423_s28 = sshll.u32 (!%p211_p7), %s217_s27, 6 }
  0x1b   : > { %v273_v9 = vshrl.u32 (!%p211_p7), %v272_v8, 7  ;;  %s548_s5 = scalar_lea.vmem (!%p211_p7), [#allocation2], %s423_s28 }
  0x1c   : > { %v264_v14 = vld [vmem:[%s548_s5] sm:$0xff] (!%p211_p7)  ;;  %v265_v15 = vld [vmem:[%s548_s5 + $0x8] sm:$0xff] (!%p211_p7)  ;;  %v266_v16 = vld [vmem:[%s548_s5 + $0x10] sm:$0xff] (!%p211_p7) }
  0x1d   : > { %v274_v11 = vsub.s32 (!%p211_p7), 0, %v273_v9  ;;  %v286_v12 = vsub.s32 (!%p211_p7), 1, %v273_v9  ;;  %v306_v13 = vsub.s32 (!%p211_p7), 2, %v273_v9  ;;  %v267_v19 = vld [vmem:[%s548_s5 + $0x18] sm:$0xff] (!%p211_p7)  ;;  %v268_v20 = vld [vmem:[%s548_s5 + $0x20] sm:$0xff] (!%p211_p7)  ;;  %v269_v21 = vld [vmem:[%s548_s5 + $0x28] sm:$0xff] (!%p211_p7) }
  0x1e   : > { %v270_v42 = vld [vmem:[%s548_s5 + $0x30] sm:$0xff] (!%p211_p7)  ;;  %v271_v56 = vld [vmem:[%s548_s5 + $0x38] sm:$0xff] (!%p211_p7) }
  0x1f   : > { %v275_v17 = vrot.slane (!%p211_p7), %v255_v10, %v274_v11  ;;  %v287_v18 = vrot.slane (!%p211_p7), %v255_v10, %v286_v12  ;;  %v307_v23 = vrot.slane (!%p211_p7), %v255_v10, %v306_v13 }
  0x21   : > { %s596_s15 = smov (!%p245_p8, %s407_s15), 1  ;;  %v288_v27 = vmul.f32 %v287_v18, %v264_v14  ;;  %v289_v29 = vmul.f32 %v287_v18, %v265_v15  ;;  %v290_v34 = vmul.f32 %v287_v18, %v266_v16  ;;  %v291_v36 = vmul.f32 %v287_v18, %v267_v19 }
  0x22   : > { %s431_s4 = sshll.u32 %s596_s15, 6  ;;  %v292_v41 = vmul.f32 %v287_v18, %v268_v20  ;;  %v293_v46 = vmul.f32 %v287_v18, %v269_v21  ;;  %v294_v55 = vmul.f32 %v287_v18, %v270_v42  ;;  %v295_v2 = vmul.f32 %v287_v18, %v271_v56 }
  0x23   : > { %s558_s8 = scalar_lea.vmem %s588_s0, %s431_s4  ;;  %s254_s11 = scalar_lea.vmem %s591_s3, %s431_s4 }
  0x24   : > { %v256_v22 = vld [vmem:[%s558_s8] sm:$0xff]  ;;  %v257_v24 = vld [vmem:[%s558_s8 + $0x8] sm:$0xff]  ;;  %v258_v25 = vld [vmem:[%s558_s8 + $0x10] sm:$0xff] }
  0x25   : > { %v276_v26 = vmul.f32 %v275_v17, %v256_v22  ;;  %v277_v28 = vmul.f32 %v275_v17, %v257_v24  ;;  %v259_v30 = vld [vmem:[%s558_s8 + $0x18] sm:$0xff]  ;;  %v260_v31 = vld [vmem:[%s558_s8 + $0x20] sm:$0xff]  ;;  %v261_v32 = vld [vmem:[%s558_s8 + $0x28] sm:$0xff]  ;;  %v278_v33 = vmul.f32 %v275_v17, %v258_v25 }
  0x26   : > { %v279_v35 = vmul.f32 %v275_v17, %v259_v30  ;;  %v262_v37 = vld [vmem:[%s558_s8 + $0x30] sm:$0xff]  ;;  %v280_v40 = vmul.f32 %v275_v17, %v260_v31  ;;  %v281_v45 = vmul.f32 %v275_v17, %v261_v32  ;;  %v263_v47 = vld [vmem:[%s558_s8 + $0x38] sm:$0xff] }
  0x27   : > { %v296_v38 = vadd.f32 %v288_v27, %v276_v26  ;;  %v297_v39 = vadd.f32 %v289_v29, %v277_v28  ;;  %v298_v43 = vadd.f32 %v290_v34, %v278_v33  ;;  %v282_v51 = vmul.f32 %v275_v17, %v262_v37 }
  0x28   : > { %v299_v44 = vadd.f32 %v291_v36, %v279_v35  ;;  %v300_v50 = vadd.f32 %v292_v41, %v280_v40  ;;  %v301_v54 = vadd.f32 %v293_v46, %v281_v45  ;;  %v283_v60 = vmul.f32 %v275_v17, %v263_v47 }
  0x29   : > { %v308_v48 = vadd.f32 %v307_v23, %v296_v38  ;;  %v309_v49 = vadd.f32 %v307_v23, %v297_v39  ;;  %v310_v52 = vadd.f32 %v307_v23, %v298_v43  ;;  %v302_v0 = vadd.f32 %v294_v55, %v282_v51 }
  0x2a   : > { %v311_v53 = vadd.f32 %v307_v23, %v299_v44  ;;  %v312_v59 = vadd.f32 %v307_v23, %v300_v50  ;;  %v313_v63 = vadd.f32 %v307_v23, %v301_v54  ;;  %v303_v5 = vadd.f32 %v295_v2, %v283_v60 }
  0x2b   : > { %v316_v57 = vmax.f32 %v308_v48, 0.0  ;;  %v317_v58 = vmax.f32 %v309_v49, 0.0  ;;  %v318_v61 = vmax.f32 %v310_v52, 0.0  ;;  %v314_v4 = vadd.f32 %v307_v23, %v302_v0 }
  0x2c   : > { %v319_v62 = vmax.f32 %v311_v53, 0.0  ;;  %v320_v1 = vmax.f32 %v312_v59, 0.0  ;;  %v321_v3 = vmax.f32 %v313_v63, 0.0  ;;  %v315_v7 = vadd.f32 %v307_v23, %v303_v5 }
  0x2d   : > { %324 = vst [vmem:[%s254_s11] sm:$0xff] %v316_v57  ;;  %325 = vst [vmem:[%s254_s11 + $0x8] sm:$0xff] %v317_v58  ;;  %v322_v6 = vmax.f32 %v314_v4, 0.0 }
  0x2e   : > { %326 = vst [vmem:[%s254_s11 + $0x10] sm:$0xff] %v318_v61  ;;  %327 = vst [vmem:[%s254_s11 + $0x18] sm:$0xff] %v319_v62  ;;  %v323_v8 = vmax.f32 %v315_v7, 0.0 }
  0x2f   : > { %328 = vst [vmem:[%s254_s11 + $0x20] sm:$0xff] %v320_v1  ;;  %329 = vst [vmem:[%s254_s11 + $0x28] sm:$0xff] %v321_v3 }
  0x30   : > { %330 = vst [vmem:[%s254_s11 + $0x30] sm:$0xff] %v322_v6  ;;  %331 = vst [vmem:[%s254_s11 + $0x38] sm:$0xff] %v323_v8 }
  0x31 PF: > { %p10_p9 = scmp.ge.s32.totalorder %s518_s16, 4   ;;  %s592_s12 = smov %s475_s13 }
  0x32   : > { %s593_s13 = smov %s527_s19  ;;  %s594_s14 = smov %s518_s16 }
  0x33   :  { %12 = sbr.rel (!%p10_p9) target bundleno = 2 (0x2), region = 108 }

// kernel: residual_block_forward.6
= control target key start
LH: loop header
LB: loop body
LE: loop exit
PB: predicated region body
PF: predicated region fallthrough
CT: control target
= control target key end

     0   :  { %s2553_s12 = smov 0   ;;  %s2912_s0 = inlined_call_operand.vmem [shape: bf16[2,10,10,128], index: 0, kind: input, shape index: {}]   ;;  %s2913_s1 = inlined_call_operand.vmem [shape: bf16[3,384,128], index: 1, kind: input, shape index: {}]   ;;  %s2914_s2 = inlined_call_operand.vmem [shape: f32[2,8,8,128], index: 2, kind: output, shape index: {0}]   ;;  %s2915_s3 = inlined_call_operand.vmem [shape: f32[2,2,128], index: 3, kind: output, shape index: {1}]  }
   0x1 LB: > { %s1820_s13 = sadd.s32 4294967295, %s2531_s12   ;;  %p1824_p0 = scmp.ge.s32.totalorder %s2531_s12, 1  ;;  %s2531_s12 = sphi %s2553_s12, %s14_s12  }
   0x2   : > { %p140_p1 = scmp.lt.s32.totalorder %s2531_s12, 3 }
   0x4   : > { %p141_p2 = pnand %p1824_p0, %p140_p1 }
   0x5   : > { %v2417_v0 = vld [vmem:[%s2913_s1 + $0x40] sm:$0xff] (!%p141_p2)   ;;  %v2420_v3 = vld [vmem:[%s2913_s1 + $0x48] sm:$0xff] (!%p141_p2)   ;;  %v2423_v6 = vld [vmem:[%s2913_s1 + $0x50] sm:$0xff] (!%p141_p2)   ;;  %p168_p3 = scmp.lt.s32.totalorder (!%p141_p2), %s1820_s13, 1  ;;  %vm1731_vm0 = vcmask (!%p141_p2), 1040384  }
   0x6   : > { %144 = sbr.rel (%p141_p2) target bundleno = 366 (0x16e), region = 28  ;;  %v2418_v1 = vld [vmem:[%s2913_s1 + $0x80] sm:$0xff] (!%p141_p2)   ;;  %2092 = vmatprep.subr.bf16.mxu0 (!%p141_p2), %v2417_v0  ;;  %v2421_v4 = vld [vmem:[%s2913_s1 + $0x88] sm:$0xff] (!%p141_p2)   ;;  %v2424_v7 = vld [vmem:[%s2913_s1 + $0x90] sm:$0xff] (!%p141_p2)  }
   0x7   : > { %v2419_v2 = vld [vmem:[%s2913_s1] sm:$0xff] (!%p141_p2)   ;;  %2248 = vmatprep.subr.bf16.mxu1 (!%p141_p2), %v2418_v1  ;;  %v2422_v5 = vld [vmem:[%s2913_s1 + $0x8] sm:$0xff] (!%p141_p2)   ;;  %v2425_v8 = vld [vmem:[%s2913_s1 + $0x10] sm:$0xff] (!%p141_p2)  }
   0x8   : > { %2093 = vmatpush3.bf16.msra.mxu0 (!%p141_p2), %v2419_v2  ;;  %2249 = vmatpush3.bf16.msra.mxu1 (!%p141_p2), %v2418_v1  ;;  %v2426_v9 = vld [vmem:[%s2913_s1 + $0x58] sm:$0xff] (!%p141_p2)   ;;  %v2429_v12 = vld [vmem:[%s2913_s1 + $0x60] sm:$0xff] (!%p141_p2)   ;;  %v2432_v15 = vld [vmem:[%s2913_s1 + $0x68] sm:$0xff] (!%p141_p2)  }
   0x9   : > { %2094 = vmatprep.subr.bf16.mxu0 (!%p141_p2), %v2420_v3  ;;  %2250 = vmatprep.subr.bf16.mxu1 (!%p141_p2), %v2421_v4  ;;  %v2427_v10 = vld [vmem:[%s2913_s1 + $0x98] sm:$0xff] (!%p141_p2)   ;;  %v2430_v13 = vld [vmem:[%s2913_s1 + $0xa0] sm:$0xff] (!%p141_p2)   ;;  %v2433_v16 = vld [vmem:[%s2913_s1 + $0xa8] sm:$0xff] (!%p141_p2)  }
   0xa   : > { %v2428_v11 = vld [vmem:[%s2913_s1 + $0x18] sm:$0xff] (!%p141_p2)   ;;  %v2431_v14 = vld [vmem:[%s2913_s1 + $0x20] sm:$0xff] (!%p141_p2)   ;;  %v2434_v17 = vld [vmem:[%s2913_s1 + $0x28] sm:$0xff] (!%p141_p2)  }
   0xb   : > { %v2435_v18 = vld [vmem:[%s2913_s1 + $0x70] sm:$0xff] (!%p141_p2)   ;;  %v2438_v21 = vld [vmem:[%s2913_s1 + $0x78] sm:$0xff] (!%p141_p2)   ;;  %v2444_v39 = vld [vmem:[%s2913_s1 + $0x100] sm:$0xff] (!%p141_p2)  }
   0xc   : > { %2095 = vmatpush3.bf16.msra.mxu0 (!%p141_p2), %v2422_v5  ;;  %2251 = vmatpush3.bf16.msra.mxu1 (!%p141_p2), %v2421_v4  ;;  %v2436_v19 = vld [vmem:[%s2913_s1 + $0xb0] sm:$0xff] (!%p141_p2)   ;;  %v2439_v22 = vld [vmem:[%s2913_s1 + $0xb8] sm:$0xff] (!%p141_p2)   ;;  %v2445_v45 = vld [vmem:[%s2913_s1 + $0x140] sm:$0xff] (!%p141_p2)  }
   0xd   : > { %2096 = vmatprep.subr.bf16.mxu0 %v2423_v6  ;;  %2252 = vmatprep.subr.bf16.mxu1 %v2424_v7  ;;  %s2917_s13 = smov (!%p168_p3, %s1820_s13), 1  ;;  %v2437_v20 = vld [vmem:[%s2913_s1 + $0x30] sm:$0xff]   ;;  %v2440_v33 = vld [vmem:[%s2913_s1 + $0x38] sm:$0xff]   ;;  %v2448_v51 = vld [vmem:[%s2913_s1 + $0xc0] sm:$0xff]  }
   0xe   : > { %s2408_s23 = smul.u32 80, %s2917_s13  ;;  %v2450_v52 = vld [vmem:[%s2913_s1 + $0x148] sm:$0xff]   ;;  %v2453_v2 = vld [vmem:[%s2913_s1 + $0x110] sm:$0xff]   ;;  %s1828_s19 = sshll.u32 %s2917_s13, 1 }
   0xf   : > { %v2449_v60 = vld [vmem:[%s2913_s1 + $0x108] sm:$0xff]   ;;  %v2454_v3 = vld [vmem:[%s2913_s1 + $0x150] sm:$0xff]   ;;  %s181_s22 = scalar_lea.vmem %s2915_s3, %s1828_s19 }
  0x10   : > { %2097 = vmatpush3.bf16.msra.mxu0 %v2425_v8  ;;  %2253 = vmatpush3.bf16.msra.mxu1 %v2424_v7  ;;  %s2631_s5 = scalar_lea.vmem %s2912_s0, %s2408_s23  ;;  %v2451_v63 = vld [vmem:[%s2913_s1 + $0xc8] sm:$0xff]   ;;  %v2455_v5 = vld [vmem:[%s2913_s1 + $0xd0] sm:$0xff]  }
  0x11   : > { %2098 = vmatprep.subr.bf16.mxu0 %v2426_v9  ;;  %2254 = vmatprep.subr.bf16.mxu1 %v2427_v10  ;;  %v183_v23 = vld [vmem:[%s2631_s5] sm:$0xf]  ;;  %v184_v24 = vld [vmem:[%s2631_s5 + $0x4] sm:$0x1]  ;;  %v185_v25 = vld [vmem:[%s2631_s5 + $0x8] sm:$0xf] }
  0x12   : > { %v186_v26 = vld [vmem:[%s2631_s5 + $0xc] sm:$0x1]  ;;  %v1829_v27 = vcombine.low %v183_v23, %v184_v24  ;;  %v2647_v32 = vld [vmem:[%s2631_s5 + $0x10] sm:$0xf]  ;;  %v188_v37 = vld [vmem:[%s2631_s5 + $0x14] sm:$0x1]  ;;  %v1837_v53 = vcombine.low %v183_v23, %v185_v25 }
  0x13   : > { %v1830_v28 = vcombine.low %v185_v25, %v186_v26  ;;  %v189_v40 = vld [vmem:[%s2631_s5 + $0x18] sm:$0xf]  ;;  %v190_v41 = vld [vmem:[%s2631_s5 + $0x1c] sm:$0x1]  ;;  %v1831_v42 = vcombine.low %v2647_v32, %v188_v37  ;;  %v191_v6 = vld [vmem:[%s2631_s5 + $0x20] sm:$0xf] }
  0x14   : > { %2099 = vmatpush3.bf16.msra.mxu0 %v2428_v11  ;;  %2255 = vmatpush3.bf16.msra.mxu1 %v2427_v10  ;;  %v240_v29 = vshrl.u32 %v1829_v27, 16  ;;  %v242_v30 = vshll.u32 %v1829_v27, 16  ;;  %v295_v31 = vrot.slane %v1829_v27, 1  ;;  %v1832_v46 = vcombine.low %v189_v40, %v190_v41  ;;  %v192_v7 = vld [vmem:[%s2631_s5 + $0x24] sm:$0x1] }
  0x15   : > { %2100 = vmatprep.subr.bf16.mxu0 %v2429_v12  ;;  %2256 = vmatprep.subr.bf16.mxu1 %v2430_v13  ;;  %v247_v34 = vshrl.u32 %v1830_v28, 16  ;;  %v249_v35 = vshll.u32 %v1830_v28, 16  ;;  %v296_v36 = vrot.slane %v1830_v28, 1  ;;  %v297_v48 = vrot.slane %v1831_v42, 1  ;;  %v193_v8 = vld [vmem:[%s2631_s5 + $0x28] sm:$0xf] }
  0x16   : > { %v244_v38 = vrot.slane %v242_v30, 1  ;;  %v298_v50 = vrot.slane %v1832_v46, 1  ;;  %v254_v54 = vshrl.u32 %v1831_v42, 16  ;;  %v256_v55 = vshll.u32 %v1831_v42, 16  ;;  %v194_v10 = vld [vmem:[%s2631_s5 + $0x2c] sm:$0x1] }
  0x17   : > { %v251_v43 = vrot.slane %v249_v35, 1  ;;  %v1839_v44 = vcombine.low %v295_v31, %v296_v36  ;;  %v261_v58 = vshrl.u32 %v1832_v46, 16  ;;  %v263_v59 = vshll.u32 %v1832_v46, 16  ;;  %v2457_v12 = vld [vmem:[%s2913_s1 + $0x158] sm:$0xff]   ;;  %v2462_v24 = vld [vmem:[%s2913_s1 + $0x120] sm:$0xff]  }
  0x18   : > { %2101 = vmatpush3.bf16.msra.mxu0 %v2431_v14  ;;  %2257 = vmatpush3.bf16.msra.mxu1 %v2430_v13  ;;  %v245_v47 = vor.u32 %v244_v38, %v240_v29  ;;  %v1842_v57 = vcombine.low %v297_v48, %v298_v50  ;;  %v258_v61 = vrot.slane %v256_v55, 1  ;;  %v1840_v9 = vcombine.low %v2647_v32, %v189_v40  ;;  %v2456_v14 = vld [vmem:[%s2913_s1 + $0x118] sm:$0xff]   ;;  %v2704_v25 = vld [vmem:[%s2631_s5 + $0x30] sm:$0xf]  ;;  %v2464_v28 = vld [vmem:[%s2913_s1 + $0xe0] sm:$0xff]  }
  0x19   : > { %2102 = vmatprep.subr.bf16.mxu0 %v2432_v15  ;;  %2258 = vmatprep.subr.bf16.mxu1 %v2433_v16  ;;  %v252_v49 = vor.u32 %v251_v43, %v247_v34  ;;  %v265_v62 = vrot.slane %v263_v59, 1  ;;  %v1833_v11 = vcombine.low %v191_v6, %v192_v7  ;;  %v1834_v13 = vcombine.low %v193_v8, %v194_v10  ;;  %v196_v29 = vld [vmem:[%s2631_s5 + $0x34] sm:$0x1]  ;;  %v197_v30 = vld [vmem:[%s2631_s5 + $0x38] sm:$0xf]  ;;  %v2466_v38 = vld [vmem:[%s2913_s1 + $0x168] sm:$0xff]  }
  0x1a   : > { %2264 = vmatprep.mubr.bf16.mxu1 %v1839_v44  ;;  %v259_v0 = vor.u32 %v258_v61, %v254_v54  ;;  %v198_v31 = vld [vmem:[%s2631_s5 + $0x3c] sm:$0x1]  ;;  %v1843_v32 = vcombine.low %v191_v6, %v193_v8  ;;  %v1835_v34 = vcombine.low %v2704_v25, %v196_v29  ;;  %v2467_v43 = vld [vmem:[%s2913_s1 + $0xe8] sm:$0xff]   ;;  %v2473_v54 = vld [vmem:[%s2913_s1 + $0xf0] sm:$0xff]   ;;  %v1846_v59 = vcombine.low %v2704_v25, %v197_v30 }
  0x1b   : > { %v1838_v56 = vcombine.low %v245_v47, %v252_v49  ;;  %v266_v1 = vor.u32 %v265_v62, %v261_v58  ;;  %v268_v15 = vshrl.u32 %v1833_v11, 16  ;;  %v299_v26 = vrot.slane %v1833_v11, 1  ;;  %v2472_v49 = vld [vmem:[%s2913_s1 + $0x170] sm:$0xff]   ;;  %v1873_v55 = vld [vmem:[%s2631_s5 + $0x8] sm:$0xf]  ;;  %v2475_v62 = vld [vmem:[%s2913_s1 + $0x178] sm:$0xff]  }
  0x1c   : > { %2103 = vmatpush3.bf16.msra.mxu0 %v2434_v17  ;;  %2259 = vmatpush3.bf16.msra.mxu1 %v2433_v16  ;;  %v270_v16 = vshll.u32 %v1833_v11, 16  ;;  %v275_v17 = vshrl.u32 %v1834_v13, 16  ;;  %v1836_v35 = vcombine.low %v197_v30, %v198_v31  ;;  %v300_v36 = vrot.slane %v1834_v13, 1  ;;  %v1878_v8 = vld [vmem:[%s2631_s5 + $0x1c] sm:$0x1] }
  0x1d   : > { %2104 = vmatprep.subr.bf16.mxu0 %v2435_v18  ;;  %2260 = vmatprep.subr.bf16.mxu1 %v2436_v19  ;;  %v1841_v4 = vcombine.low %v259_v0, %v266_v1  ;;  %v277_v18 = vshll.u32 %v1834_v13, 16  ;;  %v284_v40 = vshll.u32 %v1835_v34, 16  ;;  %v2474_v0 = vld [vmem:[%s2913_s1 + $0x138] sm:$0xff]   ;;  %v2750_v11 = vld [vmem:[%s2631_s5 + $0x20] sm:$0xf] }
  0x1e   : > { %567 = vmatprep.mubr.bf16.mxu0 %v1838_v56  ;;  %v289_v41 = vshrl.u32 %v1836_v35, 16  ;;  %v291_v42 = vshll.u32 %v1836_v35, 16  ;;  %v1845_v44 = vcombine.low %v299_v26, %v300_v36  ;;  %v302_v46 = vrot.slane %v1836_v35, 1  ;;  %v1874_v56 = vld [vmem:[%s2631_s5 + $0xc] sm:$0x1] }
  0x1f   : > { %v286_v47 = vrot.slane %v284_v40, 1  ;;  %v1889_v61 = vcombine.low %v1873_v55, %v1874_v56  ;;  %v2487_v35 = vld [vmem:[%s2913_s1 + $0x188] sm:$0xff]  }
  0x20   : > { %2105 = vmatpush3.bf16.msra.mxu0 %v2437_v20  ;;  %2261 = vmatpush3.bf16.msra.mxu1 %v2436_v19  ;;  %v2458_v19 = vld [vmem:[%s2913_s1 + $0xd8] sm:$0xff]   ;;  %v272_v20 = vrot.slane %v270_v16, 1  ;;  %v293_v48 = vrot.slane %v291_v42, 1  ;;  %v2481_v16 = vld [vmem:[%s2913_s1 + $0x200] sm:$0xff]   ;;  %v1881_v42 = vld [vmem:[%s2631_s5 + $0x28] sm:$0xf] }
  0x21   : > { %2106 = vmatprep.subr.bf16.mxu0 %v2438_v21  ;;  %2262 = vmatprep.subr.bf16.mxu1 %v2439_v22  ;;  %v279_v21 = vrot.slane %v277_v18, 1  ;;  %v731_v1 = vshrl.u32 %v1889_v61, 16 }
  0x22   : > { %v273_v23 = vor.u32 %v272_v20, %v268_v15 }
  0x23   : > { %v280_v27 = vor.u32 %v279_v21, %v275_v17 }
  0x24   : > { %2107 = vmatpush3.bf16.msra.mxu0 %v2440_v33  ;;  %2263 = vmatpush3.bf16.msra.mxu1 %v2439_v22  ;;  %v2463_v22 = vld [vmem:[%s2913_s1 + $0x160] sm:$0xff]   ;;  %v2465_v33 = vld [vmem:[%s2913_s1 + $0x128] sm:$0xff]  }
  0x25   : > { %2144 = vmatprep.subr.bf16.mxu0 %v2444_v39  ;;  %2272 = vmatprep.subr.bf16.mxu1 %v2445_v45  ;;  %v1844_v37 = vcombine.low %v273_v23, %v280_v27  ;;  %v282_v39 = vshrl.u32 %v1835_v34, 16  ;;  %v2484_v23 = vld [vmem:[%s2913_s1 + $0x180] sm:$0xff]  }
  0x27   : > { %2265 = vmatmul.mubr.bf16.vlgmr.msra.gmra.mrb[0].mxu1 %v1842_v57  ;;  %568 = vmatmul.mubr.bf16.vlgmr.msra.gmra.mrb[0].mxu0 %v1837_v53  ;;  %v2471_v53 = vld [vmem:[%s2913_s1 + $0x130] sm:$0xff]  }
  0x28   : > { %2273 = vmatpush3.bf16.msra.mxu1 %v2445_v45  ;;  %2145 = vmatpush3.bf16.msra.mxu0 %v2448_v51  ;;  %v301_v45 = vrot.slane %v1835_v34, 1  ;;  %v287_v51 = vor.u32 %v286_v47, %v282_v39  ;;  %v1875_v57 = vld [vmem:[%s2631_s5 + $0x10] sm:$0xf] }
  0x29   : > { %2274 = vmatprep.subr.bf16.mxu1 %v2450_v52  ;;  %2146 = vmatprep.subr.bf16.mxu0 %v2449_v60  ;;  %v1876_v60 = vld [vmem:[%s2631_s5 + $0x14] sm:$0x1]  ;;  %v1945_v25 = vcombine.low %v1873_v55, %v1875_v57  ;;  %v2494_v55 = vld [vmem:[%s2913_s1 + $0x198] sm:$0xff]  }
  0x2a   : > { %575 = vmatprep.mubr.bf16.mxu0 %v1841_v4  ;;  %v1848_v50 = vcombine.low %v301_v45, %v302_v46  ;;  %2268 = vmatprep.mubr.bf16.mxu1 %v1845_v44  ;;  %v2743_v4 = vld [vmem:[%s2631_s5 + $0x18] sm:$0xf]  ;;  %v2490_v39 = vld [vmem:[%s2913_s1 + $0x210] sm:$0xff]  }
  0x2b   : > { %v1891_v13 = vcombine.low %v2743_v4, %v1878_v8  ;;  %v1883_v44 = vld [vmem:[%s2631_s5 + $0x30] sm:$0xf]  ;;  %v1948_v45 = vcombine.low %v2743_v4, %v2750_v11  ;;  %v1884_v46 = vld [vmem:[%s2631_s5 + $0x34] sm:$0x1] }
  0x2c   : > { %2275 = vmatpush3.bf16.msra.mxu1 %v2450_v52  ;;  %2147 = vmatpush3.bf16.msra.mxu0 %v2451_v63  ;;  %v294_v52 = vor.u32 %v293_v48, %v289_v41  ;;  %v1890_v63 = vcombine.low %v1875_v57, %v1876_v60  ;;  %v2491_v41 = vld [vmem:[%s2913_s1 + $0x190] sm:$0xff]   ;;  %v2493_v48 = vld [vmem:[%s2913_s1 + $0x218] sm:$0xff]   ;;  %v2498_v60 = vld [vmem:[%s2913_s1 + $0x1e0] sm:$0xff]   ;;  %v1951_v4 = vcombine.low %v1881_v42, %v1883_v44 }
  0x2d   : > { %2148 = vmatprep.subr.bf16.mxu0 %v2453_v2  ;;  %2276 = vmatprep.subr.bf16.mxu1 %v2454_v3  ;;  %v733_v2 = vshll.u32 %v1889_v61, 16  ;;  %v788_v20 = vrot.slane %v1891_v13, 1  ;;  %v745_v26 = vshrl.u32 %v1891_v13, 16  ;;  %v747_v27 = vshll.u32 %v1891_v13, 16 }
  0x2e   : > { %v1847_v58 = vcombine.low %v287_v51, %v294_v52  ;;  %v740_v6 = vshll.u32 %v1890_v63, 16  ;;  %v787_v7 = vrot.slane %v1890_v63, 1 }
  0x2f   : > { %576 = vmatmul.mubr.bf16.gmra.mrb[4].mxu0 %v1840_v9  ;;  %2269 = vmatmul.mubr.bf16.gmra.mrb[4].mxu1 %v1848_v50  ;;  %v2476_v9 = vld [vmem:[%s2913_s1 + $0xf8] sm:$0xff]   ;;  %v735_v10 = vrot.slane %v733_v2, 1  ;;  %v2811_v2 = vld [vmem:[%s2631_s5 + $0x40] sm:$0xf] }
  0x30   : > { %2277 = vmatpush3.bf16.msra.mxu1 %v2454_v3  ;;  %2149 = vmatpush3.bf16.msra.mxu0 %v2455_v5  ;;  %v786_v3 = vrot.slane %v1889_v61, 1  ;;  %v738_v5 = vshrl.u32 %v1890_v63, 16  ;;  %v2492_v50 = vld [vmem:[%s2913_s1 + $0x1d8] sm:$0xff]  }
  0x31   : > { %2278 = vmatprep.subr.bf16.mxu1 %v2457_v12  ;;  %2150 = vmatprep.subr.bf16.mxu0 %v2456_v14  ;;  %v742_v14 = vrot.slane %v740_v6, 1  ;;  %v736_v18 = vor.u32 %v735_v10, %v731_v1  ;;  %v2804_v61 = vld [vmem:[%s2631_s5 + $0x38] sm:$0xf]  ;;  %v1886_v1 = vld [vmem:[%s2631_s5 + $0x3c] sm:$0x1]  ;;  %v2502_v10 = vld [vmem:[%s2913_s1 + $0x228] sm:$0xff]  }
  0x32   : > { %583 = vmatprep.mubr.bf16.mxu0 %v1844_v37  ;;  %v1947_v15 = vcombine.low %v786_v3, %v787_v7  ;;  %v1888_v3 = vld [vmem:[%s2631_s5 + $0x44] sm:$0x1]  ;;  %v1895_v6 = vcombine.low %v2804_v61, %v1886_v1 }
  0x33   : > { %v743_v21 = vor.u32 %v742_v14, %v738_v5  ;;  %v2501_v5 = vld [vmem:[%s2913_s1 + $0x1e8] sm:$0xff]   ;;  %v1896_v7 = vcombine.low %v2811_v2, %v1888_v3 }
  0x34   : > { %2279 = vmatpush3.bf16.msra.mxu1 %v2457_v12  ;;  %2151 = vmatpush3.bf16.msra.mxu0 %v2458_v19  ;;  %v1880_v12 = vld [vmem:[%s2631_s5 + $0x24] sm:$0x1] }
  0x35   : > { %2280 = vmatprep.subr.bf16.mxu1 %v2463_v22  ;;  %2152 = vmatprep.subr.bf16.mxu0 %v2462_v24  ;;  %v1892_v17 = vcombine.low %v2750_v11, %v1880_v12  ;;  %v2480_v19 = vld [vmem:[%s2913_s1 + $0x1c0] sm:$0xff]   ;;  %v2486_v24 = vld [vmem:[%s2913_s1 + $0x208] sm:$0xff]   ;;  %v773_v11 = vshrl.u32 %v1895_v6, 16  ;;  %v775_v12 = vshll.u32 %v1895_v6, 16  ;;  %v780_v13 = vshrl.u32 %v1896_v7, 16 }
  0x36   : > { %2288 = vmatprep.mubr.bf16.mxu1 %v1947_v15  ;;  %v782_v14 = vshll.u32 %v1896_v7, 16  ;;  %v2503_v15 = vld [vmem:[%s2913_s1 + $0x1a8] sm:$0xff]  }
  0x37   : > { %584 = vmatmul.mubr.bf16.gmra.mrb[8].mxu0 %v1843_v32  ;;  %v752_v30 = vshrl.u32 %v1892_v17, 16  ;;  %v754_v31 = vshll.u32 %v1892_v17, 16  ;;  %v2485_v32 = vld [vmem:[%s2913_s1 + $0x1c8] sm:$0xff]  }
  0x38   : > { %2281 = vmatpush3.bf16.msra.mxu1 %v2463_v22  ;;  %2153 = vmatpush3.bf16.msra.mxu0 %v2464_v28  ;;  %v789_v22 = vrot.slane %v1892_v17, 1  ;;  %v1946_v28 = vcombine.low %v736_v18, %v743_v21  ;;  %v792_v17 = vrot.slane %v1895_v6, 1  ;;  %v793_v18 = vrot.slane %v1896_v7, 1 }
  0x39   : > { %2282 = vmatprep.subr.bf16.mxu1 %v2466_v38  ;;  %2154 = vmatprep.subr.bf16.mxu0 %v2465_v33  ;;  %v749_v33 = vrot.slane %v747_v27, 1  ;;  %v756_v34 = vrot.slane %v754_v31, 1  ;;  %v2511_v27 = vld [vmem:[%s2913_s1 + $0x238] sm:$0xff]  }
  0x3a   : > { %591 = vmatprep.mubr.bf16.mxu0 %v1847_v58  ;;  %v1950_v29 = vcombine.low %v788_v20, %v789_v22  ;;  %v2499_v58 = vld [vmem:[%s2913_s1 + $0x220] sm:$0xff]   ;;  %v784_v20 = vrot.slane %v782_v14, 1  ;;  %v1956_v21 = vcombine.low %v792_v17, %v793_v18  ;;  %v2508_v22 = vld [vmem:[%s2913_s1 + $0x230] sm:$0xff]  }
  0x3b   : > { %v750_v36 = vor.u32 %v749_v33, %v745_v26  ;;  %v757_v37 = vor.u32 %v756_v34, %v752_v30  ;;  %v2509_v26 = vld [vmem:[%s2913_s1 + $0x1b0] sm:$0xff]   ;;  %v2842_v30 = vld [vmem:[%s2631_s5 + $0x18] sm:$0xf]  ;;  %v1984_v33 = vld [vmem:[%s2631_s5 + $0x1c] sm:$0x1] }
  0x3c   : > { %2283 = vmatpush3.bf16.msra.mxu1 %v2466_v38  ;;  %2155 = vmatpush3.bf16.msra.mxu0 %v2467_v43  ;;  %v2489_v38 = vld [vmem:[%s2913_s1 + $0x1d0] sm:$0xff]   ;;  %v1882_v43 = vld [vmem:[%s2631_s5 + $0x2c] sm:$0x1] }
  0x3d   : > { %2284 = vmatprep.subr.bf16.mxu1 %v2472_v49  ;;  %2156 = vmatprep.subr.bf16.mxu0 %v2471_v53  ;;  %v1949_v40 = vcombine.low %v750_v36, %v757_v37  ;;  %v1893_v47 = vcombine.low %v1881_v42, %v1882_v43  ;;  %v1986_v36 = vld [vmem:[%s2631_s5 + $0x24] sm:$0x1]  ;;  %v1998_v37 = vcombine.low %v2842_v30, %v1984_v33  ;;  %v2510_v42 = vld [vmem:[%s2913_s1 + $0x1f8] sm:$0xff]  }
  0x3f   : > { %592 = vmatmul.mubr.bf16.gmra.mrb[12].mxu0 %v1846_v59  ;;  %v759_v51 = vshrl.u32 %v1893_v47, 16  ;;  %v761_v52 = vshll.u32 %v1893_v47, 16 }
  0x40   : > { %2285 = vmatpush3.bf16.msra.mxu1 %v2472_v49  ;;  %2157 = vmatpush3.bf16.msra.mxu0 %v2473_v54  ;;  %v1894_v49 = vcombine.low %v1883_v44, %v1884_v46 }
  0x41   : > { %2286 = vmatprep.subr.bf16.mxu1 %v2475_v62  ;;  %2158 = vmatprep.subr.bf16.mxu0 %v2474_v0  ;;  %v763_v56 = vrot.slane %v761_v52, 1  ;;  %v2500_v0 = vld [vmem:[%s2913_s1 + $0x1a0] sm:$0xff]   ;;  %v2867_v52 = vld [vmem:[%s2631_s5 + $0x38] sm:$0xf] }
  0x42   : > { %1059 = vmatprep.mubr.bf16.mxu0 %v1946_v28  ;;  %v766_v53 = vshrl.u32 %v1894_v49, 16  ;;  %v768_v54 = vshll.u32 %v1894_v49, 16  ;;  %v791_v8 = vrot.slane %v1894_v49, 1  ;;  %v2838_v28 = vld [vmem:[%s2631_s5 + $0x10] sm:$0xf]  ;;  %v1248_v49 = vshll.u32 %v1998_v37, 16 }
  0x43   : > { %v764_v59 = vor.u32 %v763_v56, %v759_v51  ;;  %v2053_v1 = vcombine.low %v2838_v28, %v2842_v30 }
  0x44   : > { %2287 = vmatpush3.bf16.msra.mxu1 %v2475_v62  ;;  %2159 = vmatpush3.bf16.msra.mxu0 %v2476_v9  ;;  %v770_v57 = vrot.slane %v768_v54, 1  ;;  %v790_v62 = vrot.slane %v1893_v47, 1  ;;  %v1990_v47 = vld [vmem:[%s2631_s5 + $0x34] sm:$0x1] }
  0x45   : > { %2296 = vmatprep.subr.bf16.mxu1 %v2481_v16  ;;  %2196 = vmatprep.subr.bf16.mxu0 %v2480_v19  ;;  %v777_v19 = vrot.slane %v775_v12, 1 }
  0x46   : > { %v771_v63 = vor.u32 %v770_v57, %v766_v53  ;;  %v1992_v57 = vld [vmem:[%s2631_s5 + $0x3c] sm:$0x1] }
  0x47   : > { %2289 = vmatmul.mubr.bf16.vlgmr.msra.gmra.mrb[0].mxu1 %v1950_v29  ;;  %1060 = vmatmul.mubr.bf16.vlgmr.msra.gmra.mrb[16].mxu0 %v1945_v25  ;;  %v2507_v25 = vld [vmem:[%s2913_s1 + $0x1f0] sm:$0xff]  }
  0x48   : > { %2297 = vmatpush3.bf16.msra.mxu1 %v2481_v16  ;;  %2197 = vmatpush3.bf16.msra.mxu0 %v2484_v23  ;;  %v1952_v9 = vcombine.low %v764_v59, %v771_v63  ;;  %v1953_v16 = vcombine.low %v790_v62, %v791_v8  ;;  %v778_v23 = vor.u32 %v777_v19, %v773_v11  ;;  %v1982_v29 = vld [vmem:[%s2631_s5 + $0x14] sm:$0x1]  ;;  %v1250_v59 = vrot.slane %v1248_v49, 1  ;;  %v1993_v63 = vld [vmem:[%s2631_s5 + $0x40] sm:$0xf] }
  0x49   : > { %2298 = vmatprep.subr.bf16.mxu1 %v2486_v24  ;;  %2198 = vmatprep.subr.bf16.mxu0 %v2485_v32  ;;  %v1954_v32 = vcombine.low %v2804_v61, %v2811_v2  ;;  %v1997_v34 = vcombine.low %v2838_v28, %v1982_v29 }
  0x4a   : > { %1067 = vmatprep.mubr.bf16.mxu0 %v1949_v40  ;;  %2292 = vmatprep.mubr.bf16.mxu1 %v1953_v16 }
  0x4b   : > { %v1239_v43 = vshrl.u32 %v1997_v34, 16  ;;  %v1241_v44 = vshll.u32 %v1997_v34, 16 }
  0x4c   : > { %2299 = vmatpush3.bf16.msra.mxu1 %v2486_v24  ;;  %2199 = vmatpush3.bf16.msra.mxu0 %v2487_v35  ;;  %v785_v24 = vor.u32 %v784_v20, %v780_v13  ;;  %v2849_v35 = vld [vmem:[%s2631_s5 + $0x20] sm:$0xf] }
  0x4d   : > { %2200 = vmatprep.subr.bf16.mxu0 %v2489_v38  ;;  %2300 = vmatprep.subr.bf16.mxu1 %v2490_v39  ;;  %v2854_v38 = vld [vmem:[%s2631_s5 + $0x28] sm:$0xf]  ;;  %v1999_v40 = vcombine.low %v2849_v35, %v1986_v36  ;;  %v1243_v53 = vrot.slane %v1241_v44, 1 }
  0x4e   : > { %v1955_v31 = vcombine.low %v778_v23, %v785_v24  ;;  %v2056_v33 = vcombine.low %v2849_v35, %v2854_v38 }
  0x4f   : > { %1068 = vmatmul.mubr.bf16.gmra.mrb[20].mxu0 %v1948_v45  ;;  %2293 = vmatmul.mubr.bf16.gmra.mrb[4].mxu1 %v1956_v21  ;;  %v1294_v45 = vrot.slane %v1997_v34, 1  ;;  %v1296_v51 = vrot.slane %v1999_v40, 1  ;;  %v1255_v56 = vshll.u32 %v1999_v40, 16 }
  0x50   : > { %2301 = vmatpush3.bf16.msra.mxu1 %v2490_v39  ;;  %2201 = vmatpush3.bf16.msra.mxu0 %v2491_v41  ;;  %v1988_v39 = vld [vmem:[%s2631_s5 + $0x2c] sm:$0x1]  ;;  %v2859_v41 = vld [vmem:[%s2631_s5 + $0x30] sm:$0xf] }
  0x51   : > { %2302 = vmatprep.subr.bf16.mxu1 %v2493_v48  ;;  %2202 = vmatprep.subr.bf16.mxu0 %v2492_v50  ;;  %v2000_v46 = vcombine.low %v2854_v38, %v1988_v39  ;;  %v1295_v50 = vrot.slane %v1998_v37, 1  ;;  %v1257_v2 = vrot.slane %v1255_v56, 1  ;;  %v2001_v3 = vcombine.low %v2859_v41, %v1990_v47 }
  0x52   : > { %1075 = vmatprep.mubr.bf16.mxu0 %v1952_v9  ;;  %v2002_v9 = vcombine.low %v2867_v52, %v1992_v57  ;;  %v2059_v44 = vcombine.low %v2859_v41, %v2867_v52 }
  0x53   : > { %v1297_v54 = vrot.slane %v2000_v46, 1  ;;  %v1260_v61 = vshrl.u32 %v2000_v46, 16  ;;  %v1262_v62 = vshll.u32 %v2000_v46, 16  ;;  %v1298_v12 = vrot.slane %v2001_v3, 1 }
  0x54   : > { %2303 = vmatpush3.bf16.msra.mxu1 %v2493_v48  ;;  %2203 = vmatpush3.bf16.msra.mxu0 %v2494_v55  ;;  %v1246_v48 = vshrl.u32 %v1998_v37, 16  ;;  %v1253_v55 = vshrl.u32 %v1999_v40, 16  ;;  %v1299_v17 = vrot.slane %v2002_v9, 1  ;;  %v1267_v20 = vshrl.u32 %v2001_v3, 16 }
  0x55   : > { %2304 = vmatprep.subr.bf16.mxu1 %v2499_v58  ;;  %2204 = vmatprep.subr.bf16.mxu0 %v2498_v60  ;;  %v2055_v60 = vcombine.low %v1294_v45, %v1295_v50  ;;  %v2058_v7 = vcombine.low %v1296_v51, %v1297_v54  ;;  %v1264_v8 = vrot.slane %v1262_v62, 1  ;;  %v1269_v21 = vshll.u32 %v2001_v3, 16 }
  0x56   : > { %v1251_v6 = vor.u32 %v1250_v59, %v1246_v48  ;;  %v1258_v11 = vor.u32 %v1257_v2, %v1253_v55  ;;  %v2061_v23 = vcombine.low %v1298_v12, %v1299_v17  ;;  %v1274_v24 = vshrl.u32 %v2002_v9, 16 }
  0x57   : > { %1076 = vmatmul.mubr.bf16.gmra.mrb[24].mxu0 %v1951_v4  ;;  %v1994_v4 = vld [vmem:[%s2631_s5 + $0x44] sm:$0x1]  ;;  %2312 = vmatprep.mubr.bf16.mxu1 %v2055_v60  ;;  %v1265_v16 = vor.u32 %v1264_v8, %v1260_v61 }
  0x58   : > { %2305 = vmatpush3.bf16.msra.mxu1 %v2499_v58  ;;  %2205 = vmatpush3.bf16.msra.mxu0 %v2500_v0  ;;  %v2512_v58 = vld [vmem:[%s2913_s1 + $0x1b8] sm:$0xff]   ;;  %v1244_v0 = vor.u32 %v1243_v53, %v1239_v43  ;;  %v2003_v13 = vcombine.low %v1993_v63, %v1994_v4 }
  0x59   : > { %2306 = vmatprep.subr.bf16.mxu1 %v2502_v10  ;;  %2206 = vmatprep.subr.bf16.mxu0 %v2501_v5  ;;  %v1995_v5 = vld [vmem:[%s2631_s5 + $0x48] sm:$0xf] }
  0x5a   : > { %1083 = vmatprep.mubr.bf16.mxu0 %v1955_v31  ;;  %v1300_v18 = vrot.slane %v2003_v13, 1  ;;  %v1283_v28 = vshll.u32 %v2003_v13, 16  ;;  %v1281_v34 = vshrl.u32 %v2003_v13, 16  ;;  %v2062_v46 = vcombine.low %v1993_v63, %v1995_v5 }
  0x5c   : > { %2307 = vmatpush3.bf16.msra.mxu1 %v2502_v10  ;;  %2207 = vmatpush3.bf16.msra.mxu0 %v2503_v15  ;;  %v1996_v10 = vld [vmem:[%s2631_s5 + $0x4c] sm:$0x1]  ;;  %v2054_v15 = vcombine.low %v1244_v0, %v1251_v6  ;;  %v1285_v37 = vrot.slane %v1283_v28, 1  ;;  %s2091_s5 = sshll.u32 %s2917_s13, 6 }
  0x5d   : > { %2308 = vmatprep.subr.bf16.mxu1 %v2508_v22  ;;  %2208 = vmatprep.subr.bf16.mxu0 %v2507_v25  ;;  %v2004_v14 = vcombine.low %v1995_v5, %v1996_v10  ;;  %v1276_v25 = vshll.u32 %v2002_v9, 16  ;;  %s2893_s18 = scalar_lea.vmem %s2914_s2, %s2091_s5 }
  0x5f   : > { %1084 = vmatmul.mubr.bf16.gmra.mrb[28].mxu0 %v1954_v32  ;;  %v1301_v19 = vrot.slane %v2004_v14, 1  ;;  %v1290_v29 = vshll.u32 %v2004_v14, 16  ;;  %v1288_v39 = vshrl.u32 %v2004_v14, 16 }
  0x60   : > { %2309 = vmatpush3.bf16.msra.mxu1 %v2508_v22  ;;  %2209 = vmatpush3.bf16.msra.mxu0 %v2509_v26  ;;  %v2057_v22 = vcombine.low %v1258_v11, %v1265_v16  ;;  %v1271_v26 = vrot.slane %v1269_v21, 1 }
  0x61   : > { %2310 = vmatprep.subr.bf16.mxu1 %v2511_v27  ;;  %2210 = vmatprep.subr.bf16.mxu0 %v2510_v42  ;;  %v2064_v31 = vcombine.low %v1300_v18, %v1301_v19  ;;  %v1292_v40 = vrot.slane %v1290_v29, 1  ;;  %v1286_v42 = vor.u32 %v1285_v37, %v1281_v34 }
  0x62   : > { %1567 = vmatprep.mubr.bf16.mxu0 %v2054_v15  ;;  %v1272_v30 = vor.u32 %v1271_v26, %v1267_v20 }
  0x63   : > { %v1293_v43 = vor.u32 %v1292_v40, %v1288_v39 }
  0x64   : > { %2311 = vmatpush3.bf16.msra.mxu1 %v2511_v27  ;;  %2211 = vmatpush3.bf16.msra.mxu0 %v2512_v58  ;;  %v1278_v27 = vrot.slane %v1276_v25, 1 }
  0x65   : > { %v2063_v45 = vcombine.low %v1286_v42, %v1293_v43 }
  0x66   : > { %v1279_v32 = vor.u32 %v1278_v27, %v1274_v24 }
  0x67   : > { %2313 = vmatmul.mubr.bf16.vlgmr.msra.gmra.mrb[0].mxu1 %v2058_v7  ;;  %1568 = vmatmul.mubr.bf16.vlgmr.msra.gmra.mrb[32].mxu0 %v2053_v1 }
  0x68   : > { %1575 = vmatprep.mubr.bf16.mxu0 %v2057_v22  ;;  %2316 = vmatprep.mubr.bf16.mxu1 %v2061_v23  ;;  %v2060_v36 = vcombine.low %v1272_v30, %v1279_v32 }
  0x6f   : > { %2317 = vmatmul.mubr.bf16.gmra.mrb[4].mxu1 %v2064_v31  ;;  %1576 = vmatmul.mubr.bf16.gmra.mrb[36].mxu0 %v2056_v33 }
  0x70   : > { %1583 = vmatprep.mubr.bf16.mxu0 %v2060_v36 }
  0x77   : > { %1584 = vmatmul.mubr.bf16.gmra.mrb[40].mxu0 %v2059_v44 }
  0x78   : > { %1591 = vmatprep.mubr.bf16.mxu0 %v2063_v45 }
  0x7f   : > { %1592 = vmatmul.mubr.bf16.gmra.mrb[44].mxu0 %v2062_v46 }
  0xfa   : > { %v2108_v47 = vpop.f32.mrb[0].mxu0 }
  0xfb   : > { %v2109_v35 = vpop.f32.mrb[1].mxu0 }
  0xfc   : > { %v2110_v38 = vadd.f32 %v2109_v35, %v2108_v47  ;;  %v2111_v48 = vpop.f32.mrb[2].mxu0 }
  0xfd   : > { %v2112_v49 = vpop.f32.mrb[3].mxu0 }
  0xfe   : > { %v2113_v50 = vadd.f32 %v2112_v49, %v2111_v48 }
 0x102   : > { %v2114_v51 = vpop.f32.mrb[4].mxu0 }
 0x103   : > { %v2115_v53 = vpop.f32.mrb[5].mxu0 }
 0x104   : > { %v2116_v54 = vadd.f32 %v2115_v53, %v2114_v51  ;;  %v2117_v55 = vpop.f32.mrb[6].mxu0 }
 0x105   : > { %v2118_v56 = vpop.f32.mrb[7].mxu0 }
 0x106   : > { %v2119_v57 = vadd.f32 %v2118_v56, %v2117_v55 }
 0x10a   : > { %v2120_v58 = vpop.f32.mrb[8].mxu0 }
 0x10b   : > { %v2121_v59 = vpop.f32.mrb[9].mxu0 }
 0x10c   : > { %v2122_v41 = vadd.f32 %v2121_v59, %v2120_v58  ;;  %v2123_v52 = vpop.f32.mrb[10].mxu0 }
 0x10d   : > { %v2124_v60 = vpop.f32.mrb[11].mxu0 }
 0x10e   : > { %v2125_v61 = vadd.f32 %v2124_v60, %v2123_v52 }
 0x112   : > { %v2126_v62 = vpop.f32.mrb[12].mxu0 }
 0x113   : > { %v2127_v63 = vpop.f32.mrb[13].mxu0 }
 0x114   : > { %v2128_v0 = vadd.f32 %v2127_v63, %v2126_v62  ;;  %v2129_v1 = vpop.f32.mrb[14].mxu0 }
 0x115   : > { %v2130_v2 = vpop.f32.mrb[15].mxu0 }
 0x116   : > { %v2131_v3 = vadd.f32 %v2130_v2, %v2129_v1 }
 0x11a   : > { %v2160_v4 = vpop.f32.mrb[16].mxu0 }
 0x11b   : > { %v2161_v5 = vpop.f32.mrb[17].mxu0 }
 0x11c   : > { %v2162_v6 = vadd.f32 %v2161_v5, %v2160_v4  ;;  %v2163_v7 = vpop.f32.mrb[18].mxu0 }
 0x11d   : > { %v2164_v8 = vpop.f32.mrb[19].mxu0 }
 0x11e   : > { %v2331_v9 = vadd.f32 %v2162_v6, %v2110_v38  ;;  %v2165_v10 = vadd.f32 %v2164_v8, %v2163_v7 }
 0x120   : > { %v2349_v11 = vadd.f32 %v2165_v10, %v2113_v50 }
 0x122   : > { %v2166_v12 = vpop.f32.mrb[20].mxu0 }
 0x123   : > { %v2167_v13 = vpop.f32.mrb[21].mxu0 }
 0x124   : > { %v2168_v14 = vadd.f32 %v2167_v13, %v2166_v12  ;;  %v2169_v15 = vpop.f32.mrb[22].mxu0 }
 0x125   : > { %v2170_v16 = vpop.f32.mrb[23].mxu0 }
 0x126   : > { %v2322_v17 = vadd.f32 %v2168_v14, %v2116_v54  ;;  %v2171_v18 = vadd.f32 %v2170_v16, %v2169_v15 }
 0x128   : > { %v2340_v19 = vadd.f32 %v2171_v18, %v2119_v57 }
 0x12a   : > { %v2172_v20 = vpop.f32.mrb[24].mxu0 }
 0x12b   : > { %v2173_v21 = vpop.f32.mrb[25].mxu0 }
 0x12c   : > { %v2174_v22 = vadd.f32 %v2173_v21, %v2172_v20  ;;  %v2175_v23 = vpop.f32.mrb[26].mxu0 }
 0x12d   : > { %v2176_v24 = vpop.f32.mrb[27].mxu0 }
 0x12e   : > { %v2367_v25 = vadd.f32 %v2174_v22, %v2122_v41  ;;  %v2177_v26 = vadd.f32 %v2176_v24, %v2175_v23 }
 0x130   : > { %v2385_v27 = vadd.f32 %v2177_v26, %v2125_v61 }
 0x132   : > { %v2178_v28 = vpop.f32.mrb[28].mxu0 }
 0x133   : > { %v2179_v29 = vpop.f32.mrb[29].mxu0 }
 0x134   : > { %v2180_v30 = vadd.f32 %v2179_v29, %v2178_v28  ;;  %v2181_v31 = vpop.f32.mrb[30].mxu0 }
 0x135   : > { %v2182_v32 = vpop.f32.mrb[31].mxu0 }
 0x136   : > { %v2885_v33 = vadd.f32 %v2180_v30, %v2128_v0  ;;  %v2183_v34 = vadd.f32 %v2182_v32, %v2181_v31 }
 0x138   : > { %v2887_v36 = vadd.f32 %v2183_v34, %v2131_v3 }
 0x13a   : > { %v2314_v37 = vpop.f32.mrb[0].mxu1  ;;  %v2212_v39 = vpop.f32.mrb[32].mxu0 }
 0x13b   : > { %v1634_v40 = vpop.f32.mrb[1].mxu1  ;;  %v2213_v42 = vpop.f32.mrb[33].mxu0 }
 0x13c   : > { %v2315_v43 = vpop.f32.mrb[2].mxu1  ;;  %v2214_v44 = vadd.f32 %v2213_v42, %v2212_v39  ;;  %v2215_v45 = vpop.f32.mrb[34].mxu0 }
 0x13d   : > { %v1637_v46 = vpop.f32.mrb[3].mxu1  ;;  %v2216_v47 = vpop.f32.mrb[35].mxu0 }
 0x13e   : > { %v2334_v35 = vadd.f32 %v2331_v9, %v2214_v44  ;;  %v2217_v38 = vadd.f32 %v2216_v47, %v2215_v45 }
 0x140   : > { %v2337_v48 = vadd.f32 %v2334_v35, %v1634_v40  ;;  %v2352_v49 = vadd.f32 %v2349_v11, %v2217_v38 }
 0x142   : > { %v2318_v50 = vpop.f32.mrb[4].mxu1  ;;  %1681 = vst [vmem:[%s2893_s18] sm:$0xff] %v2337_v48  ;;  %v2355_v51 = vadd.f32 %v2352_v49, %v1637_v46  ;;  %v2218_v53 = vpop.f32.mrb[36].mxu0  ;;  %v1710_v57 = vmul.f32 %v2337_v48, %v2337_v48 }
 0x143   : > { %v1650_v54 = vpop.f32.mrb[5].mxu1  ;;  %v2219_v55 = vpop.f32.mrb[37].mxu0 }
 0x144   : > { %v2319_v56 = vpop.f32.mrb[6].mxu1  ;;  %1682 = vst [vmem:[%s2893_s18 + $0x8] sm:$0xff] %v2355_v51  ;;  %v1697_v58 = vadd.f32 %v2355_v51, %v2337_v48  ;;  %v1711_v59 = vmul.f32 %v2355_v51, %v2355_v51  ;;  %v2220_v41 = vadd.f32 %v2219_v55, %v2218_v53  ;;  %v2221_v52 = vpop.f32.mrb[38].mxu0 }
 0x145   : > { %v1653_v60 = vpop.f32.mrb[7].mxu1  ;;  %v2222_v61 = vpop.f32.mrb[39].mxu0 }
 0x146   : > { %v1718_v62 = vadd.f32 %v1711_v59, %v1710_v57  ;;  %v2325_v63 = vadd.f32 %v2322_v17, %v2220_v41  ;;  %v2223_v0 = vadd.f32 %v2222_v61, %v2221_v52 }
 0x148   : > { %v2328_v1 = vadd.f32 %v2325_v63, %v2314_v37  ;;  %v2343_v2 = vadd.f32 %v2340_v19, %v2223_v0 }
 0x14a   : > { %1683 = vst [vmem:[%s2893_s18 + $0x10] sm:$0xff] %v2328_v1  ;;  %v1698_v3 = vadd.f32 %v2328_v1, %v1697_v58  ;;  %v1712_v4 = vmul.f32 %v2328_v1, %v2328_v1  ;;  %v2346_v5 = vadd.f32 %v2343_v2, %v2315_v43  ;;  %v2224_v6 = vpop.f32.mrb[40].mxu0 }
 0x14b   : > { %v2225_v7 = vpop.f32.mrb[41].mxu0 }
 0x14c   : > { %v1719_v8 = vadd.f32 %v1718_v62, %v1712_v4  ;;  %1684 = vst [vmem:[%s2893_s18 + $0x18] sm:$0xff] %v2346_v5  ;;  %v1699_v9 = vadd.f32 %v2346_v5, %v1698_v3  ;;  %v1713_v10 = vmul.f32 %v2346_v5, %v2346_v5  ;;  %v2226_v11 = vadd.f32 %v2225_v7, %v2224_v6  ;;  %v2227_v12 = vpop.f32.mrb[42].mxu0 }
 0x14d   : > { %v2228_v13 = vpop.f32.mrb[43].mxu0 }
 0x14e   : > { %v1720_v14 = vadd.f32 %v1719_v8, %v1713_v10  ;;  %v2370_v15 = vadd.f32 %v2367_v25, %v2226_v11  ;;  %v2229_v16 = vadd.f32 %v2228_v13, %v2227_v12 }
 0x150   : > { %v2373_v17 = vadd.f32 %v2370_v15, %v1650_v54  ;;  %v2388_v18 = vadd.f32 %v2385_v27, %v2229_v16 }
 0x152   : > { %1685 = vst [vmem:[%s2893_s18 + $0x20] sm:$0xff] %v2373_v17  ;;  %v1700_v19 = vadd.f32 %v2373_v17, %v1699_v9  ;;  %v1714_v20 = vmul.f32 %v2373_v17, %v2373_v17  ;;  %v2391_v21 = vadd.f32 %v2388_v18, %v1653_v60  ;;  %v2230_v22 = vpop.f32.mrb[44].mxu0 }
 0x153   : > { %v2231_v23 = vpop.f32.mrb[45].mxu0 }
 0x154   : > { %v1721_v24 = vadd.f32 %v1720_v14, %v1714_v20  ;;  %1686 = vst [vmem:[%s2893_s18 + $0x28] sm:$0xff] %v2391_v21  ;;  %v1701_v26 = vadd.f32 %v2391_v21, %v1700_v19  ;;  %v1715_v28 = vmul.f32 %v2391_v21, %v2391_v21  ;;  %v2232_v29 = vadd.f32 %v2231_v23, %v2230_v22  ;;  %v2233_v30 = vpop.f32.mrb[46].mxu0 }
 0x155   : > { %v2234_v31 = vpop.f32.mrb[47].mxu0 }
 0x156   : > { %v1722_v32 = vadd.f32 %v1721_v24, %v1715_v28  ;;  %v2361_v25 = vadd.f32 %v2885_v33, %v2232_v29  ;;  %v2235_v34 = vadd.f32 %v2234_v31, %v2233_v30 }
 0x158   : > { %v2364_v27 = vadd.f32 %v2361_v25, %v2318_v50  ;;  %v2379_v37 = vadd.f32 %v2887_v36, %v2235_v34 }
 0x15a   : > { %1687 = vst [vmem:[%s2893_s18 + $0x30] sm:$0xff] %v2364_v27  ;;  %v1702_v39 = vadd.f32 %v2364_v27, %v1701_v26  ;;  %v1716_v40 = vmul.f32 %v2364_v27, %v2364_v27  ;;  %v2382_v42 = vadd.f32 %v2379_v37, %v2319_v56 }
 0x15c   : > { %v1723_v43 = vadd.f32 %v1722_v32, %v1716_v40  ;;  %1688 = vst [vmem:[%s2893_s18 + $0x38] sm:$0xff] %v2382_v42  ;;  %v1703_v44 = vadd.f32 %v2382_v42, %v1702_v39  ;;  %v1717_v45 = vmul.f32 %v2382_v42, %v2382_v42 }
 0x15e   : > { %v1704_v46 = vrot.slane %v1703_v44, 4  ;;  %v1724_v47 = vadd.f32 %v1723_v43, %v1717_v45 }
 0x160   : > { %v1705_v35 = vadd.f32 %v1704_v46, %v1703_v44  ;;  %v1725_v38 = vrot.slane %v1724_v47, 4 }
 0x162   : > { %v1706_v48 = vrot.slane %v1705_v35, 2  ;;  %v1726_v49 = vadd.f32 %v1725_v38, %v1724_v47 }
 0x164   : > { %v1707_v33 = vadd.f32 %v1706_v48, %v1705_v35  ;;  %v1727_v51 = vrot.slane %v1726_v49, 2 }
 0x166   : > { %v1708_v50 = vrot.slane %v1707_v33, 1  ;;  %v1728_v53 = vadd.f32 %v1727_v51, %v1726_v49 }
 0x168   : > { %v1729_v36 = vrot.slane %v1728_v53, 1  ;;  %v1709_v54 = vadd.f32 %v1708_v50, %v1707_v33 }
 0x16a   : > { %v1730_v55 = vadd.f32 %v1729_v36, %v1728_v53 }
 0x16c   : > { %v1732_v56 = vsel %vm1731_vm0, %v1709_v54, %v1730_v55 }
 0x16d   : > { %1733 = vst [vmem:[%s181_s22] sm:$0x3] %v1732_v56 }
 0x16e PF: > { %s14_s12 = sadd.s32 1, %s2531_s12  }
 0x16f   : > { %p11_p4 = scmp.ge.s32.totalorder %s14_s12, 4  }
 0x171   :  { %13 = sbr.rel (!%p11_p4) target bundleno = 1 (0x1), region = 74 }

</bundles_post_ra>
